<compile_context>
chip_gen: v5e
topology: v5e:2x2
jax: 0.10.0
libtpu: 0.0.40
codegen_flags: <defaults>
</compile_context>

<pallas_src>
import functools
import math

import jax
import jax.numpy as jnp
from jax.experimental import pallas as pl
from jax.experimental.pallas import tpu as pltpu


# ----------------------------------------------------------------------------
# Parameters (deterministic, shapes follow the PyTorch module __init__)
# ----------------------------------------------------------------------------
def init_params(key, c_in, c_out, e, nhead):
    ks = jax.random.split(key, 8)

    def u(k, shape, fan_in):
        b = 1.0 / math.sqrt(fan_in)
        return jax.random.uniform(k, shape, jnp.float32, -b, b)

    return dict(
        # channel_adapter: Conv2d(c_in, e, 1, bias=False) -> weight (e, c_in, 1, 1)
        adapt_w=u(ks[0], (e, c_in), c_in),
        # nn.MultiheadAttention(e, nhead): in_proj (3e, e) + bias, out_proj (e, e) + bias
        in_proj_w=u(ks[1], (3 * e, e), e),
        in_proj_b=u(ks[2], (3 * e,), e),
        out_proj_w=u(ks[3], (e, e), e),
        out_proj_b=u(ks[4], (e,), e),
        # fusion_conv: Conv2d(2e, c_in, 1, bias=False) -> weight (c_in, 2e, 1, 1)
        fusion_w=u(ks[5], (c_in, 2 * e), 2 * e),
        # ConvTranspose2d(c_in, c_out, 4, stride=2, padding=1, bias=False)
        deconv_w=u(ks[6], (c_in, c_out, 4, 4), c_in * 16),
        # GroupNorm(1, c_out) defaults
        gn_w=jnp.ones((c_out,), jnp.float32),
        gn_b=jnp.zeros((c_out,), jnp.float32),
    )


# ----------------------------------------------------------------------------
# Fused kernel: adapt -> attention -> fusion -> residual -> deconv -> GN -> LReLU
# ----------------------------------------------------------------------------
def _decoder_block_kernel(x_ref, txt_ref, mbias_ref, wmask_ref,
                          adapt_ref, wqf_ref, bqf_ref, wkv_ref, bkv_ref,
                          wof_ref, wdec_ref, gamma_ref, beta_ref,
                          y_ref, attnw_ref, ctx_ref,
                          *, nhead, height, width, eps=1e-5, slope=0.01):
    f32 = jnp.float32
    bf16 = jnp.bfloat16

    x = x_ref[0]                    # (HW, Cin)   f32 (kept for the residual)
    txt = txt_ref[0]                # (S_pad, E)  bf16
    mask_bias = mbias_ref[0]        # (1, S_pad)  f32: 0 where valid, -1e30 where padded

    hw, c_in = x.shape
    e = wkv_ref.shape[0]
    hd = e // nhead

    # ---- 1x1 channel adapter (bf16 MXU, f32 accumulate) ----
    x_bf = x.astype(bf16)
    xa = jnp.dot(x_bf, adapt_ref[...], preferred_element_type=f32)        # (HW, E)
    xa_bf = xa.astype(bf16)

    # ---- fused [scaled-q | xa@fuse_a] projection (scale + biases folded) ----
    qf = jnp.dot(xa_bf, wqf_ref[...], preferred_element_type=f32) + bqf_ref[...]
    q_bf = qf[:, :e].astype(bf16)                                         # (HW, E)
    skip = qf[:, e:]                                 # (HW, Cin): xa@fuse_a + out_b@fuse_b

    # ---- combined k,v projection of the text ----
    kv = jnp.dot(txt, wkv_ref[...], preferred_element_type=f32) + bkv_ref[...]
    k_bf = kv[:, :e].astype(bf16)
    v_bf = kv[:, e:].astype(bf16)

    # ---- multi-head cross attention: per-head context -> lane slice of scratch ----
    inv_nhead = jnp.float32(1.0 / nhead)
    for h in range(nhead):                           # static unroll; temps die at store
        sl = slice(h * hd, (h + 1) * hd)
        s = jax.lax.dot_general(q_bf[:, sl], k_bf[:, sl],
                                (((1,), (1,)), ((), ())),
                                preferred_element_type=f32)               # (HW, S_pad)
        s = s + mask_bias
        s = s - jnp.max(s, axis=-1, keepdims=True)
        pu = jnp.exp(s)
        den = jnp.sum(pu, axis=-1, keepdims=True)
        r = pl.reciprocal(den, approx=True)
        r = r * (2.0 - den * r)                      # one Newton step -> near-exact probs
        p = pu * r                                                         # (HW, S_pad)

        # accumulate head-averaged attention weights directly in the output ref
        if h == 0:
            acc = p
        else:
            acc = attnw_ref[0] + p
        if h == nhead - 1:
            attnw_ref[0] = acc * inv_nhead
        else:
            attnw_ref[0] = acc

        # per-head context written into its lane slice (no lane concat)
        ctx_ref[:, sl] = jnp.dot(p.astype(bf16), v_bf[:, sl],
                                 preferred_element_type=f32)               # (HW, hd)

    # ---- attention skip term: out-proj folded (exactly, f32) into fuse_b ----
    skip = skip + jnp.dot(ctx_ref[...].astype(bf16), wof_ref[...],
                          preferred_element_type=f32)                      # (HW, Cin)
    xres = x + skip

    # ---- ConvTranspose2d(4, s=2, p=1): one matmul over 9 shifted flat views ----
    xr_bf = xres.astype(bf16)
    zpad = jnp.zeros((width + 1, c_in), bf16)
    xflat = jnp.concatenate([zpad, xr_bf, zpad], axis=0)                   # (HW+2W+2, Cin)
    m_neg = wmask_ref[:, 0:1]                       # (HW,1) bf16: valid when dw == -1
    m_pos = wmask_ref[:, 1:2]                       # (HW,1) bf16: valid when dw == +1
    views = []
    for dh in (-1, 0, 1):
        for dw in (-1, 0, 1):
            start = (width + 1) + dh * width + dw
            v = jax.lax.slice_in_dim(xflat, start, start + hw, axis=0)     # (HW, Cin)
            if dw == -1:
                v = v * m_neg
            elif dw == 1:
                v = v * m_pos
            views.append(v)
    xs = jnp.concatenate(views, axis=-1)                                   # (HW, 9*Cin)
    y = jnp.dot(xs, wdec_ref[...], preferred_element_type=f32)             # (HW, 4*Cout)

    # ---- GroupNorm(1, Cout): one group == whole image (centered stats) + LeakyReLU ----
    n = jnp.float32(hw * y.shape[1])
    mean = jnp.sum(y) / n
    d = y - mean
    var = jnp.sum(d * d) / n
    inv_std = jax.lax.rsqrt(var + eps)
    yn = d * inv_std * gamma_ref[...] + beta_ref[...]
    y_ref[0] = jnp.where(yn >= 0, yn, slope * yn)


# ----------------------------------------------------------------------------
# Wrapper
# ----------------------------------------------------------------------------
@functools.partial(jax.jit, static_argnames=("nhead",))
def decoder_block_forward(x_nchw, encoder_output, attention_mask, params, *, nhead=4):
    B, c_in, H, W = x_nchw.shape
    S, e = encoder_output.shape[1], encoder_output.shape[2]
    assert e % nhead == 0, "nhead must divide text_embed_dim"
    hw = H * W
    hd = e // nhead
    c_out = params["deconv_w"].shape[1]
    s_pad = ((S + 127) // 128) * 128               # lane-dense scores / attnw stores
    bf16 = jnp.bfloat16

    x_tok = jnp.transpose(x_nchw, (0, 2, 3, 1)).reshape(B, hw, c_in).astype(jnp.float32)
    txt = jnp.pad(encoder_output.astype(jnp.float32),
                  ((0, 0), (0, s_pad - S), (0, 0))).astype(bf16)           # (B, S_pad, E)

    # additive key-padding bias, computed once here (hoisted out of the kernel)
    mbias = jnp.where(attention_mask.astype(jnp.float32) > 0.5, 0.0, -1e30)
    mbias = jnp.pad(mbias, ((0, 0), (0, s_pad - S)),
                    constant_values=-1e30).astype(jnp.float32).reshape(B, 1, s_pad)

    # width-boundary masks for the deconv's shifted views (static, per-pixel)
    w_idx = jnp.arange(W, dtype=jnp.int32)
    wmask = jnp.stack([jnp.tile(w_idx >= 1, H),          # valid when dw == -1
                       jnp.tile(w_idx <= W - 2, H)],     # valid when dw == +1
                      axis=1).astype(bf16)                                  # (HW, 2)

    # ---- weight prep / folding (exact, f32) ----
    wq, wk, wv = jnp.split(params["in_proj_w"], 3, axis=0)
    bq, bk, bv = jnp.split(params["in_proj_b"], 3, axis=0)
    scale = 1.0 / math.sqrt(hd)

    fuse_t = params["fusion_w"].T                                           # (2E, Cin)
    fuse_a_t = fuse_t[:e]                                                   # (E, Cin)
    fuse_b_t = fuse_t[e:]                                                   # (E, Cin)

    # fused [scaled q-proj | fuse_a] weight and bias (out_proj bias folded into fuse part)
    wqf = jnp.concatenate([wq.T * scale, fuse_a_t], axis=1).astype(bf16)    # (E, E+Cin)
    fbias = params["out_proj_b"] @ fuse_b_t                                 # (Cin,)
    bqf = jnp.concatenate([bq * scale, fbias]).reshape(1, e + c_in)         # f32

    wkv = jnp.concatenate([wk.T, wv.T], axis=1).astype(bf16)                # (E, 2E)
    bkv = jnp.concatenate([bk, bv]).reshape(1, 2 * e)                       # f32

    # out-projection folded into fuse_b: applied ONCE to the concatenated context
    wof = (params["out_proj_w"].T @ fuse_b_t).astype(bf16)                  # (E, Cin)

    # Pack deconv weights into one (9*Cin, 4*Cout) matrix: rows = 9 shifted input
    # views (dh, dw in {-1,0,1}), cols = 4 output-parity slabs x Cout.
    w = params["deconv_w"]                                                  # (Cin, Cout, 4, 4)

    def tap(par, d):
        if d == 0:
            return 1 if par == 0 else 2
        if d == -1 and par == 0:
            return 3
        if d == 1 and par == 1:
            return 0
        return None

    cols = []
    for ph in (0, 1):
        for pw in (0, 1):
            blocks = []
            for dh in (-1, 0, 1):
                for dw in (-1, 0, 1):
                    kh, kw = tap(ph, dh), tap(pw, dw)
                    if kh is None or kw is None:
                        blocks.append(jnp.zeros((c_in, c_out), w.dtype))
                    else:
                        blocks.append(w[:, :, kh, kw])
            cols.append(jnp.concatenate(blocks, axis=0))                    # (9*Cin, Cout)
    w_dec = jnp.concatenate(cols, axis=1).astype(bf16)                      # (9*Cin, 4*Cout)

    gamma = jnp.tile(params["gn_w"], 4).reshape(1, 4 * c_out)
    beta = jnp.tile(params["gn_b"], 4).reshape(1, 4 * c_out)

    def full(shape):
        return pl.BlockSpec(shape, lambda b, _n=len(shape): (0,) * _n)

    y_flat, attnw_pad = pl.pallas_call(
        functools.partial(_decoder_block_kernel, nhead=nhead, height=H, width=W),
        out_shape=(jax.ShapeDtypeStruct((B, hw, 4 * c_out), jnp.float32),
                   jax.ShapeDtypeStruct((B, hw, s_pad), jnp.float32)),
        grid=(B,),
        in_specs=[
            pl.BlockSpec((1, hw, c_in), lambda b: (b, 0, 0)),
            pl.BlockSpec((1, s_pad, e), lambda b: (b, 0, 0)),
            pl.BlockSpec((1, 1, s_pad), lambda b: (b, 0, 0)),
            full((hw, 2)),
            full((c_in, e)),
            full((e, e + c_in)),
            full((1, e + c_in)),
            full((e, 2 * e)),
            full((1, 2 * e)),
            full((e, c_in)),
            full((9 * c_in, 4 * c_out)),
            full((1, 4 * c_out)),
            full((1, 4 * c_out)),
        ],
        out_specs=(pl.BlockSpec((1, hw, 4 * c_out), lambda b: (b, 0, 0)),
                   pl.BlockSpec((1, hw, s_pad), lambda b: (b, 0, 0))),
        scratch_shapes=[pltpu.VMEM((hw, e), jnp.float32)],
        compiler_params=pltpu.CompilerParams(
            dimension_semantics=("parallel",),          # megacore: shard B over TCs
            vmem_limit_bytes=64 * 1024 * 1024),
    )(x_tok, txt, mbias, wmask,
      params["adapt_w"].T.astype(bf16),
      wqf, bqf, wkv, bkv, wof, w_dec, gamma, beta)

    # interleave parity-packed output: y_flat[b, m*W+n, (ph*2+pw)*Cout+c]
    #   -> out[b, c, 2m+ph, 2n+pw]   (pure XLA reshape/transpose, cheap)
    y = y_flat.reshape(B, H, W, 2, 2, c_out)
    y = jnp.transpose(y, (0, 1, 3, 2, 4, 5)).reshape(B, 2 * H, 2 * W, c_out)
    y_nchw = jnp.transpose(y, (0, 3, 1, 2))
    return y_nchw, attnw_pad[:, :, :S]


# ----------------------------------------------------------------------------
# Pure-JAX reference (independent formulation) for a correctness check
# ----------------------------------------------------------------------------
def decoder_block_reference(x_nchw, enc, mask, params, nhead=4):
    hp = jax.lax.Precision.HIGHEST
    B, c_in, H, W = x_nchw.shape
    S = enc.shape[1]
    e = params["adapt_w"].shape[0]
    hw = H * W

    x_tok = jnp.transpose(x_nchw, (0, 2, 3, 1)).reshape(B, hw, c_in)
    xa = jnp.einsum('bnc,ec->bne', x_tok, params["adapt_w"], precision=hp)
    wq, wk, wv = jnp.split(params["in_proj_w"], 3, axis=0)
    bq, bk, bv = jnp.split(params["in_proj_b"], 3, axis=0)
    q = jnp.einsum('bne,fe->bnf', xa, wq, precision=hp) + bq
    k = jnp.einsum('bse,fe->bsf', enc, wk, precision=hp) + bk
    v = jnp.einsum('bse,fe->bsf', enc, wv, precision=hp) + bv
    dh = e // nhead
    qh = q.reshape(B, hw, nhead, dh)
    kh = k.reshape(B, S, nhead, dh)
    vh = v.reshape(B, S, nhead, dh)
    s = jnp.einsum('bnhd,bshd->bhns', qh, kh, precision=hp) / math.sqrt(dh)
    valid = (mask > 0.5)[:, None, None, :]
    s = jnp.where(valid, s, -1e30)
    p = jax.nn.softmax(s, axis=-1)
    attn = jnp.einsum('bhns,bshd->bnhd', p, vh, precision=hp).reshape(B, hw, e)
    attn_out = jnp.einsum('bne,fe->bnf', attn, params["out_proj_w"], precision=hp) \
        + params["out_proj_b"]
    fused = jnp.concatenate([xa, attn_out], axis=-1)
    skip = jnp.einsum('bnf,cf->bnc', fused, params["fusion_w"], precision=hp)
    xres = x_tok + skip
    attn_w = jnp.mean(p, axis=1)

    xr = jnp.transpose(xres.reshape(B, H, W, c_in), (0, 3, 1, 2))
    w = params["deconv_w"]
    c_out = w.shape[1]
    y = jnp.zeros((B, c_out, 2 * H + 2, 2 * W + 2), jnp.float32)
    for kh_ in range(4):
        for kw_ in range(4):
            contrib = jnp.einsum('bchw,cd->bdhw', xr, w[:, :, kh_, kw_], precision=hp)
            y = y.at[:, :, kh_:kh_ + 2 * H:2, kw_:kw_ + 2 * W:2].add(contrib)
    y = y[:, :, 1:1 + 2 * H, 1:1 + 2 * W]
    mean = jnp.mean(y, axis=(1, 2, 3), keepdims=True)
    var = jnp.mean((y - mean) ** 2, axis=(1, 2, 3), keepdims=True)
    yn = (y - mean) * jax.lax.rsqrt(var + 1e-5)
    yn = yn * params["gn_w"][None, :, None, None] + params["gn_b"][None, :, None, None]
    yn = jnp.where(yn >= 0, yn, 0.01 * yn)
    return yn, attn_w


if __name__ == "__main__":
    B, C_IN, C_OUT, H, W = 2, 8, 8, 8, 8
    E, NHEAD, S = 32, 4, 8

    key = jax.random.PRNGKey(0)
    k1, k2, kp = jax.random.split(key, 3)
    x = jax.random.normal(k1, (B, C_IN, H, W), jnp.float32)
    enc = jax.random.normal(k2, (B, S, E), jnp.float32)
    mask = jnp.ones((B, S), jnp.int32).at[:, S - 2:].set(0)   # last 2 tokens padded
    params = init_params(kp, C_IN, C_OUT, E, NHEAD)

    y, attn_w = decoder_block_forward(x, enc, mask, params, nhead=NHEAD)
    jax.block_until_ready((y, attn_w))

    assert y.shape == (B, C_OUT, 2 * H, 2 * W)
    assert attn_w.shape == (B, H * W, S)

    y_ref, aw_ref = decoder_block_reference(x, enc, mask, params, nhead=NHEAD)
    err_y = float(jnp.max(jnp.abs(y - y_ref)))
    err_a = float(jnp.max(jnp.abs(attn_w - aw_ref)))
    # bf16 MXU operands with f32 accumulation: expect ~1e-2 max abs error.
    assert err_y < 5e-2 and err_a < 5e-2, (err_y, err_a)

    print("KERNEL_OK")
</pallas_src>

<mosaic_0001>
module attributes {stable_mosaic.version = 11 : i64} {
  func.func @_decoder_block_kernel(%arg0: i32, %arg1: memref<1x64x8xf32, #tpu.memory_space<vmem>>, %arg2: memref<1x128x32xbf16, #tpu.memory_space<vmem>>, %arg3: memref<1x1x128xf32, #tpu.memory_space<vmem>>, %arg4: memref<64x2xbf16, #tpu.memory_space<vmem>>, %arg5: memref<8x32xbf16, #tpu.memory_space<vmem>>, %arg6: memref<32x40xbf16, #tpu.memory_space<vmem>>, %arg7: memref<1x40xf32, #tpu.memory_space<vmem>>, %arg8: memref<32x64xbf16, #tpu.memory_space<vmem>>, %arg9: memref<1x64xf32, #tpu.memory_space<vmem>>, %arg10: memref<32x8xbf16, #tpu.memory_space<vmem>>, %arg11: memref<72x32xbf16, #tpu.memory_space<vmem>>, %arg12: memref<1x32xf32, #tpu.memory_space<vmem>>, %arg13: memref<1x32xf32, #tpu.memory_space<vmem>>, %arg14: memref<1x64x32xf32, #tpu.memory_space<vmem>>, %arg15: memref<1x64x128xf32, #tpu.memory_space<vmem>>, %arg16: memref<64x32xf32, #tpu.memory_space<vmem>>) attributes {dimension_semantics = [#tpu.dimension_semantics<parallel>], iteration_bounds = array<i64: 2>, scalar_prefetch = 0 : i64, scratch_operands = 1 : i64, tpu.core_type = #tpu.core_type<tc>, window_params = [{transform_indices = @transform_0, window_bounds = array<i64: 1, 64, 8>}, {transform_indices = @transform_1, window_bounds = array<i64: 1, 128, 32>}, {transform_indices = @transform_2, window_bounds = array<i64: 1, 1, 128>}, {pipeline_mode = #tpu.pipeline_mode<synchronous>, transform_indices = @transform_3, window_bounds = array<i64: 64, 2>}, {pipeline_mode = #tpu.pipeline_mode<synchronous>, transform_indices = @transform_4, window_bounds = array<i64: 8, 32>}, {pipeline_mode = #tpu.pipeline_mode<synchronous>, transform_indices = @transform_5, window_bounds = array<i64: 32, 40>}, {pipeline_mode = #tpu.pipeline_mode<synchronous>, transform_indices = @transform_6, window_bounds = array<i64: 1, 40>}, {pipeline_mode = #tpu.pipeline_mode<synchronous>, transform_indices = @transform_7, window_bounds = array<i64: 32, 64>}, {pipeline_mode = #tpu.pipeline_mode<synchronous>, transform_indices = @transform_8, window_bounds = array<i64: 1, 64>}, {pipeline_mode = #tpu.pipeline_mode<synchronous>, transform_indices = @transform_9, window_bounds = array<i64: 32, 8>}, {pipeline_mode = #tpu.pipeline_mode<synchronous>, transform_indices = @transform_10, window_bounds = array<i64: 72, 32>}, {pipeline_mode = #tpu.pipeline_mode<synchronous>, transform_indices = @transform_11, window_bounds = array<i64: 1, 32>}, {pipeline_mode = #tpu.pipeline_mode<synchronous>, transform_indices = @transform_12, window_bounds = array<i64: 1, 32>}, {transform_indices = @transform_13, window_bounds = array<i64: 1, 64, 32>}, {transform_indices = @transform_14, window_bounds = array<i64: 1, 64, 128>}]} {
    %c0 = arith.constant 0 : index
    %c0_0 = arith.constant 0 : index
    %c0_1 = arith.constant 0 : index
    %0 = vector.load %arg1[%c0, %c0_0, %c0_1] : memref<1x64x8xf32, #tpu.memory_space<vmem>>, vector<1x64x8xf32>
    %1 = vector.shape_cast %0 : vector<1x64x8xf32> to vector<64x8xf32>
    %c0_2 = arith.constant 0 : index
    %c0_3 = arith.constant 0 : index
    %c0_4 = arith.constant 0 : index
    %2 = vector.load %arg2[%c0_2, %c0_3, %c0_4] : memref<1x128x32xbf16, #tpu.memory_space<vmem>>, vector<1x128x32xbf16>
    %3 = vector.shape_cast %2 : vector<1x128x32xbf16> to vector<128x32xbf16>
    %c0_5 = arith.constant 0 : index
    %c0_6 = arith.constant 0 : index
    %c0_7 = arith.constant 0 : index
    %4 = vector.load %arg3[%c0_5, %c0_6, %c0_7] : memref<1x1x128xf32, #tpu.memory_space<vmem>>, vector<1x1x128xf32>
    %5 = vector.shape_cast %4 : vector<1x1x128xf32> to vector<1x128xf32>
    %6 = arith.truncf %1 : vector<64x8xf32> to vector<64x8xbf16>
    %c0_8 = arith.constant 0 : index
    %c0_9 = arith.constant 0 : index
    %7 = vector.load %arg5[%c0_8, %c0_9] : memref<8x32xbf16, #tpu.memory_space<vmem>>, vector<8x32xbf16>
    %cst = arith.constant dense<0.000000e+00> : vector<64x32xf32>
    %8 = tpu.matmul %6, %7, %cst {dimension_numbers = #tpu.dot_dimension_numbers<[1], [0], [0], [1], [0, 0, 1, 1], [], []>} : vector<64x8xbf16>, vector<8x32xbf16>, vector<64x32xf32> -> vector<64x32xf32>
    %9 = arith.truncf %8 : vector<64x32xf32> to vector<64x32xbf16>
    %c0_10 = arith.constant 0 : index
    %c0_11 = arith.constant 0 : index
    %10 = vector.load %arg6[%c0_10, %c0_11] : memref<32x40xbf16, #tpu.memory_space<vmem>>, vector<32x40xbf16>
    %cst_12 = arith.constant dense<0.000000e+00> : vector<64x40xf32>
    %11 = tpu.matmul %9, %10, %cst_12 {dimension_numbers = #tpu.dot_dimension_numbers<[1], [0], [0], [1], [0, 0, 1, 1], [], []>} : vector<64x32xbf16>, vector<32x40xbf16>, vector<64x40xf32> -> vector<64x40xf32>
    %c0_13 = arith.constant 0 : index
    %c0_14 = arith.constant 0 : index
    %12 = vector.load %arg7[%c0_13, %c0_14] : memref<1x40xf32, #tpu.memory_space<vmem>>, vector<1x40xf32>
    %13 = vector.broadcast %12 : vector<1x40xf32> to vector<64x40xf32>
    %14 = arith.addf %11, %13 : vector<64x40xf32>
    %15 = vector.extract_strided_slice %14 {offsets = [0, 0], sizes = [64, 32], strides = [1, 1]} : vector<64x40xf32> to vector<64x32xf32>
    %16 = arith.truncf %15 : vector<64x32xf32> to vector<64x32xbf16>
    %17 = vector.extract_strided_slice %14 {offsets = [0, 32], sizes = [64, 8], strides = [1, 1]} : vector<64x40xf32> to vector<64x8xf32>
    %c0_15 = arith.constant 0 : index
    %c0_16 = arith.constant 0 : index
    %18 = vector.load %arg8[%c0_15, %c0_16] : memref<32x64xbf16, #tpu.memory_space<vmem>>, vector<32x64xbf16>
    %cst_17 = arith.constant dense<0.000000e+00> : vector<128x64xf32>
    %19 = tpu.matmul %3, %18, %cst_17 {dimension_numbers = #tpu.dot_dimension_numbers<[1], [0], [0], [1], [0, 0, 1, 1], [], []>} : vector<128x32xbf16>, vector<32x64xbf16>, vector<128x64xf32> -> vector<128x64xf32>
    %c0_18 = arith.constant 0 : index
    %c0_19 = arith.constant 0 : index
    %20 = vector.load %arg9[%c0_18, %c0_19] : memref<1x64xf32, #tpu.memory_space<vmem>>, vector<1x64xf32>
    %21 = vector.broadcast %20 : vector<1x64xf32> to vector<128x64xf32>
    %22 = arith.addf %19, %21 : vector<128x64xf32>
    %23 = vector.extract_strided_slice %22 {offsets = [0, 0], sizes = [128, 32], strides = [1, 1]} : vector<128x64xf32> to vector<128x32xf32>
    %24 = arith.truncf %23 : vector<128x32xf32> to vector<128x32xbf16>
    %25 = vector.extract_strided_slice %22 {offsets = [0, 32], sizes = [128, 32], strides = [1, 1]} : vector<128x64xf32> to vector<128x32xf32>
    %26 = arith.truncf %25 : vector<128x32xf32> to vector<128x32xbf16>
    %27 = vector.extract_strided_slice %16 {offsets = [0, 0], sizes = [64, 8], strides = [1, 1]} : vector<64x32xbf16> to vector<64x8xbf16>
    %28 = vector.extract_strided_slice %24 {offsets = [0, 0], sizes = [128, 8], strides = [1, 1]} : vector<128x32xbf16> to vector<128x8xbf16>
    %cst_20 = arith.constant dense<0.000000e+00> : vector<64x128xf32>
    %29 = tpu.matmul %27, %28, %cst_20 {dimension_numbers = #tpu.dot_dimension_numbers<[1], [1], [0], [0], [0, 0, 1, 0], [], []>} : vector<64x8xbf16>, vector<128x8xbf16>, vector<64x128xf32> -> vector<64x128xf32>
    %30 = vector.broadcast %5 : vector<1x128xf32> to vector<64x128xf32>
    %31 = arith.addf %29, %30 : vector<64x128xf32>
    %cst_21 = arith.constant dense<0xFF800000> : vector<64xf32>
    %32 = vector.multi_reduction <maximumf>, %31, %cst_21 [1] : vector<64x128xf32> to vector<64xf32>
    %33 = vector.shape_cast %32 : vector<64xf32> to vector<64x1xf32>
    %34 = vector.broadcast %33 : vector<64x1xf32> to vector<64x128xf32>
    %35 = arith.subf %31, %34 : vector<64x128xf32>
    %36 = math.exp %35 : vector<64x128xf32>
    %cst_22 = arith.constant dense<0.000000e+00> : vector<64xf32>
    %37 = vector.multi_reduction <add>, %36, %cst_22 [1] : vector<64x128xf32> to vector<64xf32>
    %38 = vector.shape_cast %37 : vector<64xf32> to vector<64x1xf32>
    %39 = tpu.reciprocal %38 {approx = true} : vector<64x1xf32> -> vector<64x1xf32>
    %40 = arith.mulf %38, %39 : vector<64x1xf32>
    %cst_23 = arith.constant 2.000000e+00 : f32
    %41 = vector.broadcast %cst_23 : f32 to vector<64x1xf32>
    %42 = arith.subf %41, %40 : vector<64x1xf32>
    %43 = arith.mulf %39, %42 : vector<64x1xf32>
    %44 = vector.broadcast %43 : vector<64x1xf32> to vector<64x128xf32>
    %45 = arith.mulf %36, %44 : vector<64x128xf32>
    %c0_24 = arith.constant 0 : index
    %c0_25 = arith.constant 0 : index
    %c0_26 = arith.constant 0 : index
    %46 = vector.load %arg15[%c0_24, %c0_25, %c0_26] : memref<1x64x128xf32, #tpu.memory_space<vmem>>, vector<1x64x128xf32>
    %47 = vector.shape_cast %46 : vector<1x64x128xf32> to vector<64x128xf32>
    %48 = vector.shape_cast %45 : vector<64x128xf32> to vector<1x64x128xf32>
    tpu.vector_store %arg15[%c0_24, %c0_25, %c0_26], %48 {strides = array<i32>} : memref<1x64x128xf32, #tpu.memory_space<vmem>>, vector<1x64x128xf32>,
    %49 = arith.truncf %45 : vector<64x128xf32> to vector<64x128xbf16>
    %50 = vector.extract_strided_slice %26 {offsets = [0, 0], sizes = [128, 8], strides = [1, 1]} : vector<128x32xbf16> to vector<128x8xbf16>
    %cst_27 = arith.constant dense<0.000000e+00> : vector<64x8xf32>
    %51 = tpu.matmul %49, %50, %cst_27 {dimension_numbers = #tpu.dot_dimension_numbers<[1], [0], [0], [1], [0, 0, 1, 1], [], []>} : vector<64x128xbf16>, vector<128x8xbf16>, vector<64x8xf32> -> vector<64x8xf32>
    %c0_28 = arith.constant 0 : index
    %c0_29 = arith.constant 0 : index
    %52 = vector.load %arg16[%c0_28, %c0_29] : memref<64x32xf32, #tpu.memory_space<vmem>>, vector<64x8xf32>
    tpu.vector_store %arg16[%c0_28, %c0_29], %51 {strides = array<i32>} : memref<64x32xf32, #tpu.memory_space<vmem>>, vector<64x8xf32>,
    %53 = vector.extract_strided_slice %16 {offsets = [0, 8], sizes = [64, 8], strides = [1, 1]} : vector<64x32xbf16> to vector<64x8xbf16>
    %54 = vector.extract_strided_slice %24 {offsets = [0, 8], sizes = [128, 8], strides = [1, 1]} : vector<128x32xbf16> to vector<128x8xbf16>
    %cst_30 = arith.constant dense<0.000000e+00> : vector<64x128xf32>
    %55 = tpu.matmul %53, %54, %cst_30 {dimension_numbers = #tpu.dot_dimension_numbers<[1], [1], [0], [0], [0, 0, 1, 0], [], []>} : vector<64x8xbf16>, vector<128x8xbf16>, vector<64x128xf32> -> vector<64x128xf32>
    %56 = vector.broadcast %5 : vector<1x128xf32> to vector<64x128xf32>
    %57 = arith.addf %55, %56 : vector<64x128xf32>
    %cst_31 = arith.constant dense<0xFF800000> : vector<64xf32>
    %58 = vector.multi_reduction <maximumf>, %57, %cst_31 [1] : vector<64x128xf32> to vector<64xf32>
    %59 = vector.shape_cast %58 : vector<64xf32> to vector<64x1xf32>
    %60 = vector.broadcast %59 : vector<64x1xf32> to vector<64x128xf32>
    %61 = arith.subf %57, %60 : vector<64x128xf32>
    %62 = math.exp %61 : vector<64x128xf32>
    %cst_32 = arith.constant dense<0.000000e+00> : vector<64xf32>
    %63 = vector.multi_reduction <add>, %62, %cst_32 [1] : vector<64x128xf32> to vector<64xf32>
    %64 = vector.shape_cast %63 : vector<64xf32> to vector<64x1xf32>
    %65 = tpu.reciprocal %64 {approx = true} : vector<64x1xf32> -> vector<64x1xf32>
    %66 = arith.mulf %64, %65 : vector<64x1xf32>
    %cst_33 = arith.constant 2.000000e+00 : f32
    %67 = vector.broadcast %cst_33 : f32 to vector<64x1xf32>
    %68 = arith.subf %67, %66 : vector<64x1xf32>
    %69 = arith.mulf %65, %68 : vector<64x1xf32>
    %70 = vector.broadcast %69 : vector<64x1xf32> to vector<64x128xf32>
    %71 = arith.mulf %62, %70 : vector<64x128xf32>
    %c0_34 = arith.constant 0 : index
    %c0_35 = arith.constant 0 : index
    %c0_36 = arith.constant 0 : index
    %72 = vector.load %arg15[%c0_34, %c0_35, %c0_36] : memref<1x64x128xf32, #tpu.memory_space<vmem>>, vector<1x64x128xf32>
    %73 = vector.shape_cast %72 : vector<1x64x128xf32> to vector<64x128xf32>
    %74 = arith.addf %73, %71 : vector<64x128xf32>
    %c0_37 = arith.constant 0 : index
    %c0_38 = arith.constant 0 : index
    %c0_39 = arith.constant 0 : index
    %75 = vector.load %arg15[%c0_37, %c0_38, %c0_39] : memref<1x64x128xf32, #tpu.memory_space<vmem>>, vector<1x64x128xf32>
    %76 = vector.shape_cast %75 : vector<1x64x128xf32> to vector<64x128xf32>
    %77 = vector.shape_cast %74 : vector<64x128xf32> to vector<1x64x128xf32>
    tpu.vector_store %arg15[%c0_37, %c0_38, %c0_39], %77 {strides = array<i32>} : memref<1x64x128xf32, #tpu.memory_space<vmem>>, vector<1x64x128xf32>,
    %78 = arith.truncf %71 : vector<64x128xf32> to vector<64x128xbf16>
    %79 = vector.extract_strided_slice %26 {offsets = [0, 8], sizes = [128, 8], strides = [1, 1]} : vector<128x32xbf16> to vector<128x8xbf16>
    %cst_40 = arith.constant dense<0.000000e+00> : vector<64x8xf32>
    %80 = tpu.matmul %78, %79, %cst_40 {dimension_numbers = #tpu.dot_dimension_numbers<[1], [0], [0], [1], [0, 0, 1, 1], [], []>} : vector<64x128xbf16>, vector<128x8xbf16>, vector<64x8xf32> -> vector<64x8xf32>
    %c0_41 = arith.constant 0 : index
    %c8 = arith.constant 8 : index
    %81 = vector.load %arg16[%c0_41, %c8] : memref<64x32xf32, #tpu.memory_space<vmem>>, vector<64x8xf32>
    tpu.vector_store %arg16[%c0_41, %c8], %80 {strides = array<i32>} : memref<64x32xf32, #tpu.memory_space<vmem>>, vector<64x8xf32>,
    %82 = vector.extract_strided_slice %16 {offsets = [0, 16], sizes = [64, 8], strides = [1, 1]} : vector<64x32xbf16> to vector<64x8xbf16>
    %83 = vector.extract_strided_slice %24 {offsets = [0, 16], sizes = [128, 8], strides = [1, 1]} : vector<128x32xbf16> to vector<128x8xbf16>
    %cst_42 = arith.constant dense<0.000000e+00> : vector<64x128xf32>
    %84 = tpu.matmul %82, %83, %cst_42 {dimension_numbers = #tpu.dot_dimension_numbers<[1], [1], [0], [0], [0, 0, 1, 0], [], []>} : vector<64x8xbf16>, vector<128x8xbf16>, vector<64x128xf32> -> vector<64x128xf32>
    %85 = vector.broadcast %5 : vector<1x128xf32> to vector<64x128xf32>
    %86 = arith.addf %84, %85 : vector<64x128xf32>
    %cst_43 = arith.constant dense<0xFF800000> : vector<64xf32>
    %87 = vector.multi_reduction <maximumf>, %86, %cst_43 [1] : vector<64x128xf32> to vector<64xf32>
    %88 = vector.shape_cast %87 : vector<64xf32> to vector<64x1xf32>
    %89 = vector.broadcast %88 : vector<64x1xf32> to vector<64x128xf32>
    %90 = arith.subf %86, %89 : vector<64x128xf32>
    %91 = math.exp %90 : vector<64x128xf32>
    %cst_44 = arith.constant dense<0.000000e+00> : vector<64xf32>
    %92 = vector.multi_reduction <add>, %91, %cst_44 [1] : vector<64x128xf32> to vector<64xf32>
    %93 = vector.shape_cast %92 : vector<64xf32> to vector<64x1xf32>
    %94 = tpu.reciprocal %93 {approx = true} : vector<64x1xf32> -> vector<64x1xf32>
    %95 = arith.mulf %93, %94 : vector<64x1xf32>
    %cst_45 = arith.constant 2.000000e+00 : f32
    %96 = vector.broadcast %cst_45 : f32 to vector<64x1xf32>
    %97 = arith.subf %96, %95 : vector<64x1xf32>
    %98 = arith.mulf %94, %97 : vector<64x1xf32>
    %99 = vector.broadcast %98 : vector<64x1xf32> to vector<64x128xf32>
    %100 = arith.mulf %91, %99 : vector<64x128xf32>
    %c0_46 = arith.constant 0 : index
    %c0_47 = arith.constant 0 : index
    %c0_48 = arith.constant 0 : index
    %101 = vector.load %arg15[%c0_46, %c0_47, %c0_48] : memref<1x64x128xf32, #tpu.memory_space<vmem>>, vector<1x64x128xf32>
    %102 = vector.shape_cast %101 : vector<1x64x128xf32> to vector<64x128xf32>
    %103 = arith.addf %102, %100 : vector<64x128xf32>
    %c0_49 = arith.constant 0 : index
    %c0_50 = arith.constant 0 : index
    %c0_51 = arith.constant 0 : index
    %104 = vector.load %arg15[%c0_49, %c0_50, %c0_51] : memref<1x64x128xf32, #tpu.memory_space<vmem>>, vector<1x64x128xf32>
    %105 = vector.shape_cast %104 : vector<1x64x128xf32> to vector<64x128xf32>
    %106 = vector.shape_cast %103 : vector<64x128xf32> to vector<1x64x128xf32>
    tpu.vector_store %arg15[%c0_49, %c0_50, %c0_51], %106 {strides = array<i32>} : memref<1x64x128xf32, #tpu.memory_space<vmem>>, vector<1x64x128xf32>,
    %107 = arith.truncf %100 : vector<64x128xf32> to vector<64x128xbf16>
    %108 = vector.extract_strided_slice %26 {offsets = [0, 16], sizes = [128, 8], strides = [1, 1]} : vector<128x32xbf16> to vector<128x8xbf16>
    %cst_52 = arith.constant dense<0.000000e+00> : vector<64x8xf32>
    %109 = tpu.matmul %107, %108, %cst_52 {dimension_numbers = #tpu.dot_dimension_numbers<[1], [0], [0], [1], [0, 0, 1, 1], [], []>} : vector<64x128xbf16>, vector<128x8xbf16>, vector<64x8xf32> -> vector<64x8xf32>
    %c0_53 = arith.constant 0 : index
    %c16 = arith.constant 16 : index
    %110 = vector.load %arg16[%c0_53, %c16] : memref<64x32xf32, #tpu.memory_space<vmem>>, vector<64x8xf32>
    tpu.vector_store %arg16[%c0_53, %c16], %109 {strides = array<i32>} : memref<64x32xf32, #tpu.memory_space<vmem>>, vector<64x8xf32>,
    %111 = vector.extract_strided_slice %16 {offsets = [0, 24], sizes = [64, 8], strides = [1, 1]} : vector<64x32xbf16> to vector<64x8xbf16>
    %112 = vector.extract_strided_slice %24 {offsets = [0, 24], sizes = [128, 8], strides = [1, 1]} : vector<128x32xbf16> to vector<128x8xbf16>
    %cst_54 = arith.constant dense<0.000000e+00> : vector<64x128xf32>
    %113 = tpu.matmul %111, %112, %cst_54 {dimension_numbers = #tpu.dot_dimension_numbers<[1], [1], [0], [0], [0, 0, 1, 0], [], []>} : vector<64x8xbf16>, vector<128x8xbf16>, vector<64x128xf32> -> vector<64x128xf32>
    %114 = vector.broadcast %5 : vector<1x128xf32> to vector<64x128xf32>
    %115 = arith.addf %113, %114 : vector<64x128xf32>
    %cst_55 = arith.constant dense<0xFF800000> : vector<64xf32>
    %116 = vector.multi_reduction <maximumf>, %115, %cst_55 [1] : vector<64x128xf32> to vector<64xf32>
    %117 = vector.shape_cast %116 : vector<64xf32> to vector<64x1xf32>
    %118 = vector.broadcast %117 : vector<64x1xf32> to vector<64x128xf32>
    %119 = arith.subf %115, %118 : vector<64x128xf32>
    %120 = math.exp %119 : vector<64x128xf32>
    %cst_56 = arith.constant dense<0.000000e+00> : vector<64xf32>
    %121 = vector.multi_reduction <add>, %120, %cst_56 [1] : vector<64x128xf32> to vector<64xf32>
    %122 = vector.shape_cast %121 : vector<64xf32> to vector<64x1xf32>
    %123 = tpu.reciprocal %122 {approx = true} : vector<64x1xf32> -> vector<64x1xf32>
    %124 = arith.mulf %122, %123 : vector<64x1xf32>
    %cst_57 = arith.constant 2.000000e+00 : f32
    %125 = vector.broadcast %cst_57 : f32 to vector<64x1xf32>
    %126 = arith.subf %125, %124 : vector<64x1xf32>
    %127 = arith.mulf %123, %126 : vector<64x1xf32>
    %128 = vector.broadcast %127 : vector<64x1xf32> to vector<64x128xf32>
    %129 = arith.mulf %120, %128 : vector<64x128xf32>
    %c0_58 = arith.constant 0 : index
    %c0_59 = arith.constant 0 : index
    %c0_60 = arith.constant 0 : index
    %130 = vector.load %arg15[%c0_58, %c0_59, %c0_60] : memref<1x64x128xf32, #tpu.memory_space<vmem>>, vector<1x64x128xf32>
    %131 = vector.shape_cast %130 : vector<1x64x128xf32> to vector<64x128xf32>
    %132 = arith.addf %131, %129 : vector<64x128xf32>
    %cst_61 = arith.constant 2.500000e-01 : f32
    %133 = vector.broadcast %cst_61 : f32 to vector<64x128xf32>
    %134 = arith.mulf %132, %133 : vector<64x128xf32>
    %c0_62 = arith.constant 0 : index
    %c0_63 = arith.constant 0 : index
    %c0_64 = arith.constant 0 : index
    %135 = vector.load %arg15[%c0_62, %c0_63, %c0_64] : memref<1x64x128xf32, #tpu.memory_space<vmem>>, vector<1x64x128xf32>
    %136 = vector.shape_cast %135 : vector<1x64x128xf32> to vector<64x128xf32>
    %137 = vector.shape_cast %134 : vector<64x128xf32> to vector<1x64x128xf32>
    tpu.vector_store %arg15[%c0_62, %c0_63, %c0_64], %137 {strides = array<i32>} : memref<1x64x128xf32, #tpu.memory_space<vmem>>, vector<1x64x128xf32>,
    %138 = arith.truncf %129 : vector<64x128xf32> to vector<64x128xbf16>
    %139 = vector.extract_strided_slice %26 {offsets = [0, 24], sizes = [128, 8], strides = [1, 1]} : vector<128x32xbf16> to vector<128x8xbf16>
    %cst_65 = arith.constant dense<0.000000e+00> : vector<64x8xf32>
    %140 = tpu.matmul %138, %139, %cst_65 {dimension_numbers = #tpu.dot_dimension_numbers<[1], [0], [0], [1], [0, 0, 1, 1], [], []>} : vector<64x128xbf16>, vector<128x8xbf16>, vector<64x8xf32> -> vector<64x8xf32>
    %c0_66 = arith.constant 0 : index
    %c24 = arith.constant 24 : index
    %141 = vector.load %arg16[%c0_66, %c24] : memref<64x32xf32, #tpu.memory_space<vmem>>, vector<64x8xf32>
    tpu.vector_store %arg16[%c0_66, %c24], %140 {strides = array<i32>} : memref<64x32xf32, #tpu.memory_space<vmem>>, vector<64x8xf32>,
    %c0_67 = arith.constant 0 : index
    %c0_68 = arith.constant 0 : index
    %142 = vector.load %arg16[%c0_67, %c0_68] : memref<64x32xf32, #tpu.memory_space<vmem>>, vector<64x32xf32>
    %143 = arith.truncf %142 : vector<64x32xf32> to vector<64x32xbf16>
    %c0_69 = arith.constant 0 : index
    %c0_70 = arith.constant 0 : index
    %144 = vector.load %arg10[%c0_69, %c0_70] : memref<32x8xbf16, #tpu.memory_space<vmem>>, vector<32x8xbf16>
    %cst_71 = arith.constant dense<0.000000e+00> : vector<64x8xf32>
    %145 = tpu.matmul %143, %144, %cst_71 {dimension_numbers = #tpu.dot_dimension_numbers<[1], [0], [0], [1], [0, 0, 1, 1], [], []>} : vector<64x32xbf16>, vector<32x8xbf16>, vector<64x8xf32> -> vector<64x8xf32>
    %146 = arith.addf %17, %145 : vector<64x8xf32>
    %147 = arith.addf %1, %146 : vector<64x8xf32>
    %148 = arith.truncf %147 : vector<64x8xf32> to vector<64x8xbf16>
    %cst_72 = arith.constant 0.000000e+00 : bf16
    %149 = vector.broadcast %cst_72 : bf16 to vector<9x8xbf16>
    %150 = tpu.concatenate %149, %148, %149 in 0 : vector<9x8xbf16>, vector<64x8xbf16>, vector<9x8xbf16> -> vector<82x8xbf16>
    %c0_73 = arith.constant 0 : index
    %c0_74 = arith.constant 0 : index
    %151 = vector.load %arg4[%c0_73, %c0_74] : memref<64x2xbf16, #tpu.memory_space<vmem>>, vector<64x1xbf16>
    %c0_75 = arith.constant 0 : index
    %c1 = arith.constant 1 : index
    %152 = vector.load %arg4[%c0_75, %c1] : memref<64x2xbf16, #tpu.memory_space<vmem>>, vector<64x1xbf16>
    %153 = vector.extract_strided_slice %150 {offsets = [0, 0], sizes = [64, 8], strides = [1, 1]} : vector<82x8xbf16> to vector<64x8xbf16>
    %154 = vector.broadcast %151 : vector<64x1xbf16> to vector<64x8xbf16>
    %155 = arith.mulf %153, %154 : vector<64x8xbf16>
    %156 = vector.extract_strided_slice %150 {offsets = [1, 0], sizes = [64, 8], strides = [1, 1]} : vector<82x8xbf16> to vector<64x8xbf16>
    %157 = vector.extract_strided_slice %150 {offsets = [2, 0], sizes = [64, 8], strides = [1, 1]} : vector<82x8xbf16> to vector<64x8xbf16>
    %158 = vector.broadcast %152 : vector<64x1xbf16> to vector<64x8xbf16>
    %159 = arith.mulf %157, %158 : vector<64x8xbf16>
    %160 = vector.extract_strided_slice %150 {offsets = [8, 0], sizes = [64, 8], strides = [1, 1]} : vector<82x8xbf16> to vector<64x8xbf16>
    %161 = vector.broadcast %151 : vector<64x1xbf16> to vector<64x8xbf16>
    %162 = arith.mulf %160, %161 : vector<64x8xbf16>
    %163 = vector.extract_strided_slice %150 {offsets = [9, 0], sizes = [64, 8], strides = [1, 1]} : vector<82x8xbf16> to vector<64x8xbf16>
    %164 = vector.extract_strided_slice %150 {offsets = [10, 0], sizes = [64, 8], strides = [1, 1]} : vector<82x8xbf16> to vector<64x8xbf16>
    %165 = vector.broadcast %152 : vector<64x1xbf16> to vector<64x8xbf16>
    %166 = arith.mulf %164, %165 : vector<64x8xbf16>
    %167 = vector.extract_strided_slice %150 {offsets = [16, 0], sizes = [64, 8], strides = [1, 1]} : vector<82x8xbf16> to vector<64x8xbf16>
    %168 = vector.broadcast %151 : vector<64x1xbf16> to vector<64x8xbf16>
    %169 = arith.mulf %167, %168 : vector<64x8xbf16>
    %170 = vector.extract_strided_slice %150 {offsets = [17, 0], sizes = [64, 8], strides = [1, 1]} : vector<82x8xbf16> to vector<64x8xbf16>
    %171 = vector.extract_strided_slice %150 {offsets = [18, 0], sizes = [64, 8], strides = [1, 1]} : vector<82x8xbf16> to vector<64x8xbf16>
    %172 = vector.broadcast %152 : vector<64x1xbf16> to vector<64x8xbf16>
    %173 = arith.mulf %171, %172 : vector<64x8xbf16>
    %174 = tpu.concatenate %155, %156, %159, %162, %163, %166, %169, %170, %173 in 1 : vector<64x8xbf16>, vector<64x8xbf16>, vector<64x8xbf16>, vector<64x8xbf16>, vector<64x8xbf16>, vector<64x8xbf16>, vector<64x8xbf16>, vector<64x8xbf16>, vector<64x8xbf16> -> vector<64x72xbf16>
    %c0_76 = arith.constant 0 : index
    %c0_77 = arith.constant 0 : index
    %175 = vector.load %arg11[%c0_76, %c0_77] : memref<72x32xbf16, #tpu.memory_space<vmem>>, vector<72x32xbf16>
    %cst_78 = arith.constant dense<0.000000e+00> : vector<64x32xf32>
    %176 = tpu.matmul %174, %175, %cst_78 {dimension_numbers = #tpu.dot_dimension_numbers<[1], [0], [0], [1], [0, 0, 1, 1], [], []>} : vector<64x72xbf16>, vector<72x32xbf16>, vector<64x32xf32> -> vector<64x32xf32>
    %177 = vector.shape_cast %176 : vector<64x32xf32> to vector<1x64x32xf32>
    %cst_79 = arith.constant dense<0.000000e+00> : vector<1xf32>
    %178 = vector.multi_reduction <add>, %177, %cst_79 [1, 2] : vector<1x64x32xf32> to vector<1xf32>
    %179 = vector.shape_cast %178 : vector<1xf32> to vector<1x1x1xf32>
    %180 = vector.extract %179[0, 0, 0] : f32 from vector<1x1x1xf32>
    %cst_80 = arith.constant 2.048000e+03 : f32
    %181 = arith.divf %180, %cst_80 : f32
    %182 = vector.broadcast %181 : f32 to vector<64x32xf32>
    %183 = arith.subf %176, %182 : vector<64x32xf32>
    %184 = arith.mulf %183, %183 : vector<64x32xf32>
    %185 = vector.shape_cast %184 : vector<64x32xf32> to vector<1x64x32xf32>
    %cst_81 = arith.constant dense<0.000000e+00> : vector<1xf32>
    %186 = vector.multi_reduction <add>, %185, %cst_81 [1, 2] : vector<1x64x32xf32> to vector<1xf32>
    %187 = vector.shape_cast %186 : vector<1xf32> to vector<1x1x1xf32>
    %188 = vector.extract %187[0, 0, 0] : f32 from vector<1x1x1xf32>
    %cst_82 = arith.constant 2.048000e+03 : f32
    %189 = arith.divf %188, %cst_82 : f32
    %cst_83 = arith.constant 9.99999974E-6 : f32
    %190 = arith.addf %189, %cst_83 : f32
    %191 = math.rsqrt %190 : f32
    %192 = vector.broadcast %191 : f32 to vector<64x32xf32>
    %193 = arith.mulf %183, %192 : vector<64x32xf32>
    %c0_84 = arith.constant 0 : index
    %c0_85 = arith.constant 0 : index
    %194 = vector.load %arg12[%c0_84, %c0_85] : memref<1x32xf32, #tpu.memory_space<vmem>>, vector<1x32xf32>
    %195 = vector.broadcast %194 : vector<1x32xf32> to vector<64x32xf32>
    %196 = arith.mulf %193, %195 : vector<64x32xf32>
    %c0_86 = arith.constant 0 : index
    %c0_87 = arith.constant 0 : index
    %197 = vector.load %arg13[%c0_86, %c0_87] : memref<1x32xf32, #tpu.memory_space<vmem>>, vector<1x32xf32>
    %198 = vector.broadcast %197 : vector<1x32xf32> to vector<64x32xf32>
    %199 = arith.addf %196, %198 : vector<64x32xf32>
    %cst_88 = arith.constant 0.000000e+00 : f32
    %200 = vector.broadcast %cst_88 : f32 to vector<64x32xf32>
    %201 = arith.cmpf oge, %199, %200 : vector<64x32xf32>
    %cst_89 = arith.constant 0.00999999977 : f32
    %202 = vector.broadcast %cst_89 : f32 to vector<64x32xf32>
    %203 = arith.mulf %202, %199 : vector<64x32xf32>
    %204 = arith.select %201, %199, %203 : vector<64x32xi1>, vector<64x32xf32>
    %c0_90 = arith.constant 0 : index
    %c0_91 = arith.constant 0 : index
    %c0_92 = arith.constant 0 : index
    %205 = vector.load %arg14[%c0_90, %c0_91, %c0_92] : memref<1x64x32xf32, #tpu.memory_space<vmem>>, vector<1x64x32xf32>
    %206 = vector.shape_cast %205 : vector<1x64x32xf32> to vector<64x32xf32>
    %207 = vector.shape_cast %204 : vector<64x32xf32> to vector<1x64x32xf32>
    tpu.vector_store %arg14[%c0_90, %c0_91, %c0_92], %207 {strides = array<i32>} : memref<1x64x32xf32, #tpu.memory_space<vmem>>, vector<1x64x32xf32>,
    return
  }
  func.func @transform_0(%arg0: i32) -> (i32, i32, i32) {
    %c0_i32 = arith.constant 0 : i32
    %c0_i32_0 = arith.constant 0 : i32
    %c0_i32_1 = arith.constant 0 : i32
    return %arg0, %c0_i32, %c0_i32_0 : i32, i32, i32
  }
  func.func @transform_1(%arg0: i32) -> (i32, i32, i32) {
    %c0_i32 = arith.constant 0 : i32
    %c0_i32_0 = arith.constant 0 : i32
    %c0_i32_1 = arith.constant 0 : i32
    return %arg0, %c0_i32, %c0_i32_0 : i32, i32, i32
  }
  func.func @transform_2(%arg0: i32) -> (i32, i32, i32) {
    %c0_i32 = arith.constant 0 : i32
    %c0_i32_0 = arith.constant 0 : i32
    %c0_i32_1 = arith.constant 0 : i32
    return %arg0, %c0_i32, %c0_i32_0 : i32, i32, i32
  }
  func.func @transform_3(%arg0: i32) -> (i32, i32) {
    %c0_i32 = arith.constant 0 : i32
    %c0_i32_0 = arith.constant 0 : i32
    %c0_i32_1 = arith.constant 0 : i32
    return %c0_i32, %c0_i32_0 : i32, i32
  }
  func.func @transform_4(%arg0: i32) -> (i32, i32) {
    %c0_i32 = arith.constant 0 : i32
    %c0_i32_0 = arith.constant 0 : i32
    %c0_i32_1 = arith.constant 0 : i32
    return %c0_i32, %c0_i32_0 : i32, i32
  }
  func.func @transform_5(%arg0: i32) -> (i32, i32) {
    %c0_i32 = arith.constant 0 : i32
    %c0_i32_0 = arith.constant 0 : i32
    %c0_i32_1 = arith.constant 0 : i32
    return %c0_i32, %c0_i32_0 : i32, i32
  }
  func.func @transform_6(%arg0: i32) -> (i32, i32) {
    %c0_i32 = arith.constant 0 : i32
    %c0_i32_0 = arith.constant 0 : i32
    %c0_i32_1 = arith.constant 0 : i32
    return %c0_i32, %c0_i32_0 : i32, i32
  }
  func.func @transform_7(%arg0: i32) -> (i32, i32) {
    %c0_i32 = arith.constant 0 : i32
    %c0_i32_0 = arith.constant 0 : i32
    %c0_i32_1 = arith.constant 0 : i32
    return %c0_i32, %c0_i32_0 : i32, i32
  }
  func.func @transform_8(%arg0: i32) -> (i32, i32) {
    %c0_i32 = arith.constant 0 : i32
    %c0_i32_0 = arith.constant 0 : i32
    %c0_i32_1 = arith.constant 0 : i32
    return %c0_i32, %c0_i32_0 : i32, i32
  }
  func.func @transform_9(%arg0: i32) -> (i32, i32) {
    %c0_i32 = arith.constant 0 : i32
    %c0_i32_0 = arith.constant 0 : i32
    %c0_i32_1 = arith.constant 0 : i32
    return %c0_i32, %c0_i32_0 : i32, i32
  }
  func.func @transform_10(%arg0: i32) -> (i32, i32) {
    %c0_i32 = arith.constant 0 : i32
    %c0_i32_0 = arith.constant 0 : i32
    %c0_i32_1 = arith.constant 0 : i32
    return %c0_i32, %c0_i32_0 : i32, i32
  }
  func.func @transform_11(%arg0: i32) -> (i32, i32) {
    %c0_i32 = arith.constant 0 : i32
    %c0_i32_0 = arith.constant 0 : i32
    %c0_i32_1 = arith.constant 0 : i32
    return %c0_i32, %c0_i32_0 : i32, i32
  }
  func.func @transform_12(%arg0: i32) -> (i32, i32) {
    %c0_i32 = arith.constant 0 : i32
    %c0_i32_0 = arith.constant 0 : i32
    %c0_i32_1 = arith.constant 0 : i32
    return %c0_i32, %c0_i32_0 : i32, i32
  }
  func.func @transform_13(%arg0: i32) -> (i32, i32, i32) {
    %c0_i32 = arith.constant 0 : i32
    %c0_i32_0 = arith.constant 0 : i32
    %c0_i32_1 = arith.constant 0 : i32
    return %arg0, %c0_i32, %c0_i32_0 : i32, i32, i32
  }
  func.func @transform_14(%arg0: i32) -> (i32, i32, i32) {
    %c0_i32 = arith.constant 0 : i32
    %c0_i32_0 = arith.constant 0 : i32
    %c0_i32_1 = arith.constant 0 : i32
    return %arg0, %c0_i32, %c0_i32_0 : i32, i32, i32
  }
}

</mosaic_0001>

<bundles_post_ra>
// kernel: tile.23
= control target key start
LH: loop header
LB: loop body
LE: loop exit
PB: predicated region body
PF: predicated region fallthrough
CT: control target
= control target key end

     0   :  { %s29_s0 = inlined_call_operand.vmem [shape: pred[8], index: 0, kind: input, shape index: {}]   ;;  %s30_s1 = inlined_call_operand.vmem [shape: pred[8,8], index: 1, kind: output, shape index: {}]  }
   0x1   :  { %v4_v0 = vld [vmem:[%s29_s0] ss:$0 sm:$0xff] }
   0x2   :  { %v7_v1 = vand.u32 255, %v4_v0 }
   0x4   :  { %v8_v2 = vpack.c.b16 0, %v7_v1 }
   0x6   :  { %v9_v3 = vpack.c.b8 0, %v8_v2 }
   0x8   :  { %12 = vst [vmem:[%s30_s1] sm:$0x3] %v9_v3 }

// kernel: tile.28
= control target key start
LH: loop header
LB: loop body
LE: loop exit
PB: predicated region body
PF: predicated region fallthrough
CT: control target
= control target key end

     0   :  { %s78_s8 = smov 40   ;;  %s79_s9 = smov 24   ;;  %vm18_vm0 = vcmask 64512   ;;  %vm24_vm1 = vcmask 523712   ;;  %vm30_vm2 = vcmask 458112   ;;  %vm36_vm3 = vcmask 392512   ;;  %s100_s0 = inlined_call_operand.vmem [shape: pred[8,8], index: 0, kind: input, shape index: {}]   ;;  %s101_s1 = inlined_call_operand.vmem [shape: pred[64,1], index: 1, kind: output, shape index: {}]  }
   0x1   :  { %v11_v0 = vld [vmem:[%s100_s0] sm:$0x3]  ;;  %s77_s0 = smov 56   ;;  %s80_s10 = smov 48   ;;  %vm42_vm4 = vcmask 326912   ;;  %vm48_vm5 = vcmask 261312  }
   0x2   :  { %v12_v1 = vunpack.c.0.s8 %v11_v0  ;;  %s81_s11 = smov 32   ;;  %s82_s12 = smov 16   ;;  %vm54_vm6 = vcmask 195712   ;;  %vm60_vm7 = vcmask 130112  }
   0x3   :  { %s83_s13 = smov 8  }
   0x4   :  { %16 = vst [vmem:[#allocation1] sm:$0xff] %v12_v1 }
   0xb   :  { %v21_v2 = vld [vmem:[#allocation1 + $0x7] sm:$0x1]   ;;  %v33_v3 = vld [vmem:[#allocation1 + $0x5] sm:$0x1]   ;;  %v45_v4 = vld [vmem:[#allocation1 + $0x3] sm:$0x1]  }
   0xc   :  { %22 = vrot.lane.b32.xlu0 %v21_v2, %s77_s0  ;;  %34 = vrot.lane.b32.xlu1 %v33_v3, %s78_s8  ;;  %v27_v5 = vld [vmem:[#allocation1 + $0x6] sm:$0x1]   ;;  %v39_v6 = vld [vmem:[#allocation1 + $0x4] sm:$0x1]   ;;  %v51_v7 = vld [vmem:[#allocation1 + $0x2] sm:$0x1]  }
   0xd   :  { %46 = vrot.lane.b32.xlu2 %v45_v4, %s79_s9  ;;  %v57_v8 = vld [vmem:[#allocation1 + $0x1] sm:$0x1]   ;;  %v17_v9 = vld [vmem:[#allocation1] sm:$0x1]  }
   0xe   :  { %19 = vst.msk [vmem:[#allocation0] sm:$0x1] %vm18_vm0, %v17_v9  }
  0x14   :  { %28 = vrot.lane.b32.xlu0 %v27_v5, %s80_s10  ;;  %40 = vrot.lane.b32.xlu1 %v39_v6, %s81_s11 }
  0x15   :  { %52 = vrot.lane.b32.xlu2 %v51_v7, %s82_s12 }
  0x1c   :  { %58 = vrot.lane.b32.xlu0 %v57_v8, %s83_s13 }
  0x67   :  { %v47_v10 = vpop.permute.xlu2 %46  }
  0x6f   :  { %v53_v11 = vpop.permute.xlu2 %52  }
  0x7e   :  { %v23_v12 = vpop.permute.xlu0 %22   ;;  %v35_v13 = vpop.permute.xlu1 %34  }
  0x7f   :  { %25 = vst.msk [vmem:[#allocation0] sm:$0x1] %vm24_vm1, %v23_v12  }
  0x86   :  { %v29_v14 = vpop.permute.xlu0 %28   ;;  %v41_v15 = vpop.permute.xlu1 %40  }
  0x87   :  { %31 = vst.msk [vmem:[#allocation0] sm:$0x1] %vm30_vm2, %v29_v14  }
  0x88   :  { %37 = vst.msk [vmem:[#allocation0] sm:$0x1] %vm36_vm3, %v35_v13  }
  0x89   :  { %43 = vst.msk [vmem:[#allocation0] sm:$0x1] %vm42_vm4, %v41_v15  }
  0x8a   :  { %49 = vst.msk [vmem:[#allocation0] sm:$0x1] %vm48_vm5, %v47_v10  }
  0x8b   :  { %55 = vst.msk [vmem:[#allocation0] sm:$0x1] %vm54_vm6, %v53_v11  }
  0x8e   :  { %v59_v16 = vpop.permute.xlu0 %58  }
  0x8f   :  { %61 = vst.msk [vmem:[#allocation0] sm:$0x1] %vm60_vm7, %v59_v16  }
  0x96   :  { %v64_v17 = vld [vmem:[#allocation0] sm:$0xf] }
  0x97   :  { %v67_v18 = vpack.c.b16 0, %v64_v17 }
  0x99   :  { %v68_v19 = vpack.c.b8 0, %v67_v18 }
  0x9b   :  { %69 = vst [vmem:[%s101_s1] sm:$0x1] %v68_v19 }

// kernel: tile.38
= control target key start
LH: loop header
LB: loop body
LE: loop exit
PB: predicated region body
PF: predicated region fallthrough
CT: control target
= control target key end

     0   :  { %s22_s0 = inlined_call_operand.vmem [shape: f32[8], index: 0, kind: input, shape index: {}]   ;;  %s23_s1 = inlined_call_operand.vmem [shape: f32[4,8], index: 1, kind: output, shape index: {}]  }
   0x1   :  { %v4_v0 = vld [vmem:[%s22_s0] ss:$0 sm:$0xff] }
   0x2   :  { %5 = vst [vmem:[%s23_s1] sm:$0xf] %v4_v0 }

// kernel: tile.39
= control target key start
LH: loop header
LB: loop body
LE: loop exit
PB: predicated region body
PF: predicated region fallthrough
CT: control target
= control target key end

     0   :  { %s37_s8 = smov 8   ;;  %s38_s9 = smov 16   ;;  %vm7_vm0 = vcmask 64512   ;;  %vm13_vm1 = vcmask 261312   ;;  %vm19_vm2 = vcmask 195712   ;;  %vm25_vm3 = vcmask 130112   ;;  %s55_s0 = inlined_call_operand.vmem [shape: f32[4,8], index: 0, kind: input, shape index: {}]   ;;  %s56_s1 = inlined_call_operand.vmem [shape: f32[1,32], index: 1, kind: output, shape index: {}]  }
   0x1   :  { %v4_v0 = vld [vmem:[%s55_s0] sm:$0xf]  ;;  %s36_s0 = smov 24  }
   0x2   :  { %5 = vst [vmem:[#allocation1] sm:$0xf] %v4_v0 }
   0x9   :  { %v10_v1 = vld [vmem:[#allocation1 + $0x3] sm:$0x1]   ;;  %v22_v2 = vld [vmem:[#allocation1 + $0x1] sm:$0x1]   ;;  %v16_v3 = vld [vmem:[#allocation1 + $0x2] sm:$0x1]  }
   0xa   :  { %11 = vrot.lane.b32.xlu0 %v10_v1, %s36_s0  ;;  %23 = vrot.lane.b32.xlu1 %v22_v2, %s37_s8  ;;  %v6_v4 = vld [vmem:[#allocation1] sm:$0x1]  }
   0xb   :  { %8 = vst.msk [vmem:[#allocation0] sm:$0x1] %vm7_vm0, %v6_v4  }
  0x12   :  { %17 = vrot.lane.b32.xlu0 %v16_v3, %s38_s9 }
  0x7c   :  { %v12_v5 = vpop.permute.xlu0 %11   ;;  %v24_v6 = vpop.permute.xlu1 %23  }
  0x7d   :  { %14 = vst.msk [vmem:[#allocation0] sm:$0x1] %vm13_vm1, %v12_v5  }
  0x84   :  { %v18_v7 = vpop.permute.xlu0 %17  }
  0x85   :  { %20 = vst.msk [vmem:[#allocation0] sm:$0x1] %vm19_vm2, %v18_v7  }
  0x86   :  { %26 = vst.msk [vmem:[#allocation0] sm:$0x1] %vm25_vm3, %v24_v6  }
  0x8d   :  { %v29_v8 = vld [vmem:[#allocation0] sm:$0x1] }
  0x8e   :  { %32 = vst [vmem:[%s56_s1] sm:$0x1] %v29_v8 }

// kernel: decoder_block_forward.1
= control target key start
LH: loop header
LB: loop body
LE: loop exit
PB: predicated region body
PF: predicated region fallthrough
CT: control target
= control target key end

     0   :  { %s3748_s29 = smov 0   ;;  %s5304_s0 = inlined_call_operand.vmem [shape: f32[2,64,8], index: 0, kind: input, shape index: {}]   ;;  %s5305_s1 = inlined_call_operand.vmem [shape: bf16[2,128,32], index: 1, kind: input, shape index: {}]   ;;  %s5306_s2 = inlined_call_operand.vmem [shape: f32[2,1,128], index: 2, kind: input, shape index: {}]   ;;  %s5307_s3 = inlined_call_operand.vmem [shape: bf16[64,2], index: 3, kind: input, shape index: {}]   ;;  %s5308_s4 = inlined_call_operand.vmem [shape: bf16[8,32], index: 4, kind: input, shape index: {}]   ;;  %s5309_s5 = inlined_call_operand.vmem [shape: bf16[32,40], index: 5, kind: input, shape index: {}]   ;;  %s5310_s6 = inlined_call_operand.vmem [shape: f32[1,40], index: 6, kind: input, shape index: {}]   ;;  %s5311_s7 = inlined_call_operand.vmem [shape: bf16[32,64], index: 7, kind: input, shape index: {}]   ;;  %s5312_s8 = inlined_call_operand.vmem [shape: f32[1,64], index: 8, kind: input, shape index: {}]   ;;  %s5313_s9 = inlined_call_operand.vmem [shape: bf16[32,8], index: 9, kind: input, shape index: {}]   ;;  %s5314_s10 = inlined_call_operand.vmem [shape: bf16[72,32], index: 10, kind: input, shape index: {}]   ;;  %s5315_s11 = inlined_call_operand.vmem [shape: f32[1,32], index: 11, kind: input, shape index: {}]   ;;  %s5316_s12 = inlined_call_operand.vmem [shape: f32[1,32], index: 12, kind: input, shape index: {}]   ;;  %s5317_s13 = inlined_call_operand.vmem [shape: f32[2,64,32], index: 13, kind: output, shape index: {0}]   ;;  %s5318_s14 = inlined_call_operand.vmem [shape: f32[2,64,128], index: 14, kind: output, shape index: {1}]  }
   0x1 LB: > { %s3302_s30 = sadd.s32 4294967295, %s3652_s29   ;;  %p3306_p0 = scmp.ge.s32.totalorder %s3652_s29, 1  ;;  %s3652_s29 = sphi %s3748_s29, %s25_s29  }
   0x2   : > { %p433_p1 = scmp.lt.s32.totalorder %s3652_s29, 3 }
   0x4   : > { %p434_p2 = pnand %p3306_p0, %p433_p1 }
   0x6   : > { %437 = sbr.rel (%p434_p2) target bundleno = 2779 (0xadb), region = 72 }
   0xb   : > { %v3444_v0 = vld [vmem:[%s5311_s7 + $0x8] sm:$0xff]  ;;  %p492_p3 = scmp.lt.s32.totalorder %s3302_s30, 1  ;;  %v545_v1 = vld [vmem:[%s5308_s4] sm:$0xf]  ;;  %vm559_vm0 = vcmask 1043456   ;;  %vm616_vm1 = vcmask 261120  }
   0xc   : > { %v3443_v2 = vld [vmem:[%s5311_s7] sm:$0xff]  ;;  %756 = vmatpush.bf16.msra.mxu2 %v3444_v0  ;;  %v561_v3 = vsel %vm559_vm0, %v545_v1, 0  ;;  %vm546_vm2 = vcmask 64512   ;;  %v3442_v24 = vld [vmem:[%s5309_s5 + $0x8] sm:$0xff]  ;;  %s3654_s25 = smov 96   ;;  %s3655_s26 = smov 120  }
   0xd   : > { %s5343_s30 = smov (!%p492_p3, %s3302_s30), 1  ;;  %570 = vmatpush.bf16.msra.mxu0 %v561_v3  ;;  %3451 = vmatpush.bf16.msra.mxu1 %v561_v3  ;;  %v3441_v26 = vld [vmem:[%s5309_s5] sm:$0xff]  ;;  %s3657_s28 = smov 112   ;;  %vm1410_vm3 = vcmask 130112   ;;  %vm1717_vm4 = vcmask 195712   ;;  %vm2032_vm5 = vcmask 261312  }
   0xe   : > { %s3769_s21 = sshll.u32 %s5343_s30, 6  ;;  %s504_s24 = scalar_lea.vmem %s5306_s2, %s5343_s30  ;;  %v3824_v28 = vld [vmem:[%s5312_s8] ss:$0 sm:$0xff]  ;;  %vm2456_vm6 = vcmask 1041408   ;;  %vm2218_vm7 = vsmask.f32 4352 }
   0xf   : > { %s3779_s27 = scalar_lea.vmem %s5305_s1, %s3769_s21  ;;  %s3786_s16 = scalar_lea.vmem %s5304_s0, %s3769_s21  ;;  %vm2259_vm8 = vcmask 1044480   ;;  %vm2615_vm10 = vsmask.f32 7424  ;;  %vm2683_vm11 = vcmask 1046528   ;;  %vm2729_vm12 = vsmask.f32 3328 }
  0x10   : > { %757 = vmatpush.bf16.msra.mxu2 %v3443_v2  ;;  %v3433_v4 = vld [vmem:[%s3779_s27] sm:$0xff]  ;;  %v517_v6 = vld [vmem:[%s3786_s16 + $0x8] sm:$0xff]  ;;  %v518_v8 = vld [vmem:[%s3786_s16 + $0x10] sm:$0xff]  ;;  %s3658_s15 = smov 88   ;;  %s3659_s30 = smov 80   ;;  %vm2893_vm13 = vcmask 130048  }
  0x11   : > { %v516_v5 = vld [vmem:[%s3786_s16] sm:$0xff]  ;;  %v519_v9 = vld [vmem:[%s3786_s16 + $0x18] sm:$0xff]  ;;  %v3434_v10 = vld [vmem:[%s3779_s27 + $0x8] sm:$0xff]  ;;  %635 = vmatpush.bf16.msrb.mxu1 %v3442_v24  ;;  %s3661_s22 = smov 8   ;;  %s3671_s23 = smov 40   ;;  %vm2902_vm14 = vcmask 195584  }
  0x12   : > { %v541_v7 = vpack.c.bf16 %v517_v6, %v516_v5  ;;  %v542_v11 = vpack.c.bf16 %v519_v9, %v518_v8  ;;  %v520_v12 = vld [vmem:[%s3786_s16 + $0x20] sm:$0xff]  ;;  %v521_v13 = vld [vmem:[%s3786_s16 + $0x28] sm:$0xff]  ;;  %v3435_v15 = vld [vmem:[%s3779_s27 + $0x10] sm:$0xff]  ;;  %vm2919_vm15 = vcmask 326656   ;;  %s509_s20 = scalar_lea.vmem %s5317_s13, %s3769_s21 }
  0x13   : > { %3371 = vmatmul.msk.bf16.vlgmr.msra.gmra.mxu2 %vm616_vm1, %v3433_v4  ;;  %v543_v14 = vpack.c.bf16 %v521_v13, %v520_v12  ;;  %v3436_v16 = vld [vmem:[%s3779_s27 + $0x18] sm:$0xff]  ;;  %v522_v17 = vld [vmem:[%s3786_s16 + $0x30] sm:$0xff]  ;;  %v3437_v20 = vld [vmem:[%s3779_s27 + $0x20] sm:$0xff] }
  0x14   : > { %3315 = vmatmul.msk.bf16.vlgmr.msra.gmra.mxu0 %vm546_vm2, %v541_v7  ;;  %v523_v18 = vld [vmem:[%s3786_s16 + $0x38] sm:$0xff]  ;;  %v3438_v21 = vld [vmem:[%s3779_s27 + $0x28] sm:$0xff]  ;;  %v3439_v22 = vld [vmem:[%s3779_s27 + $0x30] sm:$0xff] }
  0x15   : > { %3317 = vmatmul.msk.bf16.vlgmr.msra.gmra.mxu1 %vm546_vm2, %v543_v14  ;;  %v544_v19 = vpack.c.bf16 %v523_v18, %v522_v17  ;;  %v3440_v23 = vld [vmem:[%s3779_s27 + $0x38] sm:$0xff]  ;;  %s3656_s27 = smov 104   ;;  %vm4737_vm9 = vmand %vm2259_vm8, %vm2218_vm7 }
  0x16   : > { %636 = vmatpush.bf16.msrb.mxu1 %v3441_v26 }
  0x23   : > { %3372 = vmatmul.msk.bf16.gmra.mxu2 %vm616_vm1, %v3434_v10 }
  0x24   : > { %3316 = vmatmul.msk.bf16.gmra.mxu0 %vm546_vm2, %v542_v11 }
  0x25   : > { %3318 = vmatmul.msk.bf16.gmra.mxu1 %vm546_vm2, %v544_v19 }
  0x33   : > { %3373 = vmatmul.msk.bf16.gmra.mxu2 %vm616_vm1, %v3435_v15 }
  0x43   : > { %3374 = vmatmul.msk.bf16.gmra.mxu2 %vm616_vm1, %v3436_v16 }
  0x53   : > { %3375 = vmatmul.msk.bf16.gmra.mxu2 %vm616_vm1, %v3437_v20 }
  0x63   : > { %3376 = vmatmul.msk.bf16.gmra.mxu2 %vm616_vm1, %v3438_v21 }
  0x73   : > { %3377 = vmatmul.msk.bf16.gmra.mxu2 %vm616_vm1, %v3439_v22 }
  0x83   : > { %3378 = vmatmul.msk.bf16.gmra.mxu2 %vm616_vm1, %v3440_v23 }
  0x91   : > { %v572_v25 = vpop.f32.mrf.mxu0 }
  0x92   : > { %v582_v47 = vpop.f32.mrf.mxu1 }
  0x96   : > { %v759_v27 = vpop.f32.mrf.mxu2 }
  0x97   : > { %v760_v31 = vadd.f32 %v3824_v28, %v759_v27 }
  0x99   : > { %v574_v29 = vpop.f32.mrf.mxu0  ;;  %v799_v33 = vpack.c.bf16 %v760_v31, %v760_v31 }
  0x9a   : > { %v592_v30 = vpack.c.bf16 %v574_v29, %v572_v25  ;;  %v584_v53 = vpop.f32.mrf.mxu1 }
  0x9b   : > { %v854_v37 = vunpack.c.l.b16 %v799_v33  ;;  %v594_v54 = vpack.c.bf16 %v584_v53, %v582_v47 }
  0x9c   : > { %3327 = vmatmul.msk.bf16.vlgmr.msrb.gmra.mxu1 %vm616_vm1, %v592_v30 }
  0x9e   : > { %v761_v32 = vpop.f32.mrf.mxu2 }
  0x9f   : > { %v762_v34 = vadd.f32 %v3824_v28, %v761_v32 }
  0xa1   : > { %v800_v35 = vpack.c.bf16 %v762_v34, %v762_v34  ;;  %v577_v36 = vpop.f32.mrf.mxu0 }
  0xa2   : > { %v587_v1 = vpop.f32.mrf.mxu1 }
  0xa3   : > { %v855_v38 = vunpack.c.l.b16 %v800_v35 }
  0xa5   : > { %v3829_v39 = vpack.c.b16 %v855_v38, %v854_v37 }
  0xa6   : > { %v764_v40 = vpop.f32.mrf.mxu2 }
  0xa7   : > { %1051 = vrot.lane.b32.xlu0 %v3829_v39, %s3654_s25  ;;  %1120 = vrot.lane.b32.xlu2 %v3829_v39, %s3655_s26  ;;  %v765_v43 = vadd.f32 %v3824_v28, %v764_v40 }
  0xa9   : > { %v579_v41 = vpop.f32.mrf.mxu0  ;;  %v801_v45 = vpack.c.bf16 %v765_v43, %v765_v43 }
  0xaa   : > { %v593_v42 = vpack.c.bf16 %v579_v41, %v577_v36  ;;  %v589_v9 = vpop.f32.mrf.mxu1 }
  0xab   : > { %v856_v49 = vunpack.c.l.b16 %v801_v45  ;;  %v595_v11 = vpack.c.bf16 %v589_v9, %v587_v1 }
  0xac   : > { %3328 = vmatmul.msk.bf16.gmra.mxu1 %vm616_vm1, %v593_v42 }
  0xae   : > { %v766_v44 = vpop.f32.mrf.mxu2 }
  0xaf   : > { %v767_v46 = vadd.f32 %v3824_v28, %v766_v44  ;;  %1734 = vrot.lane.b32.xlu0 %v3829_v39, %s3656_s27 }
  0xb1   : > { %v802_v48 = vpack.c.bf16 %v767_v46, %v767_v46 }
  0xb3   : > { %v857_v50 = vunpack.c.l.b16 %v802_v48 }
  0xb5   : > { %v3840_v51 = vpack.c.b16 %v857_v50, %v856_v49  ;;  %v3933_v49 = vld [vmem:[%s5310_s6] ss:$0 sm:$0xff] }
  0xb6   : > { %v769_v52 = vpop.f32.mrf.mxu2 }
  0xb7   : > { %1122 = vrot.lane.b32.xlu1 %v3840_v51, %s3655_s26  ;;  %1427 = vrot.lane.b32.xlu0 %v3829_v39, %s3657_s28  ;;  %v770_v55 = vadd.f32 %v3824_v28, %v769_v52 }
  0xb9   : > { %v803_v57 = vpack.c.bf16 %v770_v55, %v770_v55 }
  0xbb   : > { %v858_v60 = vunpack.c.l.b16 %v803_v57 }
  0xbc   : > { %3329 = vmatmul.msk.bf16.gmra.mxu1 %vm616_vm1, %v594_v54 }
  0xbe   : > { %v771_v56 = vpop.f32.mrf.mxu2 }
  0xbf   : > { %v772_v58 = vadd.f32 %v3824_v28, %v771_v56  ;;  %1429 = vrot.lane.b32.xlu1 %v3840_v51, %s3657_s28  ;;  %1053 = vrot.lane.b32.xlu0 %v3840_v51, %s3654_s25 }
  0xc1   : > { %v804_v59 = vpack.c.bf16 %v772_v58, %v772_v58 }
  0xc3   : > { %v859_v61 = vunpack.c.l.b16 %v804_v59 }
  0xc5   : > { %v3853_v62 = vpack.c.b16 %v859_v61, %v858_v60 }
  0xc6   : > { %v774_v63 = vpop.f32.mrf.mxu2 }
  0xc7   : > { %1431 = vrot.lane.b32.xlu1 %v3853_v62, %s3657_s28  ;;  %1736 = vrot.lane.b32.xlu0 %v3840_v51, %s3656_s27  ;;  %v775_v0 = vadd.f32 %v3824_v28, %v774_v63 }
  0xc8   : > { %1738 = vrot.lane.b32.xlu2 %v3853_v62, %s3656_s27 }
  0xc9   : > { %v805_v3 = vpack.c.bf16 %v775_v0, %v775_v0 }
  0xcb   : > { %v860_v6 = vunpack.c.l.b16 %v805_v3 }
  0xcc   : > { %3330 = vmatmul.msk.bf16.gmra.mxu1 %vm616_vm1, %v595_v11 }
  0xce   : > { %v776_v2 = vpop.f32.mrf.mxu2 }
  0xcf   : > { %v777_v4 = vadd.f32 %v3824_v28, %v776_v2  ;;  %1124 = vrot.lane.b32.xlu0 %v3853_v62, %s3655_s26 }
  0xd1   : > { %v806_v5 = vpack.c.bf16 %v777_v4, %v777_v4 }
  0xd3   : > { %v861_v7 = vunpack.c.l.b16 %v806_v5 }
  0xd5   : > { %v3865_v8 = vpack.c.b16 %v861_v7, %v860_v6 }
  0xd6   : > { %v779_v10 = vpop.f32.mrf.mxu2 }
  0xd7   : > { %1433 = vrot.lane.b32.xlu1 %v3865_v8, %s3657_s28  ;;  %1055 = vrot.lane.b32.xlu0 %v3853_v62, %s3654_s25  ;;  %v780_v12 = vadd.f32 %v3824_v28, %v779_v10 }
  0xd8   : > { %1126 = vrot.lane.b32.xlu2 %v3865_v8, %s3655_s26 }
  0xd9   : > { %v807_v14 = vpack.c.bf16 %v780_v12, %v780_v12 }
  0xdb   : > { %v862_v17 = vunpack.c.l.b16 %v807_v14 }
  0xde   : > { %v781_v13 = vpop.f32.mrf.mxu2 }
  0xdf   : > { %v782_v15 = vadd.f32 %v3824_v28, %v781_v13  ;;  %1057 = vrot.lane.b32.xlu0 %v3865_v8, %s3654_s25 }
  0xe0   : > { %1740 = vrot.lane.b32.xlu2 %v3865_v8, %s3656_s27 }
  0xe1   : > { %v808_v16 = vpack.c.bf16 %v782_v15, %v782_v15  ;;  %v900_v15 = vsel %vm546_vm2, %v3865_v8, 0 }
  0xe3   : > { %v863_v18 = vunpack.c.l.b16 %v808_v16 }
  0xe5   : > { %v3880_v19 = vpack.c.b16 %v863_v18, %v862_v17 }
  0xe6   : > { %v784_v20 = vpop.f32.mrf.mxu2 }
  0xe7   : > { %1128 = vrot.lane.b32.xlu1 %v3880_v19, %s3655_s26  ;;  %1742 = vrot.lane.b32.xlu0 %v3880_v19, %s3656_s27  ;;  %v785_v21 = vadd.f32 %v3824_v28, %v784_v20  ;;  %v903_v6 = vsel %vm546_vm2, %v3880_v19, 0 }
  0xe8   : > { %1435 = vrot.lane.b32.xlu2 %v3880_v19, %s3657_s28 }
  0xe9   : > { %v809_v23 = vpack.c.bf16 %v785_v21, %v785_v21 }
  0xeb   : > { %v864_v26 = vunpack.c.l.b16 %v809_v23 }
  0xee   : > { %v786_v22 = vpop.f32.mrf.mxu2 }
  0xef   : > { %v787_v24 = vadd.f32 %v3824_v28, %v786_v22  ;;  %1059 = vrot.lane.b32.xlu1 %v3880_v19, %s3654_s25 }
  0xf0   : > { %1333 = vrot.lane.b32.xlu2 %v3880_v19, %s3658_s15 }
  0xf1   : > { %v810_v25 = vpack.c.bf16 %v787_v24, %v787_v24  ;;  %v897_v24 = vsel %vm546_vm2, %v3853_v62, 0 }
  0xf3   : > { %v865_v27 = vunpack.c.l.b16 %v810_v25 }
  0xf5   : > { %v3894_v29 = vpack.c.b16 %v865_v27, %v864_v26 }
  0xf6   : > { %v789_v30 = vpop.f32.mrf.mxu2 }
  0xf7   : > { %1744 = vrot.lane.b32.xlu1 %v3894_v29, %s3656_s27  ;;  %1130 = vrot.lane.b32.xlu0 %v3894_v29, %s3655_s26  ;;  %v790_v31 = vadd.f32 %v3824_v28, %v789_v30  ;;  %v906_v0 = vsel %vm546_vm2, %v3894_v29, 0 }
  0xf8   : > { %1437 = vrot.lane.b32.xlu2 %v3894_v29, %s3657_s28 }
  0xf9   : > { %v811_v33 = vpack.c.bf16 %v790_v31, %v790_v31 }
  0xfb   : > { %v866_v36 = vunpack.c.l.b16 %v811_v33 }
  0xfe   : > { %v791_v32 = vpop.f32.mrf.mxu2 }
  0xff   : > { %v792_v34 = vadd.f32 %v3824_v28, %v791_v32  ;;  %1061 = vrot.lane.b32.xlu0 %v3894_v29, %s3654_s25 }
 0x101   : > { %v812_v35 = vpack.c.bf16 %v792_v34, %v792_v34  ;;  %v3948_v58 = vpop.permute.xlu2 %1120 }
 0x103   : > { %v867_v37 = vunpack.c.l.b16 %v812_v35  ;;  %v894_v35 = vsel %vm546_vm2, %v3840_v51, 0 }
 0x105   : > { %v3906_v38 = vpack.c.b16 %v867_v37, %v866_v36 }
 0x106   : > { %v794_v40 = vpop.f32.mrf.mxu2 }
 0x107   : > { %1132 = vrot.lane.b32.xlu1 %v3906_v38, %s3655_s26  ;;  %1335 = vrot.lane.b32.xlu0 %v3894_v29, %s3658_s15  ;;  %v795_v41 = vadd.f32 %v3824_v28, %v794_v40  ;;  %v909_v54 = vsel %vm546_vm2, %v3906_v38, 0 }
 0x108   : > { %1063 = vrot.lane.b32.xlu2 %v3906_v38, %s3654_s25 }
 0x109   : > { %v813_v42 = vpack.c.bf16 %v795_v41, %v795_v41  ;;  %v891_v41 = vsel %vm546_vm2, %v3829_v39, 0 }
 0x10b   : > { %v868_v45 = vunpack.c.l.b16 %v813_v42 }
 0x10e   : > { %v796_v43 = vpop.f32.mrf.mxu2 }
 0x10f   : > { %v797_v44 = vadd.f32 %v3824_v28, %v796_v43  ;;  %1746 = vrot.lane.b32.xlu1 %v3906_v38, %s3656_s27 }
 0x110   : > { %1337 = vrot.lane.b32.xlu2 %v3906_v38, %s3658_s15 }
 0x111   : > { %v814_v46 = vpack.c.bf16 %v797_v44, %v797_v44 }
 0x113   : > { %v869_v47 = vunpack.c.l.b16 %v814_v46 }
 0x115   : > { %v3920_v48 = vpack.c.b16 %v869_v47, %v868_v45 }
 0x117   : > { %1439 = vrot.lane.b32.xlu1 %v3906_v38, %s3657_s28  ;;  %1065 = vrot.lane.b32.xlu0 %v3920_v48, %s3654_s25  ;;  %v912_v28 = vsel %vm546_vm2, %v3920_v48, 0 }
 0x118   : > { %1748 = vrot.lane.b32.xlu2 %v3920_v48, %s3656_s27  ;;  %914 = vmatpush.bf16.xpose.msra.mxu3 %v912_v28 }
 0x119   : > { %v3935_v50 = vpop.permute.xlu0 %1051  ;;  %v638_v52 = vpop.f32.mrf.mxu1 }
 0x11a   : > { %v3938_v53 = vadd.f32 %v3933_v49, %v638_v52 }
 0x11c   : > { %v658_v55 = vpack.c.bf16 %v3938_v53, %v3938_v53 }
 0x11e   : > { %v826_v60 = vunpack.c.l.b16 %v658_v55 }
 0x11f   : > { %1134 = vrot.lane.b32.xlu1 %v3920_v48, %s3655_s26 }
 0x120   : > { %915 = vmatpush.bf16.xpose.msra.mxu3 %v909_v54 }
 0x121   : > { %v3946_v56 = vpop.permute.xlu0 %1734  ;;  %v640_v57 = vpop.f32.mrf.mxu1 }
 0x122   : > { %v3951_v59 = vadd.f32 %v3933_v49, %v640_v57  ;;  %v3961_v3 = vpop.permute.xlu2 %1738 }
 0x124   : > { %v659_v61 = vpack.c.bf16 %v3951_v59, %v3951_v59 }
 0x126   : > { %v827_v63 = vunpack.c.l.b16 %v659_v61 }
 0x127   : > { %1441 = vrot.lane.b32.xlu1 %v3920_v48, %s3657_s28 }
 0x128   : > { %916 = vmatpush.bf16.xpose.msra.mxu3 %v906_v0  ;;  %v834_v1 = vpack.c.b16 %v827_v63, %v826_v60 }
 0x129   : > { %v3959_v2 = vpop.permute.xlu0 %1427  ;;  %v643_v4 = vpop.f32.mrf.mxu1 }
 0x12a   : > { %1112 = vrot.lane.b32.xlu2 %v834_v1, %s3655_s26  ;;  %v3965_v5 = vadd.f32 %v3933_v49, %v643_v4  ;;  %v3986_v17 = vpop.permute.xlu1 %1122 }
 0x12c   : > { %v660_v7 = vpack.c.bf16 %v3965_v5, %v3965_v5 }
 0x12e   : > { %v828_v13 = vunpack.c.l.b16 %v660_v7 }
 0x12f   : > { %1339 = vrot.lane.b32.xlu1 %v3920_v48, %s3658_s15 }
 0x130   : > { %917 = vmatpush.bf16.xpose.msra.mxu3 %v903_v6 }
 0x131   : > { %v645_v10 = vpop.f32.mrf.mxu1  ;;  %v3976_v11 = vpop.permute.xlu0 %1053 }
 0x132   : > { %v3973_v9 = vpop.permute.xlu2 %1126  ;;  %1726 = vrot.lane.b32.xlu2 %v834_v1, %s3656_s27  ;;  %v3979_v12 = vadd.f32 %v3933_v49, %v645_v10  ;;  %v4002_v27 = vpop.permute.xlu1 %1429 }
 0x134   : > { %v661_v14 = vpack.c.bf16 %v3979_v12, %v3979_v12 }
 0x136   : > { %v829_v16 = vunpack.c.l.b16 %v661_v14 }
 0x137   : > { %1419 = vrot.lane.b32.xlu1 %v834_v1, %s3657_s28 }
 0x138   : > { %918 = vmatpush.bf16.xpose.msra.mxu3 %v900_v15  ;;  %v835_v18 = vpack.c.b16 %v829_v16, %v828_v13 }
 0x139   : > { %v648_v20 = vpop.f32.mrf.mxu1  ;;  %v3992_v22 = vpop.permute.xlu0 %1736 }
 0x13a   : > { %1728 = vrot.lane.b32.xlu0 %v835_v18, %s3656_s27  ;;  %1114 = vrot.lane.b32.xlu2 %v835_v18, %s3655_s26  ;;  %v3990_v21 = vpop.permute.xlu2 %1740  ;;  %v3995_v23 = vadd.f32 %v3933_v49, %v648_v20  ;;  %v4017_v40 = vpop.permute.xlu1 %1431 }
 0x13c   : > { %5325 = vst [vmem:[#allocation3_spill] sm:$0xff] %v3995_v23  ;;  %v662_v25 = vpack.c.bf16 %v3995_v23, %v3995_v23 }
 0x13e   : > { %v830_v31 = vunpack.c.l.b16 %v662_v25 }
 0x13f   : > { %1421 = vrot.lane.b32.xlu1 %v835_v18, %s3657_s28 }
 0x140   : > { %919 = vmatpush.bf16.xpose.msra.mxu3 %v897_v24 }
 0x141   : > { %v650_v26 = vpop.f32.mrf.mxu1  ;;  %v4011_v34 = vpop.permute.xlu0 %1124 }
 0x142   : > { %v4005_v30 = vadd.f32 %v3933_v49, %v650_v26  ;;  %v4009_v33 = vpop.permute.xlu2 %1435 }
 0x144   : > { %v663_v32 = vpack.c.bf16 %v4005_v30, %v4005_v30 }
 0x146   : > { %v831_v36 = vunpack.c.l.b16 %v663_v32 }
 0x148   : > { %920 = vmatpush.bf16.xpose.msra.mxu3 %v894_v35  ;;  %v836_v37 = vpack.c.b16 %v831_v36, %v830_v31 }
 0x149   : > { %v1056_v43 = vpop.permute.xlu0 %1055  ;;  %v4024_v44 = vpop.permute.xlu1 %1433 }
 0x14a   : > { %1116 = vrot.lane.b32.xlu1 %v836_v37, %s3655_s26  ;;  %1730 = vrot.lane.b32.xlu0 %v836_v37, %s3656_s27  ;;  %v4021_v42 = vpop.permute.xlu2 %1333  ;;  %v653_v45 = vpop.f32.mrf.mxu1 }
 0x14b   : > { %v4028_v46 = vadd.f32 %v3933_v49, %v653_v45  ;;  %v1772_v45 = vsel %vm546_vm2, %v3990_v21, 0 }
 0x14d   : > { %5326 = vst [vmem:[#allocation4_spill] sm:$0xff] %v4028_v46  ;;  %v664_v52 = vpack.c.bf16 %v4028_v46, %v4028_v46 }
 0x14f   : > { %v832_v60 = vunpack.c.l.b16 %v664_v52 }
 0x150   : > { %921 = vmatpush.bf16.xpose.msra.mxu3 %v891_v41 }
 0x151   : > { %v1058_v28 = vpop.permute.xlu0 %1057 }
 0x152   : > { %1423 = vrot.lane.b32.xlu1 %v836_v37, %s3657_s28  ;;  %v4030_v47 = vpop.permute.xlu2 %1437  ;;  %v655_v55 = vpop.f32.mrf.mxu1 }
 0x153   : > { %v4035_v57 = vadd.f32 %v3933_v49, %v655_v55 }
 0x155   : > { %5327 = vst [vmem:[#allocation5_spill] sm:$0xff] %v4035_v57  ;;  %v665_v61 = vpack.c.bf16 %v4035_v57, %v4035_v57 }
 0x157   : > { %3379 = vmatmul.msk.bf16.vlgmr.msra.gmra.mxu3 %vm546_vm2, %v834_v1  ;;  %v833_v0 = vunpack.c.l.b16 %v665_v61  ;;  %v1158_v61 = vsel %vm546_vm2, %v3973_v9, 0  ;;  %v1468_v9 = vsel %vm546_vm2, %v4009_v33, 0  ;;  %v4092_v33 = vld [vmem:[%s504_s24] ss:$0 sm:$0xff]  ;;  %s3660_s24 = smov 72  }
 0x159   : > { %v1129_v54 = vpop.permute.xlu1 %1128  ;;  %v837_v1 = vpack.c.b16 %v833_v0, %v832_v60  ;;  %v1743_v4 = vpop.permute.xlu0 %1742  ;;  %v1769_v60 = vsel %vm546_vm2, %v3961_v3, 0  ;;  %v1149_v0 = vsel %vm546_vm2, %v3948_v58, 0 }
 0x15a   : > { %v1775_v36 = vsel %vm546_vm2, %v1743_v4, 0  ;;  %v1161_v21 = vsel %vm546_vm2, %v1129_v54, 0  ;;  %v1471_v54 = vsel %vm546_vm2, %v4030_v47, 0  ;;  %v1465_v47 = vsel %vm546_vm2, %v4024_v44, 0 }
 0x15b   : > { %1118 = vrot.lane.b32.xlu1 %v837_v1, %s3655_s26  ;;  %1732 = vrot.lane.b32.xlu2 %v837_v1, %s3656_s27  ;;  %v1456_v4 = vsel %vm546_vm2, %v3959_v2, 0  ;;  %s4526_s27 = scalar_lea.vmem %s5318_s14, %s3769_s21 }
 0x15c   : > { %1425 = vrot.lane.b32.xlu0 %v837_v1, %s3657_s28  ;;  %s3662_s28 = smov 24  }
 0x161   : > { %v1060_v6 = vpop.permute.xlu1 %1059 }
 0x162   : > { %v1064_v63 = vpop.permute.xlu2 %1063 }
 0x167   : > { %3380 = vmatmul.msk.bf16.gmra.mxu3 %vm546_vm2, %v835_v18 }
 0x169   : > { %v1131_v49 = vpop.permute.xlu0 %1130  ;;  %v1745_v10 = vpop.permute.xlu1 %1744 }
 0x16a   : > { %v1338_v7 = vpop.permute.xlu2 %1337  ;;  %v1778_v31 = vsel %vm546_vm2, %v1745_v10, 0  ;;  %v1164_v55 = vsel %vm546_vm2, %v1131_v49, 0 }
 0x171   : > { %v1062_v15 = vpop.permute.xlu0 %1061 }
 0x172   : > { %v1749_v13 = vpop.permute.xlu2 %1748 }
 0x173   : > { %v1784_v14 = vsel %vm546_vm2, %v1749_v13, 0 }
 0x174   : > { %1786 = vmatpush.bf16.xpose.msrb.mxu2 %v1784_v14 }
 0x177   : > { %3381 = vmatmul.msk.bf16.gmra.mxu3 %vm546_vm2, %v836_v37 }
 0x179   : > { %v1133_v16 = vpop.permute.xlu1 %1132  ;;  %v1336_v20 = vpop.permute.xlu0 %1335 }
 0x17a   : > { %v1167_v41 = vsel %vm546_vm2, %v1133_v16, 0 }
 0x181   : > { %v1747_v24 = vpop.permute.xlu1 %1746 }
 0x182   : > { %v1781_v25 = vsel %vm546_vm2, %v1747_v24, 0 }
 0x183   : > { %1787 = vmatpush.bf16.xpose.msrb.mxu2 %v1781_v25 }
 0x187   : > { %3382 = vmatmul.msk.bf16.gmra.mxu3 %vm546_vm2, %v837_v1 }
 0x189   : > { %v1440_v18 = vpop.permute.xlu1 %1439  ;;  %v1066_v26 = vpop.permute.xlu0 %1065 }
 0x18a   : > { %1075 = vmatpush.bf16.msrb.mxu0 %v1066_v26  ;;  %v1474_v3 = vsel %vm546_vm2, %v1440_v18, 0 }
 0x18b   : > { %1788 = vmatpush.bf16.xpose.msrb.mxu2 %v1778_v31 }
 0x18e   : > { %1076 = vmatpush.bf16.msrb.mxu0 %v1064_v63 }
 0x191   : > { %v1135_v32 = vpop.permute.xlu1 %1134 }
 0x192   : > { %v1170_v35 = vsel %vm546_vm2, %v1135_v32, 0  ;;  %1077 = vmatpush.bf16.msrb.mxu0 %v1062_v15 }
 0x193   : > { %1172 = vmatpush.bf16.xpose.msra.mxu1 %v1170_v35  ;;  %1789 = vmatpush.bf16.xpose.msrb.mxu2 %v1775_v36 }
 0x196   : > { %1078 = vmatpush.bf16.msrb.mxu0 %v1060_v6 }
 0x199   : > { %v1442_v37 = vpop.permute.xlu1 %1441 }
 0x19a   : > { %1079 = vmatpush.bf16.msrb.mxu0 %v1058_v28  ;;  %v1477_v28 = vsel %vm546_vm2, %v1442_v37, 0 }
 0x19b   : > { %1173 = vmatpush.bf16.xpose.msra.mxu1 %v1167_v41  ;;  %1790 = vmatpush.bf16.xpose.msrb.mxu2 %v1772_v45 }
 0x19e   : > { %1080 = vmatpush.bf16.msrb.mxu0 %v1056_v43  ;;  %v1113_v43 = vpop.permute.xlu2 %1112 }
 0x1a1   : > { %v1340_v52 = vpop.permute.xlu1 %1339 }
 0x1a2   : > { %1081 = vmatpush.bf16.msrb.mxu0 %v3976_v11  ;;  %1349 = vmatpush.bf16.msrb.mxu3 %v1340_v52  ;;  %v1766_v11 = vsel %vm546_vm2, %v3992_v22, 0 }
 0x1a3   : > { %1174 = vmatpush.bf16.xpose.msra.mxu1 %v1164_v55  ;;  %1791 = vmatpush.bf16.xpose.msrb.mxu2 %v1769_v60 }
 0x1a6   : > { %1082 = vmatpush.bf16.msrb.mxu0 %v3935_v50  ;;  %1350 = vmatpush.bf16.msrb.mxu3 %v1338_v7  ;;  %v1763_v50 = vsel %vm546_vm2, %v3946_v56, 0  ;;  %v1727_v22 = vpop.permute.xlu2 %1726  ;;  %v1152_v56 = vsel %vm546_vm2, %v3986_v17, 0  ;;  %v1459_v17 = vsel %vm546_vm2, %v4002_v27, 0 }
 0x1a9   : > { %v4095_v1 = vpop.permute.xlu1 %1419 }
 0x1aa   : > { %1479 = vmatpush.bf16.xpose.msra.mxu0 %v1477_v28  ;;  %1351 = vmatpush.bf16.msrb.mxu3 %v1336_v20 }
 0x1ab   : > { %1175 = vmatpush.bf16.xpose.msra.mxu1 %v1161_v21  ;;  %1792 = vmatpush.bf16.xpose.msrb.mxu2 %v1766_v11 }
 0x1ac   : > { %v1729_v63 = vpop.permute.xlu0 %1728 }
 0x1ae   : > { %1352 = vmatpush.bf16.msrb.mxu3 %v4021_v42  ;;  %v1155_v42 = vsel %vm546_vm2, %v4011_v34, 0  ;;  %v1462_v34 = vsel %vm546_vm2, %v4017_v40, 0  ;;  %v1115_v27 = vpop.permute.xlu2 %1114 }
 0x1b1   : > { %v4101_v7 = vpop.permute.xlu1 %1421 }
 0x1b2   : > { %1480 = vmatpush.bf16.xpose.msra.mxu0 %v1474_v3 }
 0x1b3   : > { %1176 = vmatpush.bf16.xpose.msra.mxu1 %v1158_v61  ;;  %1793 = vmatpush.bf16.xpose.msrb.mxu2 %v1763_v50 }
 0x1b6   : > { %v1733_v10 = vpop.permute.xlu2 %1732 }
 0x1ba   : > { %1481 = vmatpush.bf16.xpose.msra.mxu0 %v1471_v54  ;;  %3391 = vmatmul.msk.bf16.vlgmr.msrb.gmra.mxu2 %vm546_vm2, %v1727_v22 }
 0x1bb   : > { %1177 = vmatpush.bf16.xpose.msra.mxu1 %v1155_v42 }
 0x1bc   : > { %v1731_v58 = vpop.permute.xlu0 %1730  ;;  %v1117_v15 = vpop.permute.xlu1 %1116 }
 0x1c2   : > { %1482 = vmatpush.bf16.xpose.msra.mxu0 %v1468_v9 }
 0x1c3   : > { %1178 = vmatpush.bf16.xpose.msra.mxu1 %v1152_v56 }
 0x1c4   : > { %v4108_v20 = vpop.permute.xlu1 %1423 }
 0x1ca   : > { %1483 = vmatpush.bf16.xpose.msra.mxu0 %v1465_v47  ;;  %3392 = vmatmul.msk.bf16.gmra.mxu2 %vm546_vm2, %v1729_v63 }
 0x1cb   : > { %1179 = vmatpush.bf16.xpose.msra.mxu1 %v1149_v0 }
 0x1cd   : > { %v1119_v18 = vpop.permute.xlu1 %1118 }
 0x1ce   : > { %v4118_v41 = vpop.permute.xlu0 %1425 }
 0x1d2   : > { %1484 = vmatpush.bf16.xpose.msra.mxu0 %v1462_v34  ;;  %3383 = vmatmul.msk.bf16.vlgmr.msra.gmra.mxu1 %vm546_vm2, %v1113_v43 }
 0x1da   : > { %1485 = vmatpush.bf16.xpose.msra.mxu0 %v1459_v17  ;;  %v923_v44 = vpop.f32.mrf.mxu3  ;;  %3393 = vmatmul.msk.bf16.gmra.mxu2 %vm546_vm2, %v1731_v58 }
 0x1db   : > { %v924_v40 = vadd.f32 %v4092_v33, %v923_v44 }
 0x1dd   : > { %943 = vmax.xlane.f32.xlu0 %v924_v40 }
 0x1e2   : > { %1486 = vmatpush.bf16.xpose.msra.mxu0 %v1456_v4  ;;  %v925_v6 = vpop.f32.mrf.mxu3  ;;  %3384 = vmatmul.msk.bf16.gmra.mxu1 %vm546_vm2, %v1115_v27 }
 0x1e3   : > { %v926_v49 = vadd.f32 %v4092_v33, %v925_v6 }
 0x1e5   : > { %945 = vmax.xlane.f32.xlu0 %v926_v49 }
 0x1ea   : > { %v928_v13 = vpop.f32.mrf.mxu3  ;;  %3394 = vmatmul.msk.bf16.gmra.mxu2 %vm546_vm2, %v1733_v10 }
 0x1eb   : > { %v929_v14 = vadd.f32 %v4092_v33, %v928_v13 }
 0x1ed   : > { %947 = vmax.xlane.f32.xlu2 %v929_v14 }
 0x1f2   : > { %v930_v16 = vpop.f32.mrf.mxu3  ;;  %3385 = vmatmul.msk.bf16.gmra.mxu1 %vm546_vm2, %v1117_v15 }
 0x1f3   : > { %v931_v2 = vadd.f32 %v4092_v33, %v930_v16 }
 0x1f5   : > { %949 = vmax.xlane.f32.xlu2 %v931_v2 }
 0x1fa   : > { %v933_v24 = vpop.f32.mrf.mxu3 }
 0x1fb   : > { %v934_v25 = vadd.f32 %v4092_v33, %v933_v24 }
 0x1fd   : > { %951 = vmax.xlane.f32.xlu2 %v934_v25 }
 0x202   : > { %v935_v26 = vpop.f32.mrf.mxu3  ;;  %3386 = vmatmul.msk.bf16.gmra.mxu1 %vm546_vm2, %v1119_v18 }
 0x203   : > { %v936_v31 = vadd.f32 %v4092_v33, %v935_v26 }
 0x205   : > { %953 = vmax.xlane.f32.xlu1 %v936_v31 }
 0x20a   : > { %v938_v32 = vpop.f32.mrf.mxu3 }
 0x20b   : > { %v4114_v35 = vadd.f32 %v4092_v33, %v938_v32 }
 0x20d   : > { %955 = vmax.xlane.f32.xlu2 %v4114_v35 }
 0x212   : > { %v940_v36 = vpop.f32.mrf.mxu3 }
 0x213   : > { %v941_v37 = vadd.f32 %v4092_v33, %v940_v36 }
 0x215   : > { %957 = vmax.xlane.f32.xlu0 %v941_v37 }
 0x24f   : > { %v1181_v45 = vpop.f32.mrf.mxu1 }
 0x250   : > { %v4121_v52 = vadd.f32 %v4092_v33, %v1181_v45  ;;  %v944_v55 = vpop.xlane.xlu0 %943 }
 0x251   : > { %v959_v60 = vsub.f32 %v924_v40, %v944_v55 }
 0x252   : > { %1201 = vmax.xlane.f32.xlu1 %v4121_v52 }
 0x253   : > { %v967_v28 = vmul.f32 1.442695, %v959_v60 }
 0x255   : > { %3506 = vpow2.f32 %v967_v28 }
 0x257   : > { %v1183_v21 = vpop.f32.mrf.mxu1 }
 0x258   : > { %v4125_v11 = vadd.f32 %v4092_v33, %v1183_v21  ;;  %v946_v43 = vpop.xlane.xlu0 %945 }
 0x259   : > { %v960_v22 = vsub.f32 %v926_v49, %v946_v43 }
 0x25a   : > { %1203 = vmax.xlane.f32.xlu2 %v4125_v11 }
 0x25b   : > { %v4131_v54 = vpop.eup %3506  ;;  %v969_v42 = vmul.f32 1.442695, %v960_v22 }
 0x25d   : > { %3508 = vpow2.f32 %v969_v42 }
 0x25f   : > { %v1186_v3 = vpop.f32.mrf.mxu1 }
 0x260   : > { %v4129_v61 = vadd.f32 %v4092_v33, %v1186_v3  ;;  %v948_v50 = vpop.xlane.xlu2 %947  ;;  %v1795_v3 = vpop.f32.mrf.mxu2 }
 0x261   : > { %v961_v63 = vsub.f32 %v929_v14, %v948_v50  ;;  %v4184_v50 = vadd.f32 %v4092_v33, %v1795_v3 }
 0x262   : > { %1205 = vmax.xlane.f32.xlu0 %v4129_v61  ;;  %983 = vadd.xlane.f32.xlu2 %v4131_v54 }
 0x263   : > { %v971_v0 = vmul.f32 1.442695, %v961_v63  ;;  %v4142_v44 = vpop.eup %3508 }
 0x265   : > { %3510 = vpow2.f32 %v971_v0 }
 0x267   : > { %v1188_v9 = vpop.f32.mrf.mxu1 }
 0x268   : > { %v4136_v56 = vadd.f32 %v4092_v33, %v1188_v9  ;;  %v950_v47 = vpop.xlane.xlu2 %949 }
 0x269   : > { %v962_v4 = vsub.f32 %v931_v2, %v950_v47 }
 0x26a   : > { %1207 = vmax.xlane.f32.xlu1 %v4136_v56 }
 0x26b   : > { %v973_v6 = vmul.f32 1.442695, %v962_v4  ;;  %v4149_v13 = vpop.eup %3510 }
 0x26f   : > { %v1191_v34 = vpop.f32.mrf.mxu1 }
 0x270   : > { %v4140_v17 = vadd.f32 %v4092_v33, %v1191_v34  ;;  %v952_v58 = vpop.xlane.xlu2 %951 }
 0x271   : > { %v963_v40 = vsub.f32 %v934_v25, %v952_v58 }
 0x272   : > { %985 = vadd.xlane.f32.xlu1 %v4142_v44  ;;  %1209 = vmax.xlane.f32.xlu2 %v4140_v17 }
 0x273   : > { %v975_v27 = vmul.f32 1.442695, %v963_v40 }
 0x275   : > { %3512 = vpow2.f32 %v975_v27 }
 0x276   : > { %3514 = vpow2.f32 %v973_v6 }
 0x277   : > { %v1193_v49 = vpop.f32.mrf.mxu1 }
 0x278   : > { %v4147_v10 = vadd.f32 %v4092_v33, %v1193_v49  ;;  %v954_v15 = vpop.xlane.xlu1 %953 }
 0x279   : > { %v964_v2 = vsub.f32 %v936_v31, %v954_v15 }
 0x27a   : > { %1211 = vmax.xlane.f32.xlu0 %v4147_v10  ;;  %987 = vadd.xlane.f32.xlu2 %v4149_v13 }
 0x27b   : > { %v4153_v14 = vpop.eup %3512  ;;  %v977_v18 = vmul.f32 1.442695, %v964_v2 }
 0x27c   : > { %991 = vadd.xlane.f32.xlu1 %v4153_v14  ;;  %v4156_v16 = vpop.eup %3514 }
 0x27d   : > { %3516 = vpow2.f32 %v977_v18 }
 0x27f   : > { %v1196_v24 = vpop.f32.mrf.mxu1 }
 0x280   : > { %v4160_v25 = vadd.f32 %v4092_v33, %v1196_v24  ;;  %v956_v55 = vpop.xlane.xlu2 %955 }
 0x281   : > { %v965_v60 = vsub.f32 %v4114_v35, %v956_v55  ;;  %v1797_v35 = vpop.f32.mrf.mxu2 }
 0x282   : > { %989 = vadd.xlane.f32.xlu0 %v4156_v16  ;;  %v4194_v47 = vadd.f32 %v4092_v33, %v1797_v35 }
 0x283   : > { %v4163_v45 = vpop.eup %3516 }
 0x287   : > { %v1198_v21 = vpop.f32.mrf.mxu1 }
 0x288   : > { %v958_v26 = vpop.xlane.xlu0 %957  ;;  %v4180_v43 = vadd.f32 %v4092_v33, %v1198_v21 }
 0x289   : > { %v966_v32 = vsub.f32 %v941_v37, %v958_v26  ;;  %v979_v37 = vmul.f32 1.442695, %v965_v60  ;;  %v1800_v22 = vpop.f32.mrf.mxu2 }
 0x28a   : > { %1213 = vmax.xlane.f32.xlu0 %v4160_v25  ;;  %v4200_v58 = vadd.f32 %v4092_v33, %v1800_v22 }
 0x28b   : > { %v981_v36 = vmul.f32 1.442695, %v966_v32 }
 0x28d   : > { %3518 = vpow2.f32 %v981_v36 }
 0x28e   : > { %3520 = vpow2.f32 %v979_v37 }
 0x291   : > { %v1802_v63 = vpop.f32.mrf.mxu2 }
 0x292   : > { %1329 = vrot.lane.b32.xlu2 %v3853_v62, %s3658_s15  ;;  %993 = vadd.xlane.f32.xlu0 %v4163_v45 }
 0x293   : > { %v4170_v31 = vpop.eup %3518 }
 0x294   : > { %v4176_v28 = vpop.eup %3520 }
 0x295   : > { %1331 = vrot.lane.b32.xlu1 %v3865_v8, %s3658_s15 }
 0x299   : > { %v1805_v4 = vpop.f32.mrf.mxu2 }
 0x29a   : > { %997 = vadd.xlane.f32.xlu0 %v4170_v31  ;;  %v4210_v15 = vadd.f32 %v4092_v33, %v1805_v4 }
 0x2a1   : > { %v1807_v21 = vpop.f32.mrf.mxu2 }
 0x2ae   : > { %1327 = vrot.lane.b32.xlu0 %v3840_v51, %s3658_s15 }
 0x2bb   : > { %995 = vadd.xlane.f32.xlu2 %v4176_v28 }
 0x2bf   : > { %1215 = vmax.xlane.f32.xlu1 %v4180_v43 }
 0x2c5   : > { %v4191_v9 = vpop.xlane.xlu1 %1201 }
 0x2c7   : > { %1815 = vmax.xlane.f32.xlu1 %v4184_v50 }
 0x2cd   : > { %v4187_v42 = vpop.xlane.xlu2 %1203 }
 0x2d3   : > { %1325 = vrot.lane.b32.xlu2 %v3829_v39, %s3658_s15  ;;  %s3663_s15 = smov 16  }
 0x2d5   : > { %v984_v0 = vpop.xlane.xlu2 %983  ;;  %v4205_v27 = vpop.xlane.xlu0 %1205 }
 0x2d6   : > { %3522 = vrcp.f32 %v984_v0 }
 0x2d8   : > { %1817 = vmax.xlane.f32.xlu0 %v4194_v47 }
 0x2dc   : > { %v3523_v40 = vpop.eup %3522 }
 0x2dd   : > { %v4197_v34 = vpop.xlane.xlu1 %1207  ;;  %v1007_v2 = vmul.f32 %v3523_v40, %v984_v0 }
 0x2df   : > { %v1015_v24 = vsub.f32 2.0, %v1007_v2  ;;  %v4224_v2 = vadd.f32 %v4092_v33, %v1802_v63  ;;  %v4232_v63 = vadd.f32 %v4092_v33, %v1807_v21 }
 0x2e0   : > { %1819 = vmax.xlane.f32.xlu0 %v4200_v58  ;;  %1646 = vrot.lane.b32.xlu1 %v3920_v48, %s3659_s30 }
 0x2e1   : > { %v1023_v55 = vmul.f32 %v3523_v40, %v1015_v24  ;;  %v1810_v40 = vpop.f32.mrf.mxu2 }
 0x2e3   : > { %v4216_v3 = vmul.f32 %v4131_v54, %v1023_v55 }
 0x2e5   : > { %v986_v6 = vpop.xlane.xlu1 %985  ;;  %v4207_v49 = vpop.xlane.xlu2 %1209 }
 0x2e6   : > { %3524 = vrcp.f32 %v986_v6 }
 0x2e8   : > { %1823 = vmax.xlane.f32.xlu0 %v4210_v15 }
 0x2ec   : > { %v3525_v18 = vpop.eup %3524 }
 0x2ed   : > { %v1008_v26 = vmul.f32 %v3525_v18, %v986_v6  ;;  %v4213_v32 = vpop.xlane.xlu0 %1211  ;;  %v988_v36 = vpop.xlane.xlu2 %987 }
 0x2ee   : > { %3526 = vrcp.f32 %v988_v36 }
 0x2ef   : > { %v1016_v60 = vsub.f32 2.0, %v1008_v26 }
 0x2f1   : > { %v1024_v37 = vmul.f32 %v3525_v18, %v1016_v60  ;;  %v992_v18 = vpop.xlane.xlu1 %991 }
 0x2f3   : > { %v4219_v35 = vmul.f32 %v4142_v44, %v1024_v37 }
 0x2f4   : > { %v3527_v22 = vpop.eup %3526 }
 0x2f5   : > { %v990_v0 = vpop.xlane.xlu0 %989  ;;  %v1047_v4 = vpack.c.bf16 %v4219_v35, %v4216_v3  ;;  %v1009_v6 = vmul.f32 %v3527_v22, %v988_v36 }
 0x2f6   : > { %3528 = vrcp.f32 %v990_v0 }
 0x2f7   : > { %1083 = vmatmul.bf16.vlgmr.msrb.gmra.mxu0 %v1047_v4  ;;  %v1017_v24 = vsub.f32 2.0, %v1009_v6  ;;  %3530 = vrcp.f32 %v992_v18 }
 0x2f9   : > { %v1025_v36 = vmul.f32 %v3527_v22, %v1017_v24 }
 0x2fb   : > { %v4235_v37 = vmul.f32 %v4149_v13, %v1025_v36 }
 0x2fc   : > { %v3529_v26 = vpop.eup %3528  ;;  %1961 = vrot.lane.b32.xlu0 %v3920_v48, %s3660_s24  ;;  %1821 = vmax.xlane.f32.xlu2 %v4224_v2  ;;  %v1812_v48 = vpop.f32.mrf.mxu2 }
 0x2fd   : > { %v1010_v54 = vmul.f32 %v3529_v26, %v990_v0  ;;  %v4229_v44 = vpop.xlane.xlu0 %1213  ;;  %v3531_v6 = vpop.eup %3530  ;;  %v4246_v13 = vadd.f32 %v4092_v33, %v1812_v48 }
 0x2fe   : > { %v1011_v21 = vmul.f32 %v3531_v6, %v992_v18 }
 0x2ff   : > { %v1018_v55 = vsub.f32 2.0, %v1010_v54 }
 0x301   : > { %v1026_v60 = vmul.f32 %v3529_v26, %v1018_v55  ;;  %v1330_v26 = vpop.permute.xlu2 %1329 }
 0x303   : > { %v4238_v4 = vmul.f32 %v4156_v16, %v1026_v60  ;;  %v1019_v16 = vsub.f32 2.0, %v1011_v21 }
 0x304   : > { %1957 = vrot.lane.b32.xlu0 %v3894_v29, %s3660_s24  ;;  %1825 = vmax.xlane.f32.xlu2 %v4232_v63 }
 0x305   : > { %v994_v0 = vpop.xlane.xlu0 %993  ;;  %v1048_v22 = vpack.c.bf16 %v4238_v4, %v4235_v37  ;;  %v1027_v60 = vmul.f32 %v3531_v6, %v1019_v16 }
 0x306   : > { %3532 = vrcp.f32 %v994_v0 }
 0x307   : > { %v1332_v24 = vpop.permute.xlu1 %1331  ;;  %1088 = vmatmul.bf16.gmra.mxu0 %v1048_v22  ;;  %v4250_v46 = vmul.f32 %v4153_v14, %v1027_v60 }
 0x308   : > { %1353 = vmatpush.bf16.msrb.mxu3 %v1332_v24 }
 0x30a   : > { %1829 = vmax.xlane.f32.xlu1 %v4246_v13 }
 0x30c   : > { %v3533_v54 = vpop.eup %3532  ;;  %1354 = vmatpush.bf16.msrb.mxu3 %v1330_v26 }
 0x30d   : > { %v1012_v55 = vmul.f32 %v3533_v54, %v994_v0  ;;  %v998_v22 = vpop.xlane.xlu0 %997 }
 0x30e   : > { %3534 = vrcp.f32 %v998_v22 }
 0x30f   : > { %v1020_v36 = vsub.f32 2.0, %v1012_v55 }
 0x311   : > { %v1028_v57 = vmul.f32 %v3533_v54, %v1020_v36 }
 0x313   : > { %v4253_v18 = vmul.f32 %v4163_v45, %v1028_v57  ;;  %v4266_v57 = vadd.f32 %v4092_v33, %v1810_v40 }
 0x314   : > { %v3535_v14 = vpop.eup %3534 }
 0x315   : > { %v1049_v48 = vpack.c.bf16 %v4253_v18, %v4250_v46  ;;  %v1014_v6 = vmul.f32 %v3535_v14, %v998_v22 }
 0x317   : > { %1093 = vmatmul.bf16.gmra.mxu0 %v1049_v48 }
 0x31c   : > { %1959 = vrot.lane.b32.xlu2 %v3906_v38, %s3660_s24 }
 0x320   : > { %v1328_v21 = vpop.permute.xlu0 %1327 }
 0x321   : > { %1355 = vmatpush.bf16.msrb.mxu3 %v1328_v21  ;;  %v1217_v21 = vsub.f32 %v4121_v52, %v4191_v9 }
 0x323   : > { %1953 = vrot.lane.b32.xlu1 %v3865_v8, %s3660_s24 }
 0x324   : > { %1644 = vrot.lane.b32.xlu2 %v3906_v38, %s3659_s30  ;;  %v1022_v38 = vsub.f32 2.0, %v1014_v6 }
 0x326   : > { %v1030_v26 = vmul.f32 %v3535_v14, %v1022_v38  ;;  %v1225_v14 = vmul.f32 1.442695, %v1217_v21 }
 0x328   : > { %v4281_v36 = vmul.f32 %v4170_v31, %v1030_v26 }
 0x32b   : > { %1951 = vrot.lane.b32.xlu1 %v3853_v62, %s3660_s24 }
 0x32c   : > { %1955 = vrot.lane.b32.xlu2 %v3880_v19, %s3660_s24 }
 0x32e   : > { %1827 = vmax.xlane.f32.xlu0 %v4266_v57  ;;  %v996_v45 = vpop.xlane.xlu2 %995 }
 0x32f   : > { %3536 = vrcp.f32 %v996_v45 }
 0x333   : > { %1636 = vrot.lane.b32.xlu1 %v3853_v62, %s3659_s30 }
 0x334   : > { %1642 = vrot.lane.b32.xlu2 %v3894_v29, %s3659_s30  ;;  %v4285_v29 = vpop.xlane.xlu1 %1215 }
 0x335   : > { %v3537_v0 = vpop.eup %3536 }
 0x336   : > { %v1013_v24 = vmul.f32 %v3537_v0, %v996_v45  ;;  %v1326_v40 = vpop.permute.xlu2 %1325 }
 0x337   : > { %1356 = vmatpush.bf16.msrb.mxu3 %v1326_v40 }
 0x338   : > { %v1021_v16 = vsub.f32 2.0, %v1013_v24 }
 0x33a   : > { %v1029_v54 = vmul.f32 %v3537_v0, %v1021_v16  ;;  %v1222_v16 = vsub.f32 %v4147_v10, %v4213_v32 }
 0x33c   : > { %1949 = vrot.lane.b32.xlu2 %v3840_v51, %s3660_s24  ;;  %v4278_v55 = vmul.f32 %v4176_v28, %v1029_v54  ;;  %v1816_v60 = vpop.xlane.xlu1 %1815  ;;  %v1220_v28 = vsub.f32 %v4136_v56, %v4197_v34  ;;  %v1235_v54 = vmul.f32 1.442695, %v1222_v16 }
 0x33d   : > { %v1831_v56 = vsub.f32 %v4184_v50, %v1816_v60  ;;  %v1224_v60 = vsub.f32 %v4180_v43, %v4285_v29 }
 0x33e   : > { %v1050_v62 = vpack.c.bf16 %v4281_v36, %v4278_v55  ;;  %v1231_v31 = vmul.f32 1.442695, %v1220_v28 }
 0x33f   : > { %v1239_v32 = vmul.f32 1.442695, %v1224_v60 }
 0x340   : > { %1098 = vmatmul.bf16.gmra.mxu0 %v1050_v62  ;;  %3538 = vpow2.f32 %v1231_v31 }
 0x341   : > { %3540 = vpow2.f32 %v1225_v14 }
 0x342   : > { %1640 = vrot.lane.b32.xlu0 %v3880_v19, %s3659_s30  ;;  %v1221_v19 = vsub.f32 %v4140_v17, %v4207_v49  ;;  %v1839_v17 = vmul.f32 1.442695, %v1831_v56  ;;  %v1218_v49 = vsub.f32 %v4125_v11, %v4187_v42 }
 0x344   : > { %v1233_v45 = vmul.f32 1.442695, %v1221_v19 }
 0x346   : > { %3542 = vpow2.f32 %v1233_v45 }
 0x34a   : > { %1638 = vrot.lane.b32.xlu0 %v3865_v8, %s3659_s30  ;;  %v4299_v8 = vpop.eup %3538 }
 0x34b   : > { %v1818_v48 = vpop.xlane.xlu0 %1817  ;;  %v4309_v9 = vpop.eup %3540 }
 0x34c   : > { %v4311_v34 = vpop.eup %3542  ;;  %v1832_v11 = vsub.f32 %v4194_v47, %v1818_v48 }
 0x350   : > { %3387 = vmatmul.msk.bf16.vlgmr.msra.gmra.mxu0 %vm546_vm2, %v4095_v1  ;;  %v1223_v1 = vsub.f32 %v4160_v25, %v4229_v44  ;;  %v1219_v25 = vsub.f32 %v4129_v61, %v4205_v27  ;;  %v1841_v27 = vmul.f32 1.442695, %v1832_v11 }
 0x352   : > { %v1647_v22 = vpop.permute.xlu1 %1646  ;;  %v1237_v52 = vmul.f32 1.442695, %v1223_v1  ;;  %v1229_v44 = vmul.f32 1.442695, %v1219_v25 }
 0x353   : > { %1656 = vmatpush.bf16.msrb.mxu1 %v1647_v22  ;;  %v4301_v6 = vpop.xlane.xlu0 %1819 }
 0x354   : > { %3544 = vpow2.f32 %v1237_v52 }
 0x355   : > { %3546 = vpow2.f32 %v1839_v17 }
 0x35a   : > { %v4321_v38 = vpop.eup %3544 }
 0x35b   : > { %v4319_v50 = vpop.xlane.xlu0 %1823  ;;  %v4323_v0 = vpop.eup %3546 }
 0x35d   : > { %1247 = vadd.xlane.f32.xlu1 %v4299_v8 }
 0x360   : > { %3388 = vmatmul.msk.bf16.gmra.mxu0 %vm546_vm2, %v4101_v7  ;;  %v1227_v7 = vmul.f32 1.442695, %v1218_v49 }
 0x362   : > { %3548 = vpow2.f32 %v1227_v7 }
 0x363   : > { %3550 = vpow2.f32 %v1229_v44 }
 0x364   : > { %3552 = vpow2.f32 %v1841_v27 }
 0x365   : > { %1241 = vadd.xlane.f32.xlu2 %v4309_v9  ;;  %1249 = vadd.xlane.f32.xlu1 %v4311_v34  ;;  %3554 = vpow2.f32 %v1235_v54 }
 0x366   : > { %3556 = vpow2.f32 %v1239_v32 }
 0x368   : > { %v4332_v24 = vpop.eup %3548 }
 0x369   : > { %v4334_v40 = vpop.eup %3550 }
 0x36d   : > { %1855 = vadd.xlane.f32.xlu2 %v4323_v0  ;;  %1253 = vadd.xlane.f32.xlu1 %v4321_v38 }
 0x36e   : > { %v1962_v42 = vpop.permute.xlu0 %1961 }
 0x36f   : > { %1971 = vmatpush.bf16.msra.mxu3 %v1962_v42  ;;  %v4328_v61 = vpop.xlane.xlu2 %1821 }
 0x370   : > { %3389 = vmatmul.msk.bf16.gmra.mxu0 %vm546_vm2, %v4108_v20  ;;  %v4343_v20 = vpop.eup %3552 }
 0x371   : > { %v4351_v28 = vpop.eup %3554 }
 0x372   : > { %v4355_v43 = vpop.eup %3556 }
 0x374   : > { %1243 = vadd.xlane.f32.xlu0 %v4332_v24  ;;  %v1084_v47 = vpop.f32.mrf.mxu0 }
 0x375   : > { %1104 = vst.msk [vmem:[#allocation2] sm:$0xff] %vm546_vm2, %v1084_v47  ;;  %1245 = vadd.xlane.f32.xlu2 %v4334_v40 }
 0x376   : > { %v1958_v31 = vpop.permute.xlu0 %1957 }
 0x377   : > { %v4341_v26 = vpop.xlane.xlu2 %1825 }
 0x37c   : > { %1857 = vadd.xlane.f32.xlu0 %v4343_v20  ;;  %v1086_v62 = vpop.f32.mrf.mxu0 }
 0x37d   : > { %1105 = vst.msk [vmem:[#allocation2 + $0x8] sm:$0xff] %vm546_vm2, %v1086_v62 }
 0x37f   : > { %v1960_v10 = vpop.permute.xlu2 %1959 }
 0x380   : > { %3390 = vmatmul.msk.bf16.gmra.mxu0 %vm546_vm2, %v4118_v41  ;;  %1972 = vmatpush.bf16.msra.mxu3 %v1960_v10  ;;  %v4358_v41 = vpop.xlane.xlu1 %1829 }
 0x384   : > { %1251 = vadd.xlane.f32.xlu0 %v4351_v28  ;;  %v1089_v48 = vpop.f32.mrf.mxu0  ;;  %1973 = vmatpush.bf16.msra.mxu3 %v1958_v31 }
 0x385   : > { %1106 = vst.msk [vmem:[#allocation2 + $0x10] sm:$0xff] %vm546_vm2, %v1089_v48 }
 0x387   : > { %v1645_v22 = vpop.permute.xlu2 %1644 }
 0x388   : > { %1657 = vmatpush.bf16.msrb.mxu1 %v1645_v22 }
 0x38c   : > { %1255 = vadd.xlane.f32.xlu0 %v4355_v43  ;;  %v1091_v29 = vpop.f32.mrf.mxu0 }
 0x38d   : > { %1107 = vst.msk [vmem:[#allocation2 + $0x18] sm:$0xff] %vm546_vm2, %v1091_v29 }
 0x38f   : > { %v1956_v21 = vpop.permute.xlu2 %1955 }
 0x390   : > { %1974 = vmatpush.bf16.msra.mxu3 %v1956_v21 }
 0x394   : > { %v1094_v19 = vpop.f32.mrf.mxu0 }
 0x395   : > { %1108 = vst.msk [vmem:[#allocation2 + $0x20] sm:$0xff] %vm546_vm2, %v1094_v19  ;;  %v1954_v14 = vpop.permute.xlu1 %1953 }
 0x396   : > { %1975 = vmatpush.bf16.msra.mxu3 %v1954_v14 }
 0x397   : > { %v1643_v45 = vpop.permute.xlu2 %1642 }
 0x398   : > { %1658 = vmatpush.bf16.msrb.mxu1 %v1643_v45 }
 0x39c   : > { %v1096_v1 = vpop.f32.mrf.mxu0 }
 0x39d   : > { %1109 = vst.msk [vmem:[#allocation2 + $0x28] sm:$0xff] %vm546_vm2, %v1096_v1  ;;  %v1952_v56 = vpop.permute.xlu1 %1951 }
 0x39e   : > { %1976 = vmatpush.bf16.msra.mxu3 %v1952_v56 }
 0x39f   : > { %v1950_v52 = vpop.permute.xlu2 %1949 }
 0x3a1   : > { %v4363_v17 = vpop.xlane.xlu0 %1827 }
 0x3a2   : > { %1977 = vmatpush.bf16.msra.mxu3 %v1950_v52 }
 0x3a5   : > { %v1637_v44 = vpop.permute.xlu1 %1636 }
 0x3b4   : > { %v1641_v49 = vpop.permute.xlu0 %1640 }
 0x3b5   : > { %1659 = vmatpush.bf16.msrb.mxu1 %v1641_v49 }
 0x3bc   : > { %v1639_v25 = vpop.permute.xlu0 %1638 }
 0x3bd   : > { %v1099_v7 = vpop.f32.mrf.mxu0  ;;  %1660 = vmatpush.bf16.msrb.mxu1 %v1639_v25 }
 0x3be   : > { %1110 = vst.msk [vmem:[#allocation2 + $0x30] sm:$0xff] %vm546_vm2, %v1099_v7 }
 0x3c1   : > { %1661 = vmatpush.bf16.msrb.mxu1 %v1637_v44 }
 0x3c5   : > { %v1101_v11 = vpop.f32.mrf.mxu0 }
 0x3c6   : > { %1111 = vst.msk [vmem:[#allocation2 + $0x38] sm:$0xff] %vm546_vm2, %v1101_v11 }
 0x3cd   : > { %v1488_v42 = vpop.f32.mrf.mxu0 }
 0x3ce   : > { %v4368_v27 = vadd.f32 %v4092_v33, %v1488_v42 }
 0x3d0   : > { %1508 = vmax.xlane.f32.xlu0 %v4368_v27  ;;  %v1248_v19 = vpop.xlane.xlu1 %1247 }
 0x3d5   : > { %v1490_v47 = vpop.f32.mrf.mxu0 }
 0x3d6   : > { %v4372_v16 = vadd.f32 %v4092_v33, %v1490_v47 }
 0x3d8   : > { %1510 = vmax.xlane.f32.xlu1 %v4372_v16  ;;  %v1242_v54 = vpop.xlane.xlu2 %1241 }
 0x3d9   : > { %3558 = vrcp.f32 %v1242_v54 }
 0x3dd   : > { %v1493_v62 = vpop.f32.mrf.mxu0 }
 0x3de   : > { %v4376_v60 = vadd.f32 %v4092_v33, %v1493_v62 }
 0x3df   : > { %v3559_v31 = vpop.eup %3558 }
 0x3e0   : > { %1512 = vmax.xlane.f32.xlu2 %v4376_v60  ;;  %v4379_v10 = vpop.xlane.xlu2 %1855  ;;  %v1265_v29 = vmul.f32 %v3559_v31, %v1242_v54 }
 0x3e2   : > { %v1273_v14 = vsub.f32 2.0, %v1265_v29 }
 0x3e4   : > { %v1281_v49 = vmul.f32 %v3559_v31, %v1273_v14 }
 0x3e5   : > { %v1495_v32 = vpop.f32.mrf.mxu0 }
 0x3e6   : > { %v4382_v48 = vadd.f32 %v4092_v33, %v1495_v32  ;;  %v4392_v47 = vmul.f32 %v4309_v9, %v1281_v49  ;;  %v1250_v9 = vpop.xlane.xlu1 %1249 }
 0x3e7   : > { %v1244_v22 = vpop.xlane.xlu0 %1243 }
 0x3e8   : > { %3560 = vrcp.f32 %v1244_v22  ;;  %1514 = vmax.xlane.f32.xlu1 %v4382_v48  ;;  %v1246_v21 = vpop.xlane.xlu2 %1245 }
 0x3e9   : > { %3562 = vrcp.f32 %v1246_v21 }
 0x3ea   : > { %3564 = vrcp.f32 %v1248_v19 }
 0x3ed   : > { %v1498_v45 = vpop.f32.mrf.mxu0 }
 0x3ee   : > { %v3561_v1 = vpop.eup %3560  ;;  %v4386_v56 = vadd.f32 %v4092_v33, %v1498_v45 }
 0x3ef   : > { %v1266_v52 = vmul.f32 %v3561_v1, %v1244_v22  ;;  %v4389_v7 = vpop.xlane.xlu0 %1857  ;;  %v3563_v11 = vpop.eup %3562 }
 0x3f0   : > { %1516 = vmax.xlane.f32.xlu2 %v4386_v56  ;;  %v3565_v62 = vpop.eup %3564  ;;  %v1267_v22 = vmul.f32 %v3563_v11, %v1246_v21 }
 0x3f1   : > { %v1274_v25 = vsub.f32 2.0, %v1266_v52  ;;  %v1268_v29 = vmul.f32 %v3565_v62, %v1248_v19 }
 0x3f2   : > { %v1275_v14 = vsub.f32 2.0, %v1267_v22 }
 0x3f3   : > { %v1282_v44 = vmul.f32 %v3561_v1, %v1274_v25  ;;  %v1276_v1 = vsub.f32 2.0, %v1268_v29 }
 0x3f4   : > { %v1283_v49 = vmul.f32 %v3563_v11, %v1275_v14 }
 0x3f5   : > { %v1500_v42 = vpop.f32.mrf.mxu0  ;;  %v4395_v54 = vmul.f32 %v4332_v24, %v1282_v44  ;;  %v1284_v21 = vmul.f32 %v3565_v62, %v1276_v1 }
 0x3f6   : > { %v4398_v32 = vadd.f32 %v4092_v33, %v1500_v42  ;;  %v4408_v25 = vmul.f32 %v4334_v40, %v1283_v49 }
 0x3f7   : > { %v1321_v31 = vpack.c.bf16 %v4395_v54, %v4392_v47  ;;  %v1252_v45 = vpop.xlane.xlu0 %1251  ;;  %v4411_v42 = vmul.f32 %v4299_v8, %v1284_v21 }
 0x3f8   : > { %1518 = vmax.xlane.f32.xlu1 %v4398_v32  ;;  %3566 = vrcp.f32 %v1252_v45 }
 0x3f9   : > { %1357 = vmatmul.bf16.vlgmr.msrb.gmra.mxu3 %v1321_v31  ;;  %3568 = vrcp.f32 %v1250_v9  ;;  %v1322_v11 = vpack.c.bf16 %v4411_v42, %v4408_v25 }
 0x3fd   : > { %v1503_v52 = vpop.f32.mrf.mxu0 }
 0x3fe   : > { %v4404_v24 = vadd.f32 %v4092_v33, %v1503_v52  ;;  %v3567_v44 = vpop.eup %3566  ;;  %v1254_v52 = vpop.xlane.xlu1 %1253 }
 0x3ff   : > { %v3569_v22 = vpop.eup %3568  ;;  %v1270_v29 = vmul.f32 %v3567_v44, %v1252_v45  ;;  %v1256_v40 = vpop.xlane.xlu0 %1255 }
 0x400   : > { %1520 = vmax.xlane.f32.xlu1 %v4404_v24  ;;  %v1269_v14 = vmul.f32 %v3569_v22, %v1250_v9  ;;  %3570 = vrcp.f32 %v1256_v40 }
 0x401   : > { %v1278_v62 = vsub.f32 2.0, %v1270_v29  ;;  %3572 = vrcp.f32 %v1254_v52 }
 0x402   : > { %v1277_v1 = vsub.f32 2.0, %v1269_v14 }
 0x403   : > { %v1286_v49 = vmul.f32 %v3567_v44, %v1278_v62 }
 0x404   : > { %v1285_v8 = vmul.f32 %v3569_v22, %v1277_v1 }
 0x405   : > { %v1505_v19 = vpop.f32.mrf.mxu0  ;;  %v4420_v21 = vmul.f32 %v4351_v28, %v1286_v49 }
 0x406   : > { %v4414_v31 = vadd.f32 %v4092_v33, %v1505_v19  ;;  %v3571_v33 = vpop.eup %3570  ;;  %v4423_v45 = vmul.f32 %v4311_v34, %v1285_v8 }
 0x407   : > { %v3573_v19 = vpop.eup %3572  ;;  %v1272_v23 = vmul.f32 %v3571_v33, %v1256_v40 }
 0x408   : > { %1522 = vmax.xlane.f32.xlu0 %v4414_v31  ;;  %v1323_v9 = vpack.c.bf16 %v4420_v21, %v4423_v45  ;;  %v1271_v29 = vmul.f32 %v3573_v19, %v1254_v52  ;;  %v1835_v52 = vsub.f32 %v4210_v15, %v4319_v50 }
 0x409   : > { %1362 = vmatmul.bf16.gmra.mxu3 %v1322_v11  ;;  %v1280_v44 = vsub.f32 2.0, %v1272_v23  ;;  %v1833_v23 = vsub.f32 %v4200_v58, %v4301_v6 }
 0x40a   : > { %v1279_v28 = vsub.f32 2.0, %v1271_v29 }
 0x40b   : > { %v1288_v22 = vmul.f32 %v3571_v33, %v1280_v44  ;;  %v1843_v1 = vmul.f32 1.442695, %v1833_v23  ;;  %v1838_v23 = vsub.f32 %v4246_v13, %v4358_v41 }
 0x40c   : > { %v1287_v11 = vmul.f32 %v3573_v19, %v1279_v28  ;;  %v1836_v28 = vsub.f32 %v4232_v63, %v4341_v26 }
 0x40d   : > { %v4432_v34 = vmul.f32 %v4355_v43, %v1288_v22  ;;  %v1847_v43 = vmul.f32 1.442695, %v1835_v52  ;;  %v1853_v63 = vmul.f32 1.442695, %v1838_v23 }
 0x40e   : > { %v4435_v14 = vmul.f32 %v4321_v38, %v1287_v11 }
 0x410   : > { %v1324_v62 = vpack.c.bf16 %v4432_v34, %v4435_v14 }
 0x419   : > { %1634 = vrot.lane.b32.xlu1 %v3840_v51, %s3659_s30  ;;  %1367 = vmatmul.bf16.gmra.mxu3 %v1323_v9  ;;  %v1834_v51 = vsub.f32 %v4224_v2, %v4328_v61 }
 0x41b   : > { %v1845_v40 = vmul.f32 1.442695, %v1834_v51 }
 0x41c   : > { %1947 = vrot.lane.b32.xlu0 %v3829_v39, %s3660_s24  ;;  %s3670_s24 = smov 64  }
 0x41d   : > { %3574 = vpow2.f32 %v1845_v40 }
 0x41e   : > { %3576 = vpow2.f32 %v1843_v1 }
 0x41f   : > { %3578 = vpow2.f32 %v1847_v43 }
 0x423   : > { %v4445_v38 = vpop.eup %3574 }
 0x424   : > { %v4449_v2 = vpop.eup %3576 }
 0x425   : > { %v4452_v58 = vpop.eup %3578 }
 0x429   : > { %1372 = vmatmul.bf16.gmra.mxu3 %v1324_v62 }
 0x443   : > { %v1509_v49 = vpop.xlane.xlu0 %1508  ;;  %1861 = vadd.xlane.f32.xlu1 %v4445_v38 }
 0x444   : > { %v1524_v8 = vsub.f32 %v4368_v27, %v1509_v49 }
 0x446   : > { %v1532_v61 = vmul.f32 1.442695, %v1524_v8  ;;  %1859 = vadd.xlane.f32.xlu0 %v4449_v2 }
 0x448   : > { %3580 = vpow2.f32 %v1532_v61 }
 0x44b   : > { %v1511_v15 = vpop.xlane.xlu1 %1510  ;;  %1863 = vadd.xlane.f32.xlu1 %v4452_v58 }
 0x44c   : > { %v1525_v6 = vsub.f32 %v4372_v16, %v1511_v15  ;;  %v1849_v16 = vmul.f32 1.442695, %v1836_v28 }
 0x44e   : > { %v4456_v50 = vpop.eup %3580  ;;  %v1534_v33 = vmul.f32 1.442695, %v1525_v6 }
 0x44f   : > { %1548 = vadd.xlane.f32.xlu2 %v4456_v50 }
 0x450   : > { %3582 = vpow2.f32 %v1534_v33 }
 0x453   : > { %v1513_v19 = vpop.xlane.xlu2 %1512 }
 0x456   : > { %v4459_v27 = vpop.eup %3582 }
 0x457   : > { %1550 = vadd.xlane.f32.xlu2 %v4459_v27 }
 0x45b   : > { %v1515_v9 = vpop.xlane.xlu1 %1514 }
 0x45c   : > { %v1527_v29 = vsub.f32 %v4382_v48, %v1515_v9 }
 0x45e   : > { %v1538_v44 = vmul.f32 1.442695, %v1527_v29 }
 0x460   : > { %3584 = vpow2.f32 %v1538_v44  ;;  %v1526_v44 = vsub.f32 %v4376_v60, %v1513_v19 }
 0x461   : > { %3586 = vpow2.f32 %v1849_v16 }
 0x463   : > { %v1517_v22 = vpop.xlane.xlu2 %1516 }
 0x464   : > { %v1528_v11 = vsub.f32 %v4386_v56, %v1517_v22 }
 0x466   : > { %v4466_v62 = vpop.eup %3584  ;;  %v1540_v51 = vmul.f32 1.442695, %v1528_v11  ;;  %v1536_v11 = vmul.f32 1.442695, %v1526_v44 }
 0x467   : > { %1554 = vadd.xlane.f32.xlu0 %v4466_v62  ;;  %v4472_v1 = vpop.eup %3586 }
 0x468   : > { %3588 = vpow2.f32 %v1540_v51 }
 0x46b   : > { %v1519_v48 = vpop.xlane.xlu1 %1518 }
 0x46c   : > { %v1529_v40 = vsub.f32 %v4398_v32, %v1519_v48 }
 0x46e   : > { %v4474_v26 = vpop.eup %3588  ;;  %v1542_v52 = vmul.f32 1.442695, %v1529_v40 }
 0x46f   : > { %1632 = vrot.lane.b32.xlu2 %v3829_v39, %s3659_s30  ;;  %1865 = vadd.xlane.f32.xlu0 %v4472_v1  ;;  %s3664_s30 = smov 32  }
 0x470   : > { %3590 = vpow2.f32 %v1542_v52  ;;  %1556 = vadd.xlane.f32.xlu1 %v4474_v26 }
 0x471   : > { %3592 = vpow2.f32 %v1853_v63 }
 0x472   : > { %3594 = vrcp.f32 %v4389_v7 }
 0x473   : > { %v1521_v56 = vpop.xlane.xlu1 %1520 }
 0x474   : > { %v1530_v13 = vsub.f32 %v4404_v24, %v1521_v56 }
 0x476   : > { %v4481_v41 = vpop.eup %3590  ;;  %v1544_v32 = vmul.f32 1.442695, %v1530_v13 }
 0x477   : > { %v4483_v43 = vpop.eup %3592  ;;  %1558 = vadd.xlane.f32.xlu0 %v4481_v41 }
 0x478   : > { %3596 = vpow2.f32 %v1544_v32  ;;  %1869 = vadd.xlane.f32.xlu1 %v4483_v43  ;;  %v3595_v39 = vpop.eup %3594 }
 0x479   : > { %3598 = vrcp.f32 %v4379_v10  ;;  %v1880_v24 = vmul.f32 %v3595_v39, %v4389_v7  ;;  %v1837_v7 = vsub.f32 %v4266_v57, %v4363_v17 }
 0x47a   : > { %3600 = vpow2.f32 %v1536_v11  ;;  %v1305_v11 = vadd.f32 %v4392_v47, %v4216_v3  ;;  %v1306_v3 = vadd.f32 %v4395_v54, %v4219_v35 }
 0x47b   : > { %v1888_v15 = vsub.f32 2.0, %v1880_v24  ;;  %v1523_v33 = vpop.xlane.xlu0 %1522 }
 0x47c   : > { %v1358_v29 = vpop.f32.mrf.mxu3 }
 0x47d   : > { %v1896_v9 = vmul.f32 %v3595_v39, %v1888_v15 }
 0x47e   : > { %v4489_v49 = vpop.eup %3596 }
 0x47f   : > { %v3599_v8 = vpop.eup %3598  ;;  %1560 = vadd.xlane.f32.xlu0 %v4489_v49  ;;  %v4496_v22 = vmul.f32 %v4343_v20, %v1896_v9  ;;  %v1851_v20 = vmul.f32 1.442695, %v1837_v7 }
 0x480   : > { %v1879_v61 = vmul.f32 %v3599_v8, %v4379_v10  ;;  %v4504_v19 = vpop.eup %3600 }
 0x481   : > { %3602 = vpow2.f32 %v1851_v20 }
 0x482   : > { %v1887_v6 = vsub.f32 2.0, %v1879_v61 }
 0x484   : > { %v1895_v28 = vmul.f32 %v3599_v8, %v1887_v6  ;;  %v1360_v60 = vpop.f32.mrf.mxu3 }
 0x486   : > { %v1903_v51 = vmul.f32 %v4323_v0, %v1895_v28  ;;  %v1531_v0 = vsub.f32 %v4414_v31, %v1523_v33 }
 0x487   : > { %v4508_v40 = vpop.eup %3602 }
 0x488   : > { %v1943_v10 = vpack.c.bf16 %v4496_v22, %v1903_v51  ;;  %v1546_v48 = vmul.f32 1.442695, %v1531_v0 }
 0x48a   : > { %3604 = vpow2.f32 %v1546_v48 }
 0x48b   : > { %v1635_v16 = vpop.permute.xlu1 %1634 }
 0x48c   : > { %1662 = vmatpush.bf16.msrb.mxu1 %v1635_v16 }
 0x48e   : > { %v1948_v23 = vpop.permute.xlu0 %1947 }
 0x48f   : > { %1978 = vmatpush.bf16.msra.mxu3 %v1948_v23 }
 0x490   : > { %v4511_v57 = vpop.eup %3604 }
 0x491   : > { %1386 = vrot.lane.b32.xlu1 %v1358_v29, %s3661_s22 }
 0x492   : > { %1979 = vmatmul.bf16.vlgmr.msra.gmra.mxu3 %v1943_v10 }
 0x493   : > { %1388 = vrot.lane.b32.xlu0 %v1360_v60, %s3661_s22 }
 0x498   : > { %1552 = vadd.xlane.f32.xlu2 %v4504_v19 }
 0x4a0   : > { %1867 = vadd.xlane.f32.xlu2 %v4508_v40 }
 0x4a8   : > { %1562 = vadd.xlane.f32.xlu2 %v4511_v57 }
 0x4b6   : > { %v1862_v17 = vpop.xlane.xlu1 %1861 }
 0x4b7   : > { %3606 = vrcp.f32 %v1862_v17 }
 0x4b9   : > { %v1860_v63 = vpop.xlane.xlu0 %1859 }
 0x4ba   : > { %3608 = vrcp.f32 %v1860_v63 }
 0x4bd   : > { %v3607_v52 = vpop.eup %3606 }
 0x4be   : > { %v1882_v56 = vmul.f32 %v3607_v52, %v1862_v17  ;;  %v1864_v17 = vpop.xlane.xlu1 %1863 }
 0x4c0   : > { %v3609_v13 = vpop.eup %3608  ;;  %v1890_v32 = vsub.f32 2.0, %v1882_v56 }
 0x4c1   : > { %v1881_v39 = vmul.f32 %v3609_v13, %v1860_v63 }
 0x4c2   : > { %v1549_v31 = vpop.xlane.xlu2 %1548  ;;  %v1898_v8 = vmul.f32 %v3607_v52, %v1890_v32  ;;  %v4532_v52 = vpop.f32.mrf.mxu3 }
 0x4c3   : > { %v1889_v24 = vsub.f32 2.0, %v1881_v39  ;;  %3610 = vrcp.f32 %v1549_v31 }
 0x4c4   : > { %v1906_v6 = vmul.f32 %v4445_v38, %v1898_v8 }
 0x4c5   : > { %v1897_v61 = vmul.f32 %v3609_v13, %v1889_v24 }
 0x4c7   : > { %v4515_v15 = vmul.f32 %v4449_v2, %v1897_v61 }
 0x4c9   : > { %v3611_v33 = vpop.eup %3610  ;;  %v1944_v9 = vpack.c.bf16 %v1906_v6, %v4515_v15 }
 0x4ca   : > { %v1572_v29 = vmul.f32 %v3611_v33, %v1549_v31  ;;  %v1551_v44 = vpop.xlane.xlu2 %1550  ;;  %v4536_v24 = vpop.f32.mrf.mxu3 }
 0x4cb   : > { %3612 = vrcp.f32 %v1551_v44  ;;  %1984 = vmatmul.bf16.gmra.mxu3 %v1944_v9 }
 0x4cc   : > { %v1580_v28 = vsub.f32 2.0, %v1572_v29  ;;  %3614 = vrcp.f32 %v1864_v17 }
 0x4ce   : > { %v1588_v16 = vmul.f32 %v3611_v33, %v1580_v28  ;;  %v1308_v33 = vadd.f32 %v4411_v42, %v4238_v4 }
 0x4d0   : > { %v1596_v23 = vmul.f32 %v4456_v50, %v1588_v16 }
 0x4d1   : > { %v3613_v10 = vpop.eup %3612 }
 0x4d2   : > { %v1612_v2 = vadd.f32 %v1596_v23, %v1305_v11  ;;  %v1573_v7 = vmul.f32 %v3613_v10, %v1551_v44  ;;  %v1633_v60 = vpop.permute.xlu2 %1632  ;;  %v3615_v32 = vpop.eup %3614 }
 0x4d3   : > { %1663 = vmatpush.bf16.msrb.mxu1 %v1633_v60  ;;  %v1883_v54 = vmul.f32 %v3615_v32, %v1864_v17  ;;  %v4544_v4 = vpop.f32.mrf.mxu3  ;;  %v1309_v17 = vadd.f32 %v4423_v45, %v4250_v46 }
 0x4d4   : > { %v1919_v38 = vadd.f32 %v1903_v51, %v1612_v2  ;;  %v1581_v20 = vsub.f32 2.0, %v1573_v7 }
 0x4d5   : > { %v1891_v9 = vsub.f32 2.0, %v1883_v54 }
 0x4d6   : > { %v1927_v0 = vmul.f32 0.25, %v1919_v38  ;;  %v1589_v48 = vmul.f32 %v3613_v10, %v1581_v20 }
 0x4d7   : > { %v1899_v10 = vmul.f32 %v3615_v32, %v1891_v9 }
 0x4d8   : > { %1935 = vst [vmem:[%s4526_s27] sm:$0xff] %v1927_v0  ;;  %v1597_v47 = vmul.f32 %v4459_v27, %v1589_v48 }
 0x4da   : > { %v1613_v50 = vadd.f32 %v1597_v47, %v1306_v3  ;;  %v1555_v51 = vpop.xlane.xlu0 %1554  ;;  %v1628_v63 = vpack.c.bf16 %v1597_v47, %v1596_v23 }
 0x4db   : > { %3616 = vrcp.f32 %v1555_v51  ;;  %v4560_v46 = vpop.f32.mrf.mxu3 }
 0x4dc   : > { %v1920_v56 = vadd.f32 %v4496_v22, %v1613_v50  ;;  %1664 = vmatmul.bf16.vlgmr.msrb.gmra.mxu1 %v1628_v63 }
 0x4de   : > { %v1928_v13 = vmul.f32 0.25, %v1920_v56 }
 0x4e0   : > { %1936 = vst [vmem:[%s4526_s27 + $0x8] sm:$0xff] %v1928_v13 }
 0x4e1   : > { %v3617_v39 = vpop.eup %3616 }
 0x4e2   : > { %v1575_v31 = vmul.f32 %v3617_v39, %v1555_v51  ;;  %v1866_v8 = vpop.xlane.xlu0 %1865 }
 0x4e3   : > { %3618 = vrcp.f32 %v1866_v8  ;;  %v1557_v35 = vpop.xlane.xlu1 %1556 }
 0x4e4   : > { %v1583_v27 = vsub.f32 2.0, %v1575_v31  ;;  %3620 = vrcp.f32 %v1557_v35 }
 0x4e6   : > { %v1591_v61 = vmul.f32 %v3617_v39, %v1583_v27 }
 0x4e8   : > { %v4541_v22 = vmul.f32 %v4466_v62, %v1591_v61  ;;  %v1907_v62 = vmul.f32 %v4452_v58, %v1899_v10  ;;  %v1307_v10 = vadd.f32 %v4408_v25, %v4235_v37  ;;  %v1311_v37 = vadd.f32 %v4435_v14, %v4278_v55 }
 0x4e9   : > { %v3619_v29 = vpop.eup %3618  ;;  %v1312_v55 = vadd.f32 %v4432_v34, %v4281_v36 }
 0x4ea   : > { %v3621_v44 = vpop.eup %3620  ;;  %v1884_v28 = vmul.f32 %v3619_v29, %v1866_v8  ;;  %v1559_v16 = vpop.xlane.xlu0 %1558  ;;  %v1615_v11 = vadd.f32 %v4541_v22, %v1308_v33 }
 0x4eb   : > { %v1576_v23 = vmul.f32 %v3621_v44, %v1557_v35  ;;  %3622 = vrcp.f32 %v1559_v16  ;;  %v4565_v8 = vpop.f32.mrf.mxu3 }
 0x4ec   : > { %v1892_v2 = vsub.f32 2.0, %v1884_v28  ;;  %v1922_v7 = vadd.f32 %v1906_v6, %v1615_v11 }
 0x4ed   : > { %v1584_v60 = vsub.f32 2.0, %v1576_v23 }
 0x4ee   : > { %v1900_v38 = vmul.f32 %v3619_v29, %v1892_v2  ;;  %v1930_v20 = vmul.f32 0.25, %v1922_v7 }
 0x4ef   : > { %v1592_v42 = vmul.f32 %v3621_v44, %v1584_v60 }
 0x4f0   : > { %v1908_v0 = vmul.f32 %v4472_v1, %v1900_v38  ;;  %1938 = vst [vmem:[%s4526_s27 + $0x18] sm:$0xff] %v1930_v20  ;;  %v1310_v1 = vadd.f32 %v4420_v21, %v4253_v18 }
 0x4f1   : > { %v3623_v48 = vpop.eup %3622  ;;  %v4552_v3 = vmul.f32 %v4474_v26, %v1592_v42  ;;  %v1870_v26 = vpop.xlane.xlu1 %1869 }
 0x4f2   : > { %v1577_v6 = vmul.f32 %v3623_v48, %v1559_v16  ;;  %v1945_v47 = vpack.c.bf16 %v1908_v0, %v1907_v62  ;;  %v1561_v39 = vpop.xlane.xlu0 %1560 }
 0x4f3   : > { %v1616_v50 = vadd.f32 %v4552_v3, %v1309_v17  ;;  %3624 = vrcp.f32 %v1561_v39 }
 0x4f4   : > { %v1585_v51 = vsub.f32 2.0, %v1577_v6  ;;  %1989 = vmatmul.bf16.gmra.mxu3 %v1945_v47  ;;  %3626 = vrcp.f32 %v1870_v26 }
 0x4f5   : > { %v1923_v63 = vadd.f32 %v1907_v62, %v1616_v50 }
 0x4f6   : > { %v1593_v58 = vmul.f32 %v3623_v48, %v1585_v51 }
 0x4f7   : > { %v1931_v56 = vmul.f32 0.25, %v1923_v63 }
 0x4f8   : > { %v4558_v13 = vmul.f32 %v4481_v41, %v1593_v58  ;;  %v4569_v41 = vpop.f32.mrf.mxu3 }
 0x4f9   : > { %1939 = vst [vmem:[%s4526_s27 + $0x20] sm:$0xff] %v1931_v56  ;;  %v3625_v54 = vpop.eup %3624 }
 0x4fa   : > { %v1617_v45 = vadd.f32 %v4558_v13, %v1310_v1  ;;  %v3627_v27 = vpop.eup %3626  ;;  %v1578_v61 = vmul.f32 %v3625_v54, %v1561_v39 }
 0x4fb   : > { %v1886_v44 = vmul.f32 %v3627_v27, %v1870_v26 }
 0x4fc   : > { %v1924_v32 = vadd.f32 %v1908_v0, %v1617_v45  ;;  %v1586_v28 = vsub.f32 2.0, %v1578_v61 }
 0x4fd   : > { %v1894_v2 = vsub.f32 2.0, %v1886_v44 }
 0x4fe   : > { %v1932_v31 = vmul.f32 0.25, %v1924_v32  ;;  %v1594_v7 = vmul.f32 %v3625_v54, %v1586_v28 }
 0x4ff   : > { %v1902_v48 = vmul.f32 %v3627_v27, %v1894_v2 }
 0x500   : > { %1940 = vst [vmem:[%s4526_s27 + $0x28] sm:$0xff] %v1932_v31  ;;  %v1602_v17 = vmul.f32 %v4489_v49, %v1594_v7 }
 0x501   : > { %v1910_v51 = vmul.f32 %v4483_v43, %v1902_v48 }
 0x502   : > { %v1618_v50 = vadd.f32 %v1602_v17, %v1311_v37 }
 0x503   : > { %v1387_v35 = vpop.permute.xlu1 %1386 }
 0x504   : > { %1411 = vst.msk [vmem:[#allocation2] sm:$0xff] %vm1410_vm3, %v1387_v35 }
 0x505   : > { %v1389_v18 = vpop.permute.xlu0 %1388 }
 0x506   : > { %1412 = vst.msk [vmem:[#allocation2 + $0x8] sm:$0xff] %vm1410_vm3, %v1389_v18 }
 0x50b   : > { %v1553_v21 = vpop.xlane.xlu2 %1552 }
 0x50c   : > { %3628 = vrcp.f32 %v1553_v21 }
 0x512   : > { %v3629_v33 = vpop.eup %3628 }
 0x513   : > { %v1574_v9 = vmul.f32 %v3629_v33, %v1553_v21  ;;  %v1868_v29 = vpop.xlane.xlu2 %1867 }
 0x514   : > { %3630 = vrcp.f32 %v1868_v29 }
 0x515   : > { %v1582_v16 = vsub.f32 2.0, %v1574_v9  ;;  %v1980_v11 = vpop.f32.mrf.mxu3 }
 0x516   : > { %2008 = vrot.lane.b32.xlu1 %v1980_v11, %s3662_s28 }
 0x517   : > { %v1590_v23 = vmul.f32 %v3629_v33, %v1582_v16 }
 0x519   : > { %v1598_v60 = vmul.f32 %v4504_v19, %v1590_v23 }
 0x51a   : > { %v3631_v38 = vpop.eup %3630 }
 0x51b   : > { %v1885_v20 = vmul.f32 %v3631_v38, %v1868_v29  ;;  %v1563_v42 = vpop.xlane.xlu2 %1562  ;;  %v1614_v62 = vadd.f32 %v1598_v60, %v1307_v10  ;;  %v1629_v0 = vpack.c.bf16 %v4541_v22, %v1598_v60 }
 0x51c   : > { %3632 = vrcp.f32 %v1563_v42 }
 0x51d   : > { %v1893_v6 = vsub.f32 2.0, %v1885_v20  ;;  %1669 = vmatmul.bf16.gmra.mxu1 %v1629_v0  ;;  %v1921_v47 = vadd.f32 %v4515_v15, %v1614_v62  ;;  %v1982_v39 = vpop.f32.mrf.mxu3 }
 0x51e   : > { %1392 = vrot.lane.b32.xlu1 %v4536_v24, %s3661_s22 }
 0x51f   : > { %v1901_v25 = vmul.f32 %v3631_v38, %v1893_v6  ;;  %v1929_v19 = vmul.f32 0.25, %v1921_v47 }
 0x521   : > { %1937 = vst [vmem:[%s4526_s27 + $0x10] sm:$0xff] %v1929_v19  ;;  %v1909_v22 = vmul.f32 %v4508_v40, %v1901_v25  ;;  %v1630_v40 = vpack.c.bf16 %v4558_v13, %v4552_v3 }
 0x522   : > { %v3633_v49 = vpop.eup %3632 }
 0x523   : > { %v1579_v63 = vmul.f32 %v3633_v49, %v1563_v42  ;;  %v1925_v58 = vadd.f32 %v1909_v22, %v1618_v50  ;;  %v1946_v15 = vpack.c.bf16 %v1910_v51, %v1909_v22 }
 0x525   : > { %v1587_v56 = vsub.f32 2.0, %v1579_v63  ;;  %v1933_v1 = vmul.f32 0.25, %v1925_v58  ;;  %1994 = vmatmul.bf16.gmra.mxu3 %v1946_v15 }
 0x527   : > { %v1595_v24 = vmul.f32 %v3633_v49, %v1587_v56  ;;  %1941 = vst [vmem:[%s4526_s27 + $0x30] sm:$0xff] %v1933_v1 }
 0x529   : > { %v1603_v14 = vmul.f32 %v4511_v57, %v1595_v24 }
 0x52b   : > { %v1619_v45 = vadd.f32 %v1603_v14, %v1312_v55  ;;  %v1631_v32 = vpack.c.bf16 %v1603_v14, %v1602_v17  ;;  %v3665_v14 = vmov 1  }
 0x52c   : > { %3493 = vset.pattern.permute.xlu2 %v3665_v14  ;;  %3494 = vset.pattern.permute.xlu0 %v3665_v14 }
 0x52d   : > { %v1926_v43 = vadd.f32 %v1910_v51, %v1619_v45  ;;  %1674 = vmatmul.bf16.gmra.mxu1 %v1630_v40  ;;  %3492 = vset.pattern.permute.xlu1 %v3665_v14 }
 0x52f   : > { %v1934_v26 = vmul.f32 0.25, %v1926_v43 }
 0x531   : > { %1942 = vst [vmem:[%s4526_s27 + $0x38] sm:$0xff] %v1934_v26 }
 0x53d   : > { %1679 = vmatmul.bf16.gmra.mxu1 %v1631_v32  ;;  %v2265_v32 = vld [vmem:[%s5307_s3 + $0x8] sm:$0xf] }
 0x54e   : > { %v1985_v31 = vpop.f32.mrf.mxu3 }
 0x54f   : > { %2012 = vrot.lane.b32.xlu1 %v1985_v31, %s3662_s28  ;;  %v2268_v31 = vld [vmem:[%s5307_s3 + $0x14] sm:$0xf] }
 0x556   : > { %v1987_v57 = vpop.f32.mrf.mxu3 }
 0x557   : > { %1396 = vrot.lane.b32.xlu1 %v4560_v46, %s3661_s22 }
 0x559   : > { %v1665_v36 = vpop.f32.mrf.mxu1 }
 0x55a   : > { %1693 = vrot.lane.b32.xlu2 %v1665_v36, %s3663_s15  ;;  %v2266_v36 = vld [vmem:[%s5307_s3 + $0xc] sm:$0xf] }
 0x561   : > { %v1667_v34 = vpop.f32.mrf.mxu1 }
 0x562   : > { %2010 = vrot.lane.b32.xlu2 %v1982_v39, %s3662_s28  ;;  %1695 = vrot.lane.b32.xlu0 %v1667_v34, %s3663_s15 }
 0x56a   : > { %1390 = vrot.lane.b32.xlu0 %v4532_v52, %s3661_s22 }
 0x577   : > { %v1990_v3 = vpop.f32.mrf.mxu3 }
 0x578   : > { %2016 = vrot.lane.b32.xlu1 %v1990_v3, %s3662_s28  ;;  %v4675_v3 = vld [vmem:[%s5307_s3 + $0x18] sm:$0xf] }
 0x57f   : > { %v1992_v18 = vpop.f32.mrf.mxu3 }
 0x580   : > { %1400 = vrot.lane.b32.xlu1 %v4569_v41, %s3661_s22  ;;  %v3446_v41 = vld [vmem:[%s5313_s9 + $0x8] sm:$0xff] }
 0x581   : > { %2087 = vmatpush.bf16.msrb.mxu0 %v3446_v41 }
 0x588   : > { %v2009_v13 = vpop.permute.xlu1 %2008 }
 0x590   : > { %v1393_v46 = vpop.permute.xlu1 %1392 }
 0x591   : > { %1414 = vst.msk [vmem:[#allocation2 + $0x18] sm:$0xff] %vm1410_vm3, %v1393_v46 }
 0x59a   : > { %v1670_v35 = vpop.f32.mrf.mxu1 }
 0x59b   : > { %1697 = vrot.lane.b32.xlu2 %v1670_v35, %s3663_s15  ;;  %v2267_v35 = vld [vmem:[%s5307_s3 + $0x10] sm:$0xf] }
 0x5a2   : > { %v1672_v21 = vpop.f32.mrf.mxu1 }
 0x5a3   : > { %2014 = vrot.lane.b32.xlu2 %v1987_v57, %s3662_s28  ;;  %1699 = vrot.lane.b32.xlu0 %v1672_v21, %s3663_s15  ;;  %v2264_v57 = vld [vmem:[%s5307_s3 + $0x4] sm:$0xf] }
 0x5a8   : > { %v1995_v52 = vpop.f32.mrf.mxu3 }
 0x5a9   : > { %2020 = vrot.lane.b32.xlu1 %v1995_v52, %s3662_s28 }
 0x5aa   : > { %v1675_v54 = vpop.f32.mrf.mxu1 }
 0x5ab   : > { %1394 = vrot.lane.b32.xlu0 %v4544_v4, %s3661_s22  ;;  %1701 = vrot.lane.b32.xlu2 %v1675_v54, %s3663_s15  ;;  %v3445_v4 = vld [vmem:[%s5313_s9] sm:$0xff]  ;;  %v2270_v54 = vld [vmem:[%s5307_s3 + $0x1c] sm:$0xf] }
 0x5ac   : > { %2088 = vmatpush.bf16.msrb.mxu0 %v3445_v4 }
 0x5b0   : > { %v1997_v29 = vpop.f32.mrf.mxu3 }
 0x5b2   : > { %v1677_v27 = vpop.f32.mrf.mxu1 }
 0x5b3   : > { %2018 = vrot.lane.b32.xlu2 %v1992_v18, %s3662_s28  ;;  %1703 = vrot.lane.b32.xlu0 %v1677_v27, %s3663_s15 }
 0x5b4   : > { %v1694_v61 = vpop.permute.xlu2 %1693 }
 0x5b5   : > { %1718 = vst.msk [vmem:[#allocation2] sm:$0xff] %vm1717_vm4, %v1694_v61 }
 0x5b6   : > { %2033 = vst.msk [vmem:[#allocation2] sm:$0xff] %vm2032_vm5, %v2009_v13  ;;  %v5322_v13 = vmov 0  }
 0x5ba   : > { %v1680_v33 = vpop.f32.mrf.mxu1 }
 0x5bb   : > { %1398 = vrot.lane.b32.xlu0 %v4565_v8, %s3661_s22  ;;  %1705 = vrot.lane.b32.xlu2 %v1680_v33, %s3663_s15  ;;  %v2263_v33 = vld [vmem:[%s5307_s3] sm:$0xf] }
 0x5bc   : > { %v2011_v11 = vpop.permute.xlu2 %2010 }
 0x5bd   : > { %v2041_v23 = vld [vmem:[#allocation2] sm:$0xff] }
 0x5c1   : > { %v2013_v9 = vpop.permute.xlu1 %2012 }
 0x5c2   : > { %v1682_v44 = vpop.f32.mrf.mxu1 }
 0x5c3   : > { %2022 = vrot.lane.b32.xlu2 %v1997_v29, %s3662_s28  ;;  %1707 = vrot.lane.b32.xlu0 %v1682_v44, %s3663_s15  ;;  %v5328_v29 = vld [vmem:[#allocation3_spill] sm:$0xff] }
 0x5c9   : > { %v1397_v28 = vpop.permute.xlu1 %1396 }
 0x5ca   : > { %1416 = vst.msk [vmem:[#allocation2 + $0x28] sm:$0xff] %vm1410_vm3, %v1397_v28  ;;  %v5329_v28 = vld [vmem:[#allocation4_spill] sm:$0xff] }
 0x5d4   : > { %v1696_v16 = vpop.permute.xlu0 %1695 }
 0x5d5   : > { %1719 = vst.msk [vmem:[#allocation2 + $0x8] sm:$0xff] %vm1717_vm4, %v1696_v16 }
 0x5d6   : > { %2034 = vst.msk [vmem:[#allocation2 + $0x8] sm:$0xff] %vm2032_vm5, %v2011_v11 }
 0x5dc   : > { %v1391_v8 = vpop.permute.xlu0 %1390 }
 0x5dd   : > { %1413 = vst.msk [vmem:[#allocation2 + $0x10] sm:$0xff] %vm1410_vm3, %v1391_v8  ;;  %v2042_v10 = vld [vmem:[#allocation2 + $0x8] sm:$0xff] }
 0x5de   : > { %v2049_v2 = vpack.c.bf16 %v2042_v10, %v2041_v23  ;;  %v5330_v10 = vld [vmem:[#allocation5_spill] sm:$0xff] }
 0x5e0   : > { %3403 = vmatmul.msk.bf16.vlgmr.msrb.gmra.mxu0 %vm616_vm1, %v2049_v2 }
 0x5ea   : > { %v2017_v7 = vpop.permute.xlu1 %2016 }
 0x5f2   : > { %v1401_v60 = vpop.permute.xlu1 %1400 }
 0x5f3   : > { %1418 = vst.msk [vmem:[#allocation2 + $0x38] sm:$0xff] %vm1410_vm3, %v1401_v60 }
 0x5f5   : > { %v1698_v38 = vpop.permute.xlu2 %1697 }
 0x5f6   : > { %1720 = vst.msk [vmem:[#allocation2 + $0x10] sm:$0xff] %vm1717_vm4, %v1698_v38 }
 0x5f7   : > { %2035 = vst.msk [vmem:[#allocation2 + $0x10] sm:$0xff] %vm2032_vm5, %v2013_v9 }
 0x5fd   : > { %v2015_v20 = vpop.permute.xlu2 %2014 }
 0x5fe   : > { %v2043_v48 = vld [vmem:[#allocation2 + $0x10] sm:$0xff] }
 0x605   : > { %v1702_v62 = vpop.permute.xlu2 %1701 }
 0x60d   : > { %v2019_v47 = vpop.permute.xlu2 %2018 }
 0x615   : > { %v1700_v42 = vpop.permute.xlu0 %1699  ;;  %v1706_v25 = vpop.permute.xlu2 %1705 }
 0x616   : > { %1721 = vst.msk [vmem:[#allocation2 + $0x18] sm:$0xff] %vm1717_vm4, %v1700_v42 }
 0x617   : > { %2036 = vst.msk [vmem:[#allocation2 + $0x18] sm:$0xff] %vm2032_vm5, %v2015_v20 }
 0x61b   : > { %v2021_v51 = vpop.permute.xlu1 %2020 }
 0x61d   : > { %v1395_v0 = vpop.permute.xlu0 %1394  ;;  %v2023_v58 = vpop.permute.xlu2 %2022 }
 0x61e   : > { %1415 = vst.msk [vmem:[#allocation2 + $0x20] sm:$0xff] %vm1410_vm3, %v1395_v0  ;;  %v2044_v17 = vld [vmem:[#allocation2 + $0x18] sm:$0xff] }
 0x61f   : > { %1722 = vst.msk [vmem:[#allocation2 + $0x20] sm:$0xff] %vm1717_vm4, %v1702_v62  ;;  %v2050_v6 = vpack.c.bf16 %v2044_v17, %v2043_v48 }
 0x620   : > { %2037 = vst.msk [vmem:[#allocation2 + $0x20] sm:$0xff] %vm2032_vm5, %v2017_v7 }
 0x621   : > { %3404 = vmatmul.msk.bf16.gmra.mxu0 %vm616_vm1, %v2050_v6 }
 0x625   : > { %v1704_v37 = vpop.permute.xlu0 %1703 }
 0x626   : > { %1723 = vst.msk [vmem:[#allocation2 + $0x28] sm:$0xff] %vm1717_vm4, %v1704_v37 }
 0x627   : > { %2038 = vst.msk [vmem:[#allocation2 + $0x28] sm:$0xff] %vm2032_vm5, %v2019_v47  ;;  %v2045_v50 = vld [vmem:[#allocation2 + $0x20] sm:$0xff] }
 0x62d   : > { %v1399_v19 = vpop.permute.xlu0 %1398 }
 0x62e   : > { %1417 = vst.msk [vmem:[#allocation2 + $0x30] sm:$0xff] %vm1410_vm3, %v1399_v19  ;;  %v2046_v22 = vld [vmem:[#allocation2 + $0x28] sm:$0xff]  ;;  %vm2937_vm3 = vcmask 457728  }
 0x62f   : > { %1724 = vst.msk [vmem:[#allocation2 + $0x30] sm:$0xff] %vm1717_vm4, %v1706_v25  ;;  %v2051_v49 = vpack.c.bf16 %v2046_v22, %v2045_v50  ;;  %v3638_v50 = vld [vmem:[%s3786_s16] sm:$0xff] }
 0x630   : > { %2039 = vst.msk [vmem:[#allocation2 + $0x30] sm:$0xff] %vm2032_vm5, %v2021_v51 }
 0x631   : > { %3405 = vmatmul.msk.bf16.gmra.mxu0 %vm616_vm1, %v2051_v49 }
 0x635   : > { %v1708_v63 = vpop.permute.xlu0 %1707 }
 0x636   : > { %1725 = vst.msk [vmem:[#allocation2 + $0x38] sm:$0xff] %vm1717_vm4, %v1708_v63  ;;  %vm2946_vm4 = vcmask 523264  }
 0x637   : > { %2040 = vst.msk [vmem:[#allocation2 + $0x38] sm:$0xff] %vm2032_vm5, %v2023_v58  ;;  %v2047_v15 = vld [vmem:[#allocation2 + $0x30] sm:$0xff]  ;;  %vm2991_vm5 = vcmask 588800  }
 0x63e   : > { %v2048_v56 = vld [vmem:[#allocation2 + $0x38] sm:$0xff] }
 0x63f   : > { %v2052_v1 = vpack.c.bf16 %v2048_v56, %v2047_v15  ;;  %v3639_v15 = vld [vmem:[%s3786_s16 + $0x8] sm:$0xff] }
 0x641   : > { %3406 = vmatmul.msk.bf16.gmra.mxu0 %vm616_vm1, %v2052_v1 }
 0x65d   : > { %v2090_v24 = vpop.f32.mrf.mxu0 }
 0x65e   : > { %2118 = vrot.lane.b32.xlu0 %v2090_v24, %s3664_s30 }
 0x665   : > { %v2092_v55 = vpop.f32.mrf.mxu0 }
 0x666   : > { %2120 = vrot.lane.b32.xlu1 %v2092_v55, %s3664_s30 }
 0x69e   : > { %v2095_v45 = vpop.f32.mrf.mxu0 }
 0x69f   : > { %2122 = vrot.lane.b32.xlu2 %v2095_v45, %s3664_s30 }
 0x6a6   : > { %v2097_v40 = vpop.f32.mrf.mxu0 }
 0x6a7   : > { %2124 = vrot.lane.b32.xlu0 %v2097_v40, %s3664_s30 }
 0x6ae   : > { %v2100_v43 = vpop.f32.mrf.mxu0 }
 0x6af   : > { %2126 = vrot.lane.b32.xlu1 %v2100_v43, %s3664_s30 }
 0x6b6   : > { %v2102_v26 = vpop.f32.mrf.mxu0 }
 0x6b7   : > { %2128 = vrot.lane.b32.xlu2 %v2102_v26, %s3664_s30 }
 0x6be   : > { %v2105_v39 = vpop.f32.mrf.mxu0 }
 0x6bf   : > { %2392 = vperm.xlu2 %3493, %v2265_v32   ;;  %2130 = vrot.lane.b32.xlu0 %v2105_v39, %s3664_s30 }
 0x6c6   : > { %v2107_v34 = vpop.f32.mrf.mxu0 }
 0x6c7   : > { %2416 = vperm.xlu2 %3493, %v2268_v31   ;;  %2132 = vrot.lane.b32.xlu1 %v2107_v34, %s3664_s30 }
 0x6c8   : > { %2400 = vperm.xlu0 %3494, %v2266_v36  }
 0x6cf   : > { %3496 = vset.pattern.permute.xlu2 %v5322_v13  ;;  %2384 = vperm.xlu1 %3492, %v2264_v57  }
 0x6d0   : > { %2300 = vperm.xlu2 %3496, %v2266_v36   ;;  %2424 = vperm.xlu0 %3494, %v4675_v3   ;;  %v2119_v46 = vpop.permute.xlu0 %2118 }
 0x6d1   : > { %v2142_v18 = vadd.f32 %v2119_v46, %v3938_v53 }
 0x6d7   : > { %2408 = vperm.xlu1 %3492, %v2267_v35  }
 0x6d8   : > { %v2121_v21 = vpop.permute.xlu1 %2120  ;;  %2158 = vrot.lane.b32.xlu2 %v2142_v18, %s3654_s25  ;;  %3498 = vset.pattern.permute.xlu0 %v5322_v13 }
 0x6d9   : > { %v2143_v52 = vadd.f32 %v2121_v21, %v3951_v59 }
 0x6db   : > { %2160 = vrot.lane.b32.xlu0 %v2143_v52, %s3654_s25 }
 0x6df   : > { %3495 = vset.pattern.permute.xlu1 %v5322_v13 }
 0x6e0   : > { %2291 = vperm.xlu1 %3495, %v2265_v32  }
 0x6e8   : > { %3497 = vset.pattern.permute.xlu1 %v3665_v14 }
 0x6e9   : > { %2432 = vperm.xlu1 %3497, %v2270_v54  }
 0x6f9   : > { %v2123_v53 = vpop.permute.xlu2 %2122 }
 0x6fa   : > { %v2144_v41 = vadd.f32 %v2123_v53, %v3965_v5 }
 0x6fc   : > { %2162 = vrot.lane.b32.xlu1 %v2144_v41, %s3654_s25 }
 0x711   : > { %v2129_v27 = vpop.permute.xlu2 %2128 }
 0x712   : > { %v2147_v59 = vadd.f32 %v2129_v27, %v4005_v30 }
 0x714   : > { %2168 = vrot.lane.b32.xlu1 %v2147_v59, %s3654_s25 }
 0x719   : > { %v2125_v61 = vpop.permute.xlu0 %2124  ;;  %v4704_v30 = vpop.permute.xlu2 %2392 }
 0x71a   : > { %v2145_v4 = vadd.f32 %v2125_v61, %v3979_v12  ;;  %v3667_v12 = vmov 839922192   ;;  %v3640_v61 = vld [vmem:[%s3786_s16 + $0x10] sm:$0xff] }
 0x71b   : > { %v2277_v8 = vunpack.c.l.s4 %v3667_v12 }
 0x71c   : > { %2164 = vrot.lane.b32.xlu2 %v2145_v4, %s3654_s25  ;;  %2376 = vperm.xlu1 %3497, %v2263_v33  }
 0x71d   : > { %v4711_v60 = vunpack.c.0.s8 %v2277_v8 }
 0x721   : > { %v2127_v9 = vpop.permute.xlu1 %2126  ;;  %v2417_v11 = vpop.permute.xlu2 %2416 }
 0x722   : > { %v2146_v5 = vadd.f32 %v2127_v9, %v5328_v29  ;;  %v2422_v20 = vperm.slane %v2417_v11, %v4711_v60  ;;  %v3641_v29 = vld [vmem:[%s3786_s16 + $0x18] sm:$0xff] }
 0x724   : > { %2166 = vrot.lane.b32.xlu0 %v2146_v5, %s3654_s25  ;;  %3499 = vset.pattern.permute.xlu1 %v5322_v13  ;;  %v2445_v0 = vunpack.c.l.bf16 %v2422_v20 }
 0x725   : > { %2282 = vperm.xlu1 %3499, %v2264_v57  }
 0x726   : > { %v2466_v6 = vrot.slane %v2445_v0, 6 }
 0x72a   : > { %v4714_v38 = vpop.permute.xlu2 %2300 }
 0x731   : > { %v2131_v44 = vpop.permute.xlu0 %2130 }
 0x732   : > { %v2148_v16 = vadd.f32 %v2131_v44, %v5329_v28  ;;  %v2159_v47 = vpop.permute.xlu2 %2158 }
 0x733   : > { %v2182_v22 = vadd.f32 %v3638_v50, %v2159_v47 }
 0x734   : > { %2170 = vrot.lane.b32.xlu2 %v2148_v16, %s3654_s25 }
 0x735   : > { %v2190_v58 = vpack.c.bf16 %v2182_v22, %v2182_v22 }
 0x737   : > { %v2206_v45 = vunpack.c.l.b16 %v2190_v58 }
 0x739   : > { %v2133_v23 = vpop.permute.xlu1 %2132 }
 0x73a   : > { %v2149_v2 = vadd.f32 %v2133_v23, %v5330_v10  ;;  %v4709_v7 = vpop.permute.xlu0 %2400  ;;  %v2398_v23 = vperm.slane %v4704_v30, %v4711_v60 }
 0x73c   : > { %2309 = vperm.xlu2 %3496, %v2267_v35   ;;  %2172 = vrot.lane.b32.xlu0 %v2149_v2, %s3654_s25  ;;  %s3668_s25 = smov 48  }
 0x741   : > { %v4717_v42 = vpop.permute.xlu1 %2384 }
 0x742   : > { %v2425_v62 = vpop.permute.xlu0 %2424  ;;  %v2390_v10 = vperm.slane %v4717_v42, %v4711_v60 }
 0x743   : > { %v2430_v48 = vperm.slane %v2425_v62, %v4711_v60  ;;  %v2406_v62 = vperm.slane %v4709_v7, %v4711_v60 }
 0x744   : > { %2273 = vperm.xlu2 %3496, %v2263_v33   ;;  %2318 = vperm.xlu0 %3498, %v2268_v31   ;;  %v2441_v47 = vunpack.c.l.bf16 %v2390_v10 }
 0x745   : > { %v2446_v17 = vunpack.c.l.bf16 %v2430_v48  ;;  %v2442_v48 = vunpack.c.l.bf16 %v2398_v23  ;;  %v4778_v50 = vunpack.c.l.bf16 %v2406_v62 }
 0x747   : > { %v2468_v37 = vrot.slane %v2446_v17, 6 }
 0x749   : > { %v4721_v25 = vsel %vm2456_vm6, %v2466_v6, %v2468_v37  ;;  %v2409_v19 = vpop.permute.xlu1 %2408 }
 0x74a   : > { %v2414_v51 = vperm.slane %v2409_v19, %v4711_v60 }
 0x74c   : > { %2327 = vperm.xlu2 %3496, %v4675_v3   ;;  %2336 = vperm.xlu0 %3498, %v2270_v54   ;;  %v4726_v49 = vunpack.c.l.bf16 %v2414_v51 }
 0x74d   : > { %v2161_v63 = vpop.permute.xlu0 %2160 }
 0x74e   : > { %v2183_v56 = vadd.f32 %v3639_v15, %v2161_v63  ;;  %v2464_v1 = vrot.slane %v4726_v49, 6  ;;  %v2460_v63 = vrot.slane %v2442_v48, 6  ;;  %v2458_v15 = vrot.slane %v2441_v47, 6  ;;  %v3643_v47 = vld [vmem:[%s3786_s16 + $0x20] sm:$0xff] }
 0x750   : > { %v2191_v24 = vpack.c.bf16 %v2183_v56, %v2183_v56  ;;  %v4733_v55 = vsel %vm2456_vm6, %v2464_v1, %v2466_v6  ;;  %v2306_v6 = vperm.slane %v4714_v38, %v4711_v60 }
 0x752   : > { %v2207_v40 = vunpack.c.l.b16 %v2191_v24  ;;  %v2292_v43 = vpop.permute.xlu1 %2291  ;;  %v4790_v58 = vunpack.c.l.bf16 %v2306_v6 }
 0x754   : > { %v2214_v26 = vpack.c.b16 %v2207_v40, %v2206_v45  ;;  %3500 = vset.pattern.permute.xlu0 %v3665_v14  ;;  %v2462_v45 = vrot.slane %v4778_v50, 6 }
 0x756   : > { %v2220_v32 = vshrl.u32 %v2214_v26, 16  ;;  %v2223_v39 = vshll.u32 %v2214_v26, 16  ;;  %v4805_v26 = vsel %vm2456_vm6, %v2460_v63, %v2462_v45 }
 0x758   : > { %v2222_v31 = vrot.slane %v2220_v32, 3  ;;  %v2225_v36 = vrot.slane %v2223_v39, 4  ;;  %v4808_v32 = vsel %vm2456_vm6, %v2458_v15, %v2460_v63 }
 0x75a   : > { %v2226_v57 = vor.u32 %v2225_v36, %v2222_v31 }
 0x75b   : > { %v2433_v3 = vpop.permute.xlu1 %2432 }
 0x75c   : > { %v4743_v46 = vsel %vm4737_vm9, 0, %v2226_v57  ;;  %v2438_v14 = vperm.slane %v2433_v3, %v4711_v60 }
 0x75d   : > { %v2617_v35 = vshrl.u32 %v4743_v46, 16  ;;  %v2619_v18 = vshll.u32 %v4743_v46, 16 }
 0x75e   : > { %v2447_v21 = vunpack.c.l.bf16 %v2438_v14 }
 0x75f   : > { %v4748_v52 = vrot.slane %v2617_v35, 4  ;;  %v4750_v54 = vrot.slane %v2619_v18, 5  ;;  %v2621_v17 = vrot.slane %v2619_v18, 1 }
 0x760   : > { %v4752_v53 = vrot.slane %v2447_v21, 6 }
 0x761   : > { %v2622_v38 = vor.u32 %v2621_v17, %v2617_v35 }
 0x762   : > { %v4758_v27 = vsel %vm2456_vm6, %v2468_v37, %v4752_v53  ;;  %v2297_v37 = vperm.slane %v2292_v43, %v4711_v60 }
 0x764   : > { %v4792_v56 = vunpack.c.l.bf16 %v2297_v37 }
 0x76e   : > { %v2163_v59 = vpop.permute.xlu1 %2162 }
 0x76f   : > { %v2184_v33 = vadd.f32 %v3640_v61, %v2163_v59 }
 0x771   : > { %v2192_v9 = vpack.c.bf16 %v2184_v33, %v2184_v33 }
 0x773   : > { %v2208_v28 = vunpack.c.l.b16 %v2192_v9  ;;  %v3642_v9 = vld [vmem:[%s3786_s16 + $0x28] sm:$0xff] }
 0x776   : > { %v2165_v4 = vpop.permute.xlu2 %2164 }
 0x777   : > { %v2185_v5 = vadd.f32 %v3641_v29, %v2165_v4 }
 0x779   : > { %v2193_v44 = vpack.c.bf16 %v2185_v5, %v2185_v5 }
 0x77b   : > { %v2209_v16 = vunpack.c.l.b16 %v2193_v44  ;;  %v2343_v44 = vunpack.c.l.bf16 %v4743_v46 }
 0x77d   : > { %v2215_v11 = vpack.c.b16 %v2209_v16, %v2208_v28  ;;  %v2344_v28 = vunpack.c.h.bf16 %v4743_v46 }
 0x77f   : > { %v2228_v12 = vshrl.u32 %v2215_v11, 16  ;;  %v2231_v8 = vshll.u32 %v2215_v11, 16 }
 0x781   : > { %v2230_v2 = vrot.slane %v2228_v12, 3  ;;  %v2233_v20 = vrot.slane %v2231_v8, 4 }
 0x783   : > { %v4768_v0 = vor.u32 %v2233_v20, %v2230_v2 }
 0x785   : > { %v4775_v30 = vsel %vm2218_vm7, %v2226_v57, %v4768_v0 }
 0x786   : > { %v2169_v42 = vpop.permute.xlu1 %2168  ;;  %v2624_v19 = vshll.u32 %v4775_v30, 16  ;;  %v4781_v7 = vunpack.c.l.bf16 %v4775_v30  ;;  %v4784_v22 = vunpack.c.h.bf16 %v4775_v30  ;;  %v2503_v12 = vrot.slane %v4775_v30, 4 }
 0x787   : > { %v2187_v29 = vadd.f32 %v3642_v9, %v2169_v42 }
 0x788   : > { %v4788_v51 = vrot.slane %v2624_v19, 1  ;;  %v2361_v40 = vmul.f32 %v4792_v56, %v4781_v7  ;;  %v2362_v43 = vmul.f32 %v4790_v58, %v4784_v22  ;;  %v2483_v3 = vmul.f32 %v4808_v32, %v4781_v7 }
 0x789   : > { %v2484_v14 = vmul.f32 %v4805_v26, %v4784_v22  ;;  %v2195_v17 = vpack.c.bf16 %v2187_v29, %v2187_v29 }
 0x78a   : > { %v2627_v24 = vsel %vm2615_vm10, %v2622_v38, %v4788_v51  ;;  %v2369_v39 = vpack.c.bf16 %v2361_v40, %v2361_v40  ;;  %v2370_v31 = vpack.c.bf16 %v2362_v43, %v2362_v43  ;;  %v2492_v61 = vpack.c.bf16 %v2483_v3, %v2483_v3 }
 0x78b   : > { %2652 = vrot.lane.b32.xlu2 %v2627_v24, %s3661_s22  ;;  %v2493_v33 = vpack.c.bf16 %v2484_v14, %v2484_v14  ;;  %v2502_v24 = vrot.slane %v4743_v46, 4 }
 0x78c   : > { %v4817_v18 = vunpack.c.l.b16 %v2369_v39  ;;  %v4819_v21 = vunpack.c.l.b16 %v2370_v31  ;;  %v2671_v20 = vunpack.c.l.b16 %v2492_v61 }
 0x78d   : > { %v2672_v62 = vunpack.c.l.b16 %v2493_v33 }
 0x78e   : > { %v2377_v36 = vpop.permute.xlu1 %2376  ;;  %v4810_v57 = vpop.permute.xlu2 %2170 }
 0x78f   : > { %v2382_v35 = vperm.slane %v2377_v36, %v4711_v60  ;;  %v4845_v36 = vsel %vm559_vm0, %v2502_v24, %v2503_v12  ;;  %v2679_v14 = vpack.c.b16 %v2672_v62, %v2671_v20 }
 0x791   : > { %v2440_v59 = vunpack.c.l.bf16 %v2382_v35  ;;  %v2211_v35 = vunpack.c.l.b16 %v2195_v17 }
 0x793   : > { %v4824_v5 = vrot.slane %v2440_v59, 6 }
 0x795   : > { %v4830_v16 = vsel %vm2456_vm6, %v4824_v5, %v2458_v15  ;;  %v2577_v11 = vmul.f32 %v4824_v5, %v4781_v7  ;;  %v2481_v8 = vmul.f32 %v4824_v5, %v2343_v44 }
 0x796   : > { %v2167_v23 = vpop.permute.xlu0 %2166  ;;  %v2310_v10 = vpop.permute.xlu2 %2309  ;;  %v2482_v2 = vmul.f32 %v4830_v16, %v2344_v28  ;;  %v2578_v48 = vmul.f32 %v4830_v16, %v4784_v22 }
 0x797   : > { %v2586_v6 = vpack.c.bf16 %v2577_v11, %v2577_v11  ;;  %v2186_v37 = vadd.f32 %v3643_v47, %v2167_v23  ;;  %v2283_v42 = vpop.permute.xlu1 %2282  ;;  %v2490_v38 = vpack.c.bf16 %v2481_v8, %v2481_v8  ;;  %v2516_v11 = vunpack.c.h.bf16 %v4845_v36 }
 0x798   : > { %v2288_v63 = vperm.slane %v2283_v42, %v4711_v60  ;;  %v2491_v15 = vpack.c.bf16 %v2482_v2, %v2482_v2  ;;  %v2587_v39 = vpack.c.bf16 %v2578_v48, %v2578_v48  ;;  %v4856_v48 = vrot.slane %v2679_v14, 1 }
 0x799   : > { %v2194_v40 = vpack.c.bf16 %v2186_v37, %v2186_v37  ;;  %v2669_v43 = vunpack.c.l.b16 %v2490_v38  ;;  %v4847_v61 = vunpack.c.l.b16 %v2586_v6  ;;  %v2515_v42 = vunpack.c.l.bf16 %v4845_v36 }
 0x79a   : > { %v2352_v31 = vunpack.c.l.bf16 %v2288_v63  ;;  %v2670_v3 = vunpack.c.l.b16 %v2491_v15  ;;  %v4849_v33 = vunpack.c.l.b16 %v2587_v39  ;;  %v2315_v63 = vperm.slane %v2310_v10, %v4711_v60  ;;  %v3644_v10 = vld [vmem:[%s3786_s16 + $0x30] sm:$0xff] }
 0x79b   : > { %v2210_v59 = vunpack.c.l.b16 %v2194_v40  ;;  %v2628_v15 = vshrl.u32 %v4775_v30, 16  ;;  %v4879_v14 = vsel %vm2456_vm6, %v2462_v45, %v2464_v1 }
 0x79c   : > { %v4851_v9 = vmul.f32 %v2352_v31, %v2344_v28  ;;  %v2678_v46 = vpack.c.b16 %v2670_v3, %v2669_v43  ;;  %v2524_v17 = vmul.f32 %v2516_v11, %v2352_v31  ;;  %v4872_v3 = vunpack.c.l.bf16 %v5322_v13  ;;  %v3645_v13 = vld [vmem:[%s3786_s16 + $0x38] sm:$0xff]  ;;  %s3669_s16 = smov 56  }
 0x79d   : > { %v2216_v29 = vpack.c.b16 %v2211_v35, %v2210_v59  ;;  %v2188_v35 = vadd.f32 %v3644_v10, %v4810_v57  ;;  %v4896_v50 = vrot.slane %v2628_v15, 4 }
 0x79e   : > { %v2274_v23 = vpop.permute.xlu2 %2273  ;;  %v2684_v2 = vrot.slane %v2678_v46, 1  ;;  %v2532_v40 = vpack.c.bf16 %v2524_v17, %v2524_v17 }
 0x79f   : > { %v2237_v20 = vshrl.u32 %v2216_v29, 16  ;;  %v2240_v62 = vshll.u32 %v2216_v29, 16  ;;  %v2279_v28 = vperm.slane %v2274_v23, %v4711_v60  ;;  %v4891_v29 = vunpack.c.l.bf16 %v2315_v63 }
 0x7a0   : > { %v2686_v6 = vsel %vm2683_vm11, %v2684_v2, %v4856_v48  ;;  %v2710_v1 = vunpack.c.l.b16 %v2532_v40  ;;  %v2196_v17 = vpack.c.bf16 %v2188_v35, %v2188_v35  ;;  %v2368_v40 = vpack.c.bf16 %v4851_v9, %v4851_v9 }
 0x7a1   : > { %v2239_v47 = vrot.slane %v2237_v20, 3  ;;  %v2242_v37 = vrot.slane %v2240_v62, 4  ;;  %v2351_v38 = vunpack.c.l.bf16 %v2279_v28  ;;  %2693 = vrot.lane.b32.xlu0 %v2686_v6, %s3663_s15  ;;  %v2561_v28 = vmul.f32 %v2352_v31, %v4784_v22 }
 0x7a3   : > { %v4867_v24 = vor.u32 %v2242_v37, %v2239_v47  ;;  %v2359_v43 = vmul.f32 %v2351_v38, %v2343_v44  ;;  %v2523_v39 = vmul.f32 %v2515_v42, %v2351_v38  ;;  %v2560_v45 = vmul.f32 %v2351_v38, %v4781_v7 }
 0x7a5   : > { %v4886_v44 = vsel %vm2218_vm7, %v4768_v0, %v4867_v24  ;;  %v2531_v59 = vpack.c.bf16 %v2523_v39, %v2523_v39  ;;  %v2367_v39 = vpack.c.bf16 %v2359_v43, %v2359_v43  ;;  %v2568_v31 = vpack.c.bf16 %v2560_v45, %v2560_v45 }
 0x7a6   : > { %v4889_v46 = vunpack.c.l.bf16 %v4886_v44  ;;  %v4894_v49 = vunpack.c.h.bf16 %v4886_v44  ;;  %v2505_v23 = vrot.slane %v4886_v44, 4  ;;  %v2632_v63 = vshll.u32 %v4886_v44, 16 }
 0x7a7   : > { %v2709_v57 = vunpack.c.l.b16 %v2531_v59  ;;  %v2569_v43 = vpack.c.bf16 %v2561_v28, %v2561_v28 }
 0x7a8   : > { %v4902_v0 = vmul.f32 %v4891_v29, %v4889_v46  ;;  %v2562_v2 = vmul.f32 %v4792_v56, %v4889_v46  ;;  %v2563_v20 = vmul.f32 %v4790_v58, %v4894_v49  ;;  %v2485_v62 = vmul.f32 %v4879_v14, %v4889_v46 }
 0x7a9   : > { %v2717_v7 = vpack.c.b16 %v2710_v1, %v2709_v57  ;;  %v2486_v6 = vmul.f32 %v4733_v55, %v4894_v49  ;;  %v2506_v22 = vsel %vm559_vm0, %v2503_v12, %v2505_v23  ;;  %v4923_v4 = vrot.slane %v2632_v63, 1 }
 0x7aa   : > { %v2570_v47 = vpack.c.bf16 %v2562_v2, %v2562_v2  ;;  %v2571_v37 = vpack.c.bf16 %v2563_v20, %v2563_v20  ;;  %v2494_v38 = vpack.c.bf16 %v2485_v62, %v2485_v62  ;;  %v2630_v2 = vor.u32 %v2628_v15, %v4788_v51 }
 0x7ab   : > { %2721 = vrot.lane.b32.xlu1 %v2717_v7, %s3662_s28  ;;  %v2495_v10 = vpack.c.bf16 %v2486_v6, %v2486_v6  ;;  %v2517_v20 = vunpack.c.l.bf16 %v2506_v22  ;;  %v2518_v9 = vunpack.c.h.bf16 %v2506_v22  ;;  %v2636_v6 = vshrl.u32 %v4886_v44, 16 }
 0x7ac   : > { %v2809_v35 = vunpack.c.l.b16 %v2570_v47  ;;  %v2810_v59 = vunpack.c.l.b16 %v2571_v37  ;;  %v2673_v1 = vunpack.c.l.b16 %v2494_v38  ;;  %v2212_v47 = vunpack.c.l.b16 %v2196_v17 }
 0x7ad   : > { %v2674_v57 = vunpack.c.l.b16 %v2495_v10  ;;  %v2525_v12 = vmul.f32 %v2517_v20, %v4792_v56  ;;  %v2526_v45 = vmul.f32 %v2518_v9, %v4790_v58  ;;  %v4929_v37 = vunpack.c.l.b16 %v2368_v40 }
 0x7ae   : > { %v2173_v62 = vpop.permute.xlu0 %2172  ;;  %v2816_v7 = vpack.c.b16 %v2810_v59, %v2809_v35  ;;  %v4931_v51 = vunpack.c.l.b16 %v2367_v39  ;;  %v4933_v15 = vunpack.c.l.b16 %v2568_v31  ;;  %v4938_v22 = vunpack.c.l.b16 %v2569_v43 }
 0x7af   : > { %v2189_v8 = vadd.f32 %v3645_v13, %v2173_v62  ;;  %v2680_v41 = vpack.c.b16 %v2674_v57, %v2673_v1  ;;  %v2533_v10 = vpack.c.bf16 %v2525_v12, %v2525_v12  ;;  %v2534_v13 = vpack.c.bf16 %v2526_v45, %v2526_v45 }
 0x7b0   : > { %2821 = vrot.lane.b32.xlu0 %v2816_v7, %s3668_s25  ;;  %v4942_v58 = vsel %vm2615_vm10, %v2630_v2, %v4923_v4  ;;  %v2737_v56 = vrot.slane %v2636_v6, 4  ;;  %v2738_v17 = vrot.slane %v2632_v63, 5  ;;  %v2734_v31 = vrot.slane %v2624_v19, 5 }
 0x7b1   : > { %v2197_v28 = vpack.c.bf16 %v2189_v8, %v2189_v8  ;;  %v4936_v38 = vrot.slane %v2680_v41, 1  ;;  %v2711_v41 = vunpack.c.l.b16 %v2533_v10  ;;  %v2712_v8 = vunpack.c.l.b16 %v2534_v13 }
 0x7b2   : > { %v2579_v35 = vmul.f32 %v4808_v32, %v4889_v46  ;;  %v2580_v63 = vmul.f32 %v4805_v26, %v4894_v49  ;;  %v2585_v57 = vmul.f32 %v4872_v3, %v4752_v53  ;;  %v4964_v30 = vor.u32 %v2738_v17, %v2737_v56 }
 0x7b3   : > { %v2213_v40 = vunpack.c.l.b16 %v2197_v28  ;;  %v2688_v39 = vsel %vm2683_vm11, %v4856_v48, %v4936_v38  ;;  %2654 = vrot.lane.b32.xlu1 %v4942_v58, %s3661_s22  ;;  %v2718_v43 = vpack.c.b16 %v2712_v8, %v2711_v41  ;;  %v4969_v7 = vor.u32 %v2734_v31, %v4896_v50 }
 0x7b4   : > { %2695 = vrot.lane.b32.xlu2 %v2688_v39, %s3663_s15  ;;  %v2588_v12 = vpack.c.bf16 %v2579_v35, %v2579_v35  ;;  %v2589_v45 = vpack.c.bf16 %v2580_v63, %v2580_v63  ;;  %v2544_v13 = vmul.f32 %v2518_v9, %v4805_v26  ;;  %v2594_v17 = vpack.c.bf16 %v2585_v57, %v2585_v57 }
 0x7b5   : > { %v2217_v48 = vpack.c.b16 %v2213_v40, %v2212_v47  ;;  %v2543_v47 = vmul.f32 %v2517_v20, %v4808_v32  ;;  %v2740_v56 = vsel %vm2729_vm12, %v4969_v7, %v4964_v30  ;;  %v2542_v32 = vmul.f32 %v2516_v11, %v4830_v16 }
 0x7b6   : > { %v2319_v2 = vpop.permute.xlu0 %2318  ;;  %v2541_v50 = vmul.f32 %v2515_v42, %v4824_v5  ;;  %v2852_v26 = vunpack.c.l.b16 %v2588_v12  ;;  %v2853_v20 = vunpack.c.l.b16 %v2589_v45  ;;  %v2553_v8 = vpack.c.bf16 %v2544_v13, %v2544_v13 }
 0x7b7   : > { %v2246_v19 = vshrl.u32 %v2217_v48, 16  ;;  %v2249_v62 = vshll.u32 %v2217_v48, 16  ;;  %v2324_v46 = vperm.slane %v2319_v2, %v4711_v60  ;;  %v2552_v41 = vpack.c.bf16 %v2543_v47, %v2543_v47 }
 0x7b8   : > { %2723 = vrot.lane.b32.xlu0 %v2718_v43, %s3662_s28  ;;  %v4996_v35 = vunpack.c.l.b16 %v2594_v17  ;;  %v2551_v34 = vpack.c.bf16 %v2542_v32, %v2542_v32  ;;  %v2550_v63 = vpack.c.bf16 %v2541_v50, %v2541_v50  ;;  %v2860_v43 = vpack.c.b16 %v2853_v20, %v2852_v26 }
 0x7b9   : > { %v2248_v28 = vrot.slane %v2246_v19, 3  ;;  %v2251_v3 = vrot.slane %v2249_v62, 4  ;;  %v2356_v10 = vunpack.c.l.bf16 %v2324_v46  ;;  %v5009_v19 = vunpack.c.l.b16 %v2552_v41 }
 0x7ba   : > { %v5011_v62 = vunpack.c.l.b16 %v2553_v8  ;;  %v2638_v46 = vor.u32 %v2636_v6, %v4923_v4  ;;  %v5034_v13 = vunpack.c.l.b16 %v2550_v63  ;;  %v2371_v17 = vpack.c.bf16 %v4902_v0, %v4902_v0 }
 0x7bb   : > { %v2252_v40 = vor.u32 %v2251_v3, %v2248_v28  ;;  %v4977_v39 = vmul.f32 %v2356_v10, %v4894_v49  ;;  %2753 = vrot.lane.b32.xlu1 %v2740_v56, %s3664_s30  ;;  %v5036_v56 = vunpack.c.l.b16 %v2551_v34  ;;  %v5043_v32 = vrot.slane %v2860_v43, 1 }
 0x7bd   : > { %v4988_v9 = vsel %vm2218_vm7, %v4867_v24, %v2252_v40  ;;  %v4992_v49 = vsel %vm4737_vm9, %v2252_v40, 0  ;;  %v2372_v40 = vpack.c.bf16 %v4977_v39, %v4977_v39 }
 0x7be   : > { %v2350_v31 = vunpack.c.h.bf16 %v4988_v9  ;;  %v2507_v16 = vrot.slane %v4988_v9, 4  ;;  %v2337_v11 = vpop.permute.xlu0 %2336  ;;  %v5324_v36 = vrot.slane %v4992_v49, 4  ;;  %v5323_v42 = vunpack.c.h.bf16 %v4992_v49 }
 0x7bf   : > { %v2342_v5 = vperm.slane %v2337_v11, %v4711_v60  ;;  %v2640_v24 = vshll.u32 %v4988_v9, 16  ;;  %v5017_v45 = vunpack.c.l.bf16 %v4988_v9  ;;  %v2644_v8 = vshrl.u32 %v4988_v9, 16 }
 0x7c0   : > { %v5005_v48 = vsel %vm559_vm0, %v2505_v23, %v2507_v16  ;;  %v2565_v57 = vmul.f32 %v2356_v10, %v2350_v31  ;;  %v2863_v23 = vpack.c.b16 %v4996_v35, %v4996_v35  ;;  %v5028_v3 = vsel %vm559_vm0, %v2507_v16, %v5324_v36 }
 0x7c1   : > { %v5007_v2 = vunpack.c.l.bf16 %v2342_v5  ;;  %v2642_v12 = vrot.slane %v2640_v24, 1  ;;  %v2520_v47 = vunpack.c.h.bf16 %v5005_v48  ;;  %v2584_v4 = vmul.f32 %v5323_v42, %v4758_v27 }
 0x7c2   : > { %v2573_v44 = vpack.c.bf16 %v2565_v57, %v2565_v57  ;;  %v2519_v26 = vunpack.c.l.bf16 %v5005_v48  ;;  %v2522_v20 = vunpack.c.h.bf16 %v5028_v3  ;;  %v2564_v41 = vmul.f32 %v4891_v29, %v5017_v45 }
 0x7c3   : > { %v5023_v28 = vmul.f32 %v5007_v2, %v2350_v31  ;;  %v2643_v6 = vsel %vm2615_vm10, %v2638_v46, %v2642_v12  ;;  %v2546_v16 = vmul.f32 %v2520_v47, %v4733_v55  ;;  %v2521_v11 = vunpack.c.l.bf16 %v5028_v3 }
 0x7c4   : > { %2656 = vrot.lane.b32.xlu0 %v2643_v6, %s3661_s22  ;;  %2835 = vrot.lane.b32.xlu1 %v2643_v6, %s3669_s16  ;;  %v2593_v5 = vpack.c.bf16 %v2584_v4, %v2584_v4  ;;  %v2742_v34 = vrot.slane %v2640_v24, 5  ;;  %v2812_v63 = vunpack.c.l.b16 %v2573_v44  ;;  %v2572_v57 = vpack.c.bf16 %v2564_v41, %v2564_v41 }
 0x7c5   : > { %v2741_v43 = vrot.slane %v2644_v8, 4  ;;  %v2487_v48 = vmul.f32 %v4721_v25, %v5017_v45  ;;  %v5057_v46 = vmul.f32 %v2520_v47, %v2356_v10  ;;  %v2488_v6 = vmul.f32 %v4758_v27, %v2350_v31 }
 0x7c6   : > { %v2581_v1 = vmul.f32 %v4879_v14, %v5017_v45  ;;  %v2582_v9 = vmul.f32 %v4733_v55, %v2350_v31  ;;  %v2548_v4 = vmul.f32 %v2522_v20, %v4758_v27  ;;  %v2811_v24 = vunpack.c.l.b16 %v2572_v57 }
 0x7c7   : > { %v5066_v44 = vor.u32 %v2742_v34, %v2741_v43  ;;  %v2496_v41 = vpack.c.bf16 %v2487_v48, %v2487_v48  ;;  %v2497_v42 = vpack.c.bf16 %v2488_v6, %v2488_v6  ;;  %v5069_v10 = vunpack.c.l.bf16 %v4992_v49 }
 0x7c8   : > { %v2590_v59 = vpack.c.bf16 %v2581_v1, %v2581_v1  ;;  %v2591_v36 = vpack.c.bf16 %v2582_v9, %v2582_v9  ;;  %v2555_v47 = vpack.c.bf16 %v2546_v16, %v2546_v16  ;;  %v2817_v50 = vpack.c.b16 %v2812_v63, %v2811_v24 }
 0x7c9   : > { %v2744_v55 = vsel %vm2729_vm12, %v4964_v30, %v5066_v44  ;;  %v2675_v31 = vunpack.c.l.b16 %v2496_v41  ;;  %v2676_v27 = vunpack.c.l.b16 %v2497_v42  ;;  %v2583_v43 = vmul.f32 %v4721_v25, %v5069_v10 }
 0x7ca   : > { %v2854_v57 = vunpack.c.l.b16 %v2590_v59  ;;  %v2855_v34 = vunpack.c.l.b16 %v2591_v36  ;;  %v2557_v1 = vpack.c.bf16 %v2548_v4, %v2548_v4  ;;  %2823 = vrot.lane.b32.xlu2 %v2817_v50, %s3668_s25  ;;  %v2646_v48 = vor.u32 %v2644_v8, %v2642_v12  ;;  %v2328_v8 = vpop.permute.xlu2 %2327 }
 0x7cb   : > { %v2648_v16 = vshll.u32 %v4992_v49, 16  ;;  %v2545_v63 = vmul.f32 %v2519_v26, %v4879_v14  ;;  %v2681_v6 = vpack.c.b16 %v2676_v27, %v2675_v31  ;;  %v2592_v30 = vpack.c.bf16 %v2583_v43, %v2583_v43 }
 0x7cc   : > { %2755 = vrot.lane.b32.xlu0 %v2744_v55, %s3664_s30  ;;  %v2861_v9 = vpack.c.b16 %v2855_v34, %v2854_v57  ;;  %v2857_v24 = vunpack.c.l.b16 %v2593_v5  ;;  %v2527_v41 = vmul.f32 %v2519_v26, %v4891_v29  ;;  %v2773_v59 = vunpack.c.l.b16 %v2555_v47 }
 0x7cd   : > { %v2554_v42 = vpack.c.bf16 %v2545_v63, %v2545_v63  ;;  %v2547_v36 = vmul.f32 %v2521_v11, %v4721_v25  ;;  %v2689_v4 = vrot.slane %v2681_v6, 1  ;;  %v2856_v50 = vunpack.c.l.b16 %v2592_v30 }
 0x7ce   : > { %v2867_v55 = vrot.slane %v2861_v9, 1  ;;  %v2489_v12 = vmul.f32 %v4752_v53, %v5069_v10  ;;  %v5088_v14 = vrot.slane %v2648_v16, 1  ;;  %v2775_v29 = vunpack.c.l.b16 %v2557_v1 }
 0x7cf   : > { %v2772_v5 = vunpack.c.l.b16 %v2554_v42  ;;  %v2556_v31 = vpack.c.bf16 %v2547_v36, %v2547_v36  ;;  %v2536_v26 = vpack.c.bf16 %v5057_v46, %v5057_v46  ;;  %v2690_v25 = vsel %vm2683_vm11, %v4936_v38, %v2689_v4 }
 0x7d0   : > { %v2862_v47 = vpack.c.b16 %v2857_v24, %v2856_v50  ;;  %v2498_v27 = vpack.c.bf16 %v2489_v12, %v2489_v12  ;;  %2697 = vrot.lane.b32.xlu1 %v2690_v25, %s3663_s15  ;;  %v5097_v57 = vsel %vm2615_vm10, %v2646_v48, %v5088_v14  ;;  %v2535_v34 = vpack.c.bf16 %v2527_v41, %v2527_v41 }
 0x7d1   : > { %v2779_v43 = vpack.c.b16 %v2773_v59, %v2772_v5  ;;  %v2774_v63 = vunpack.c.l.b16 %v2556_v31  ;;  %v2333_v6 = vperm.slane %v2328_v8, %v4711_v60  ;;  %v2868_v1 = vsel %vm2683_vm11, %v5043_v32, %v2867_v55 }
 0x7d2   : > { %v2869_v38 = vrot.slane %v2862_v47, 1  ;;  %v2677_v46 = vunpack.c.l.b16 %v2498_v27  ;;  %v5107_v9 = vunpack.c.l.b16 %v2372_v40  ;;  %2875 = vrot.lane.b32.xlu2 %v2868_v1, %s3670_s24  ;;  %v2777_v48 = vpack.c.b16 %v5036_v56, %v5034_v13 }
 0x7d3   : > { %v2785_v60 = vrot.slane %v2779_v43, 1  ;;  %v2780_v30 = vpack.c.b16 %v2775_v29, %v2774_v63  ;;  %v5115_v24 = vunpack.c.l.b16 %v2371_v17  ;;  %v2871_v39 = vrot.slane %v2863_v23, 1 }
 0x7d4   : > { %2837 = vrot.lane.b32.xlu0 %v5097_v57, %s3669_s16  ;;  %v2870_v41 = vsel %vm2683_vm11, %v2867_v55, %v2869_v38  ;;  %v2682_v42 = vpack.c.b16 %v2677_v46, %v2677_v46  ;;  %v2714_v40 = vunpack.c.l.b16 %v2536_v26  ;;  %v2713_v59 = vunpack.c.l.b16 %v2535_v34 }
 0x7d5   : > { %v5333_v36 = vpack.c.b16 %v5011_v62, %v5009_v19  ;;  %v2787_v56 = vrot.slane %v2780_v30, 1  ;;  %v2357_v50 = vunpack.c.l.bf16 %v2333_v6  ;;  %v2374_v0 = vpack.c.bf16 %v5023_v28, %v5023_v28 }
 0x7d6   : > { %v2691_v17 = vrot.slane %v2682_v42, 1  ;;  %v5334_v12 = vrot.slane %v4992_v49, 4  ;;  %v2782_v8 = vrot.slane %v2777_v48, 1  ;;  %v5130_v35 = vsel %vm2683_vm11, %v2869_v38, %v2871_v39 }
 0x7d7   : > { %v2783_v13 = vrot.slane %v5333_v36, 1  ;;  %v2788_v5 = vsel %vm2683_vm11, %v2785_v60, %v2787_v56  ;;  %v2613_v23 = vpack.c.b16 %v5107_v9, %v5115_v24  ;;  %v2365_v31 = vmul.f32 %v2357_v50, %v5017_v45 }
 0x7d8   : > { %v2540_v55 = vunpack.c.l.bf16 %v5334_v12  ;;  %v2692_v19 = vsel %vm2683_vm11, %v2689_v4, %v2691_v17  ;;  %2877 = vrot.lane.b32.xlu1 %v2870_v41, %s3670_s24  ;;  %v2719_v28 = vpack.c.b16 %v2714_v40, %v2713_v59  ;;  %v5139_v26 = vunpack.c.l.b16 %v2374_v0  ;;  %v3450_v17 = vld [vmem:[%s5314_s10 + $0x18] sm:$0xff] }
 0x7d9   : > { %v2784_v29 = vsel %vm2683_vm11, %v2782_v8, %v2783_v13  ;;  %v2373_v47 = vpack.c.bf16 %v2365_v31, %v2365_v31  ;;  %v2529_v45 = vmul.f32 %v2521_v11, %v2357_v50  ;;  %v5335_v38 = vpack.c.b16 %v4938_v22, %v4933_v15 }
 0x7da   : > { %v2549_v62 = vmul.f32 %v2540_v55, %v4752_v53  ;;  %2725 = vrot.lane.b32.xlu2 %v2719_v28, %s3662_s28  ;;  %v2530_v53 = vmul.f32 %v2522_v20, %v5007_v2  ;;  %v2786_v20 = vsel %vm2683_vm11, %v2783_v13, %v2785_v60  ;;  %v5336_v11 = vunpack.c.h.bf16 %v4992_v49 }
 0x7db   : > { %v5148_v27 = vunpack.c.l.b16 %v2373_v47  ;;  %v2537_v6 = vpack.c.bf16 %v2529_v45, %v2529_v45  ;;  %v2566_v41 = vmul.f32 %v5069_v10, %v2357_v50  ;;  %v5337_v22 = vor.u32 %v4750_v54, %v4748_v52 }
 0x7dc   : > { %2791 = vrot.lane.b32.xlu0 %v2784_v29, %s3671_s23  ;;  %v2558_v25 = vpack.c.bf16 %v2549_v62, %v2549_v62  ;;  %v2538_v63 = vpack.c.bf16 %v2530_v53, %v2530_v53  ;;  %v2567_v46 = vmul.f32 %v5336_v11, %v5007_v2  ;;  %v2963_v2 = vld [vmem:[%s5314_s10 + $0x20] sm:$0xf]  ;;  %v2745_v39 = vshrl.u32 %v4992_v49, 16 }
 0x7dd   : > { %v2614_v43 = vpack.c.b16 %v5139_v26, %v5148_v27  ;;  %v2715_v30 = vunpack.c.l.b16 %v2537_v6  ;;  %v2574_v60 = vpack.c.bf16 %v2566_v41, %v2566_v41  ;;  %v2981_v40 = vunpack.c.l.b16 %v2963_v2 }
 0x7de   : > { %v2776_v4 = vunpack.c.l.b16 %v2558_v25  ;;  %v2716_v48 = vunpack.c.l.b16 %v2538_v63  ;;  %v2575_v42 = vpack.c.bf16 %v2567_v46, %v2567_v46  ;;  %v2747_v13 = vrot.slane %v2745_v39, 4 }
 0x7df   : > { %v2813_v59 = vunpack.c.l.b16 %v2574_v60  ;;  %v2986_v36 = vpack.c.b16 %v2981_v40, %v2981_v40  ;;  %v2748_v52 = vrot.slane %v2648_v16, 5  ;;  %v5338_v49 = vpack.c.b16 %v4849_v33, %v4847_v61  ;;  %v3449_v33 = vld [vmem:[%s5314_s10 + $0x10] sm:$0xff] }
 0x7e0   : > { %v2781_v34 = vpack.c.b16 %v2776_v4, %v2776_v4  ;;  %2819 = vrot.lane.b32.xlu1 %v5335_v38, %s3668_s25  ;;  %v2720_v15 = vpack.c.b16 %v2716_v48, %v2715_v30  ;;  %v2814_v10 = vunpack.c.l.b16 %v2575_v42  ;;  %v5339_v12 = vmov 0  }
 0x7e1   : > { %v2864_v16 = vrot.slane %v5338_v49, 1  ;;  %v2831_v55 = vrot.slane %v5339_v12, 1  ;;  %v5340_v45 = vpack.c.b16 %v4819_v21, %v4817_v18 }
 0x7e2   : > { %v2789_v1 = vrot.slane %v2781_v34, 1  ;;  %2793 = vrot.lane.b32.xlu2 %v2786_v20, %s3671_s23  ;;  %v2818_v54 = vpack.c.b16 %v2814_v10, %v2813_v59 }
 0x7e3   : > { %v2866_v0 = vsel %vm2683_vm11, %v2864_v16, %v5043_v32 }
 0x7e4   : > { %2833 = vrot.lane.b32.xlu0 %v4942_v58, %s3669_s16  ;;  %v2790_v3 = vsel %vm2683_vm11, %v2787_v56, %v2789_v1  ;;  %v2736_v58 = vsel %vm2729_vm12, %v5337_v22, %v4969_v7  ;;  %v3001_v7 = vsel %vm559_vm0, %v2986_v36, 0  ;;  %v2749_v56 = vor.u32 %v2748_v52, %v2747_v13 }
 0x7e5   : > { %3452 = vmatpush.bf16.msra.mxu2 %v3001_v7  ;;  %3006 = vmatpush.bf16.msra.mxu1 %v3001_v7  ;;  %v2653_v32 = vpop.permute.xlu2 %2652  ;;  %vm2928_vm0 = vcmask 392192  }
 0x7e6   : > { %v2750_v50 = vsel %vm2729_vm12, %v5066_v44, %v2749_v56  ;;  %v3448_v44 = vld [vmem:[%s5314_s10 + $0x8] sm:$0xff] }
 0x7e8   : > { %2795 = vrot.lane.b32.xlu1 %v2788_v5, %s3671_s23 }
 0x7e9   : > { %3453 = vmatpush.bf16.msra.mxu2 %v3450_v17  ;;  %3007 = vmatpush.bf16.msra.mxu1 %v3450_v17 }
 0x7ea   : > { %2751 = vrot.lane.b32.xlu2 %v2736_v58, %s3664_s30 }
 0x7ec   : > { %2727 = vrot.lane.b32.xlu0 %v2720_v15, %s3662_s28  ;;  %v5341_v15 = vpack.c.b16 %v4929_v37, %v4931_v51 }
 0x7ed   : > { %3454 = vmatpush.bf16.msra.mxu2 %v3449_v33  ;;  %3008 = vmatpush.bf16.msra.mxu1 %v3449_v33 }
 0x7ee   : > { %v2883_v22 = vsel %vm546_vm2, %v5341_v15, %v2653_v32 }
 0x7f0   : > { %2699 = vrot.lane.b32.xlu1 %v2692_v19, %s3663_s15 }
 0x7f1   : > { %3455 = vmatpush.bf16.msra.mxu2 %v3448_v44  ;;  %3009 = vmatpush.bf16.msra.mxu1 %v3448_v44 }
 0x7f2   : > { %2658 = vrot.lane.b32.xlu2 %v5097_v57, %s3661_s22  ;;  %v2827_v57 = vor.u32 %v2745_v39, %v5088_v14 }
 0x7f4   : > { %2825 = vrot.lane.b32.xlu0 %v2818_v54, %s3668_s25  ;;  %v2832_v61 = vsel %vm2615_vm10, %v2827_v57, %v2831_v55 }
 0x7f8   : > { %2757 = vrot.lane.b32.xlu1 %v2750_v50, %s3664_s30 }
 0x7fa   : > { %2873 = vrot.lane.b32.xlu2 %v2866_v0, %s3670_s24 }
 0x800   : > { %2839 = vrot.lane.b32.xlu1 %v2832_v61, %s3669_s16 }
 0x802   : > { %2797 = vrot.lane.b32.xlu2 %v2790_v3, %s3671_s23 }
 0x80a   : > { %2879 = vrot.lane.b32.xlu2 %v5130_v35, %s3670_s24  ;;  %v3447_v35 = vld [vmem:[%s5314_s10] sm:$0xff] }
 0x80b   : > { %3456 = vmatpush.bf16.msra.mxu2 %v3447_v35  ;;  %3010 = vmatpush.bf16.msra.mxu1 %v3447_v35 }
 0x80e   : > { %v2696_v5 = vpop.permute.xlu2 %2695 }
 0x813   : > { %v2694_v14 = vpop.permute.xlu0 %2693 }
 0x814   : > { %v2895_v60 = vsel %vm2893_vm13, %v2883_v22, %v2694_v14 }
 0x81d   : > { %v2722_v8 = vpop.permute.xlu1 %2721 }
 0x81e   : > { %v2904_v2 = vsel %vm2902_vm14, %v2895_v60, %v2722_v8 }
 0x822   : > { %v2822_v19 = vpop.permute.xlu0 %2821 }
 0x824   : > { %v2824_v62 = vpop.permute.xlu2 %2823 }
 0x825   : > { %v2655_v31 = vpop.permute.xlu1 %2654 }
 0x826   : > { %v2886_v4 = vsel %vm546_vm2, %v5340_v45, %v2655_v31 }
 0x827   : > { %v2897_v63 = vsel %vm2893_vm13, %v2886_v4, %v2696_v5 }
 0x82a   : > { %v2724_v28 = vpop.permute.xlu0 %2723 }
 0x82b   : > { %v2906_v6 = vsel %vm2902_vm14, %v2897_v63, %v2724_v28 }
 0x82c   : > { %v2876_v29 = vpop.permute.xlu2 %2875 }
 0x82d   : > { %v2754_v25 = vpop.permute.xlu1 %2753 }
 0x82e   : > { %v2914_v38 = vsel %vm616_vm1, %v2906_v6, %v2754_v25 }
 0x834   : > { %v2726_v53 = vpop.permute.xlu2 %2725 }
 0x836   : > { %v2657_v47 = vpop.permute.xlu0 %2656  ;;  %v2836_v34 = vpop.permute.xlu1 %2835 }
 0x837   : > { %v2889_v59 = vsel %vm546_vm2, %v2613_v23, %v2657_v47 }
 0x83c   : > { %v2794_v20 = vpop.permute.xlu2 %2793 }
 0x83d   : > { %v2923_v3 = vsel %vm2919_vm15, %v2914_v38, %v2794_v20 }
 0x83e   : > { %v2756_v1 = vpop.permute.xlu0 %2755  ;;  %v2932_v18 = vsel %vm2928_vm0, %v2923_v3, %v2822_v19 }
 0x83f   : > { %v2941_v21 = vsel %vm2937_vm3, %v2932_v18, %v2836_v34 }
 0x840   : > { %v2950_v11 = vsel %vm2946_vm4, %v2941_v21, %v2876_v29 }
 0x841   : > { %3424 = vmatmul.msk.bf16.vlgmr.msra.gmra.mxu2 %vm2991_vm5, %v2950_v11 }
 0x842   : > { %v2698_v46 = vpop.permute.xlu1 %2697 }
 0x843   : > { %v2899_v51 = vsel %vm2893_vm13, %v2889_v59, %v2698_v46 }
 0x844   : > { %v2752_v30 = vpop.permute.xlu2 %2751  ;;  %v2908_v7 = vsel %vm2902_vm14, %v2899_v51, %v2726_v53 }
 0x845   : > { %v2912_v10 = vsel %vm616_vm1, %v2904_v2, %v2752_v30  ;;  %v2916_v50 = vsel %vm616_vm1, %v2908_v7, %v2756_v1 }
 0x846   : > { %v2838_v48 = vpop.permute.xlu0 %2837 }
 0x84a   : > { %v2878_v41 = vpop.permute.xlu1 %2877 }
 0x84c   : > { %v2659_v58 = vpop.permute.xlu2 %2658 }
 0x84d   : > { %v2892_v0 = vsel %vm546_vm2, %v2614_v43, %v2659_v58 }
 0x84e   : > { %v2792_v42 = vpop.permute.xlu0 %2791 }
 0x84f   : > { %v2921_v39 = vsel %vm2919_vm15, %v2912_v10, %v2792_v42 }
 0x852   : > { %v2820_v40 = vpop.permute.xlu1 %2819 }
 0x853   : > { %v2930_v36 = vsel %vm2928_vm0, %v2921_v39, %v2820_v40 }
 0x854   : > { %v2874_v13 = vpop.permute.xlu2 %2873 }
 0x856   : > { %v2834_v37 = vpop.permute.xlu0 %2833 }
 0x857   : > { %v2939_v52 = vsel %vm2937_vm3, %v2930_v36, %v2834_v37 }
 0x858   : > { %v2948_v54 = vsel %vm2946_vm4, %v2939_v52, %v2874_v13 }
 0x859   : > { %3423 = vmatmul.msk.bf16.vlgmr.msra.gmra.mxu1 %vm2991_vm5, %v2948_v54 }
 0x85a   : > { %v2796_v56 = vpop.permute.xlu1 %2795 }
 0x85b   : > { %v2925_v9 = vsel %vm2919_vm15, %v2916_v50, %v2796_v56 }
 0x85c   : > { %v2934_v24 = vsel %vm2928_vm0, %v2925_v9, %v2824_v62  ;;  %v2798_v12 = vpop.permute.xlu2 %2797 }
 0x85d   : > { %v2943_v23 = vsel %vm2937_vm3, %v2934_v24, %v2838_v48  ;;  %v3672_v48 = vmov 2048.0  }
 0x85e   : > { %v2952_v49 = vsel %vm2946_vm4, %v2943_v23, %v2878_v41  ;;  %v2728_v17 = vpop.permute.xlu0 %2727  ;;  %3634 = vrcp.f32 %v3672_v48 }
 0x85f   : > { %3425 = vmatmul.msk.bf16.gmra.mxu2 %vm2991_vm5, %v2952_v49 }
 0x862   : > { %v2700_v16 = vpop.permute.xlu1 %2699 }
 0x863   : > { %v2901_v57 = vsel %vm2893_vm13, %v2892_v0, %v2700_v16 }
 0x864   : > { %v2910_v61 = vsel %vm2902_vm14, %v2901_v57, %v2728_v17  ;;  %v2880_v5 = vpop.permute.xlu2 %2879  ;;  %v3635_v30 = vpop.eup %3634 }
 0x865   : > { %v3057_v41 = vmul.f32 2048.0, %v3635_v30  ;;  %vm3061_vm2 = vweird.f32 %v3635_v30 }
 0x866   : > { %v2826_v44 = vpop.permute.xlu0 %2825 }
 0x867   : > { %v3058_v42 = vsub.f32 1.0, %v3057_v41 }
 0x869   : > { %v3059_v60 = vmul.f32 %v3635_v30, %v3058_v42  ;;  %v3505_v42 = vld [vmem:[%s5316_s12] ss:$0 sm:$0xff] }
 0x86a   : > { %v2758_v55 = vpop.permute.xlu1 %2757 }
 0x86b   : > { %v2918_v33 = vsel %vm616_vm1, %v2910_v61, %v2758_v55  ;;  %v3060_v39 = vadd.f32 %v3635_v30, %v3059_v60 }
 0x86c   : > { %v2927_v32 = vsel %vm2919_vm15, %v2918_v33, %v2798_v12 }
 0x86d   : > { %v2936_v14 = vsel %vm2928_vm0, %v2927_v32, %v2826_v44  ;;  %v3062_v36 = vsel %vm3061_vm2, %v3635_v30, %v3060_v39 }
 0x872   : > { %v2840_v8 = vpop.permute.xlu1 %2839 }
 0x873   : > { %v2945_v26 = vsel %vm2937_vm3, %v2936_v14, %v2840_v8 }
 0x874   : > { %v2954_v27 = vsel %vm2946_vm4, %v2945_v26, %v2880_v5 }
 0x875   : > { %3426 = vmatmul.msk.bf16.gmra.mxu2 %vm2991_vm5, %v2954_v27 }
 0x8c4   : > { %v3017_v43 = vpop.f32.mrf.mxu2 }
 0x8c5   : > { %v3035_v53 = vsel %vm616_vm1, %v3017_v43, 0.0 }
 0x8cc   : > { %v3019_v35 = vpop.f32.mrf.mxu2 }
 0x8cd   : > { %v3037_v4 = vsel %vm616_vm1, %v3019_v35, 0.0 }
 0x8d6   : > { %v3012_v19 = vpop.f32.mrf.mxu1 }
 0x8d7   : > { %v3032_v29 = vsel %vm616_vm1, %v3012_v19, 0.0 }
 0x8de   : > { %v3014_v31 = vpop.f32.mrf.mxu1 }
 0x8df   : > { %v3033_v28 = vsel %vm616_vm1, %v3014_v31, 0.0 }
 0x8e0   : > { %v3034_v25 = vadd.f32 %v3033_v28, %v3032_v29 }
 0x8e2   : > { %v3022_v62 = vpop.f32.mrf.mxu2  ;;  %v3036_v45 = vadd.f32 %v3035_v53, %v3034_v25 }
 0x8e3   : > { %v3039_v6 = vsel %vm616_vm1, %v3022_v62, 0.0 }
 0x8e4   : > { %v3038_v34 = vadd.f32 %v3037_v4, %v3036_v45 }
 0x8e6   : > { %v3040_v1 = vadd.f32 %v3039_v6, %v3038_v34 }
 0x8ea   : > { %v3024_v47 = vpop.f32.mrf.mxu2 }
 0x8eb   : > { %v3041_v38 = vsel %vm616_vm1, %v3024_v47, 0.0 }
 0x8ec   : > { %v3042_v3 = vadd.f32 %v3041_v38, %v3040_v1 }
 0x8f8   : > { %v3027_v63 = vpop.f32.mrf.mxu2 }
 0x8f9   : > { %v3043_v20 = vsel %vm616_vm1, %v3027_v63, 0.0 }
 0x8fa   : > { %v3044_v18 = vadd.f32 %v3043_v20, %v3042_v3 }
 0x900   : > { %v3029_v21 = vpop.f32.mrf.mxu2 }
 0x901   : > { %v3045_v11 = vsel %vm616_vm1, %v3029_v21, 0.0 }
 0x902   : > { %v3046_v46 = vadd.f32 %v3045_v11, %v3044_v18 }
 0x904   : > { %3047 = vadd.xlane.f32.xlu0 %v3046_v46 }
 0x977   : > { %v3048_v15 = vpop.xlane.xlu0 %3047 }
 0x978   : > { %v3049_v22 = vrot.slane %v3048_v15, 4 }
 0x97a   : > { %v3050_v58 = vadd.f32 %v3049_v22, %v3048_v15 }
 0x97c   : > { %v3051_v2 = vrot.slane %v3050_v58, 2 }
 0x97e   : > { %v3052_v10 = vadd.f32 %v3051_v2, %v3050_v58 }
 0x980   : > { %v3053_v40 = vrot.slane %v3052_v10, 1 }
 0x982   : > { %v3054_v59 = vadd.f32 %v3053_v40, %v3052_v10 }
 0x984   : > { %3457 = vpush %v3054_v59 }
 0x985   : > { %3459 = vpush %v3062_v36 }
 0x9b5   : > { %s3458_s25 = spop %3457 }
 0x9b6   : > { %s5268_s16 = spop %3459 }
 0x9b7   : > { %s3064_s24 = smul.f32 %s5268_s16, %s3458_s25 }
 0x9b9   : > { %v3065_v37 = vstv %s3064_s24 }
 0x9ba   : > { %v3066_v51 = vsub.f32 %v3012_v19, %v3065_v37  ;;  %v3067_v13 = vsub.f32 %v3014_v31, %v3065_v37  ;;  %v3068_v52 = vsub.f32 %v3017_v43, %v3065_v37  ;;  %v3069_v54 = vsub.f32 %v3019_v35, %v3065_v37 }
 0x9bb   : > { %v3070_v7 = vsub.f32 %v3022_v62, %v3065_v37  ;;  %v3071_v24 = vsub.f32 %v3024_v47, %v3065_v37  ;;  %v3072_v17 = vsub.f32 %v3027_v63, %v3065_v37  ;;  %v3073_v61 = vsub.f32 %v3029_v21, %v3065_v37  ;;  %v3504_v21 = vld [vmem:[%s5315_s11] ss:$0 sm:$0xff] }
 0x9bc   : > { %v3074_v56 = vmul.f32 %v3066_v51, %v3066_v51  ;;  %v3075_v50 = vmul.f32 %v3067_v13, %v3067_v13  ;;  %v3076_v9 = vmul.f32 %v3068_v52, %v3068_v52  ;;  %v3077_v23 = vmul.f32 %v3069_v54, %v3069_v54 }
 0x9bd   : > { %v3078_v57 = vmul.f32 %v3070_v7, %v3070_v7  ;;  %v3079_v33 = vmul.f32 %v3071_v24, %v3071_v24  ;;  %v3080_v14 = vmul.f32 %v3072_v17, %v3072_v17  ;;  %v3081_v26 = vmul.f32 %v3073_v61, %v3073_v61 }
 0x9be   : > { %v3082_v49 = vsel %vm616_vm1, %v3074_v56, 0.0  ;;  %v3083_v16 = vsel %vm616_vm1, %v3075_v50, 0.0  ;;  %v3085_v12 = vsel %vm616_vm1, %v3076_v9, 0.0  ;;  %v3087_v32 = vsel %vm616_vm1, %v3077_v23, 0.0 }
 0x9bf   : > { %v3084_v0 = vadd.f32 %v3083_v16, %v3082_v49  ;;  %v3089_v8 = vsel %vm616_vm1, %v3078_v57, 0.0  ;;  %v3091_v27 = vsel %vm616_vm1, %v3079_v33, 0.0  ;;  %v3093_v35 = vsel %vm616_vm1, %v3080_v14, 0.0 }
 0x9c0   : > { %v3095_v62 = vsel %vm616_vm1, %v3081_v26, 0.0 }
 0x9c1   : > { %v3086_v55 = vadd.f32 %v3085_v12, %v3084_v0 }
 0x9c3   : > { %v3088_v44 = vadd.f32 %v3087_v32, %v3086_v55 }
 0x9c5   : > { %v3090_v5 = vadd.f32 %v3089_v8, %v3088_v44 }
 0x9c7   : > { %v3092_v43 = vadd.f32 %v3091_v27, %v3090_v5 }
 0x9c9   : > { %v3094_v19 = vadd.f32 %v3093_v35, %v3092_v43 }
 0x9cb   : > { %v3096_v31 = vadd.f32 %v3095_v62, %v3094_v19 }
 0x9cd   : > { %3097 = vadd.xlane.f32.xlu1 %v3096_v31 }
 0xa40   : > { %v3098_v28 = vpop.xlane.xlu1 %3097 }
 0xa41   : > { %v3099_v29 = vrot.slane %v3098_v28, 4 }
 0xa43   : > { %v3100_v25 = vadd.f32 %v3099_v29, %v3098_v28 }
 0xa45   : > { %v3101_v47 = vrot.slane %v3100_v25, 2 }
 0xa47   : > { %v3102_v53 = vadd.f32 %v3101_v47, %v3100_v25 }
 0xa49   : > { %v3103_v45 = vrot.slane %v3102_v53, 1 }
 0xa4b   : > { %v3104_v4 = vadd.f32 %v3103_v45, %v3102_v53 }
 0xa4d   : > { %3461 = vpush %v3104_v4 }
 0xa7e   : > { %s3462_s23 = spop %3461 }
 0xa7f   : > { %s3114_s26 = smul.f32 %s3462_s23, %s5268_s16 }
 0xa81   : > { %s3115_s27 = sadd.f32 1e-05, %s3114_s26 }
 0xa83   : > { %v3116_v34 = vstv %s3115_s27 }
 0xa84   : > { %3636 = vrsqrt.f32 %v3116_v34  ;;  %vm3123_vm7 = vweird.f32 %v3116_v34 }
 0xa8a   : > { %v3637_v63 = vpop.eup %3636 }
 0xa8b   : > { %v3118_v6 = vmul.f32 %v3637_v63, %v3116_v34  ;;  %vm3124_vm6 = vweird.f32 %v3637_v63 }
 0xa8c   : > { %vm3125_vm8 = vmor %vm3123_vm7, %vm3124_vm6 }
 0xa8d   : > { %v3119_v1 = vmul.f32 %v3637_v63, %v3118_v6 }
 0xa8f   : > { %v3120_v38 = vmul.f32 0.5, %v3119_v1 }
 0xa91   : > { %v3121_v20 = vsub.f32 1.5, %v3120_v38 }
 0xa93   : > { %v3122_v3 = vmul.f32 %v3637_v63, %v3121_v20 }
 0xa95   : > { %v3126_v18 = vsel %vm3125_vm8, %v3637_v63, %v3122_v3 }
 0xa96   : > { %3463 = vpush %v3126_v18 }
 0xac7   : > { %s3464_s28 = spop %3463 }
 0xac8   : > { %v3128_v11 = vstv %s3464_s28 }
 0xac9   : > { %v3129_v46 = vmul.f32 %v3128_v11, %v3066_v51  ;;  %v3130_v48 = vmul.f32 %v3128_v11, %v3067_v13  ;;  %v3131_v30 = vmul.f32 %v3128_v11, %v3068_v52  ;;  %v3132_v41 = vmul.f32 %v3128_v11, %v3069_v54 }
 0xaca   : > { %v3133_v15 = vmul.f32 %v3128_v11, %v3070_v7  ;;  %v3134_v22 = vmul.f32 %v3128_v11, %v3071_v24  ;;  %v3135_v58 = vmul.f32 %v3128_v11, %v3072_v17  ;;  %v3136_v60 = vmul.f32 %v3128_v11, %v3073_v61 }
 0xacb   : > { %v3141_v2 = vmul.f32 %v3504_v21, %v3129_v46  ;;  %v3142_v10 = vmul.f32 %v3504_v21, %v3130_v48  ;;  %v3143_v39 = vmul.f32 %v3504_v21, %v3131_v30  ;;  %v3144_v40 = vmul.f32 %v3504_v21, %v3132_v41 }
 0xacc   : > { %v3145_v59 = vmul.f32 %v3504_v21, %v3133_v15  ;;  %v3146_v36 = vmul.f32 %v3504_v21, %v3134_v22  ;;  %v3147_v37 = vmul.f32 %v3504_v21, %v3135_v58  ;;  %v3148_v51 = vmul.f32 %v3504_v21, %v3136_v60 }
 0xacd   : > { %v3153_v13 = vadd.f32 %v3505_v42, %v3141_v2  ;;  %v3154_v52 = vadd.f32 %v3505_v42, %v3142_v10  ;;  %v3155_v54 = vadd.f32 %v3505_v42, %v3143_v39  ;;  %v3156_v56 = vadd.f32 %v3505_v42, %v3144_v40 }
 0xace   : > { %v3157_v50 = vadd.f32 %v3505_v42, %v3145_v59  ;;  %v3158_v9 = vadd.f32 %v3505_v42, %v3146_v36  ;;  %v3159_v23 = vadd.f32 %v3505_v42, %v3147_v37  ;;  %v3160_v7 = vadd.f32 %v3505_v42, %v3148_v51 }
 0xacf   : > { %vm3161_vm9 = vcmp.ge.f32.partialorder %v3153_v13, 0.0  ;;  %vm3162_vm10 = vcmp.ge.f32.partialorder %v3154_v52, 0.0  ;;  %vm3163_vm11 = vcmp.ge.f32.partialorder %v3155_v54, 0.0  ;;  %vm3164_vm12 = vcmp.ge.f32.partialorder %v3156_v56, 0.0 }
 0xad0   : > { %vm3165_vm13 = vcmp.ge.f32.partialorder %v3157_v50, 0.0  ;;  %v3169_v24 = vmul.f32 0.01, %v3153_v13  ;;  %v3170_v49 = vmul.f32 0.01, %v3154_v52  ;;  %vm3166_vm14 = vcmp.ge.f32.partialorder %v3158_v9, 0.0 }
 0xad1   : > { %v3171_v16 = vmul.f32 0.01, %v3155_v54  ;;  %v3172_v0 = vmul.f32 0.01, %v3156_v56  ;;  %v3173_v17 = vmul.f32 0.01, %v3157_v50 }
 0xad2   : > { %v3174_v57 = vmul.f32 0.01, %v3158_v9  ;;  %v3175_v12 = vmul.f32 0.01, %v3159_v23  ;;  %v3177_v55 = vsel %vm3161_vm9, %v3153_v13, %v3169_v24  ;;  %v3178_v61 = vsel %vm3162_vm10, %v3154_v52, %v3170_v49 }
 0xad3   : > { %vm3167_vm15 = vcmp.ge.f32.partialorder %v3159_v23, 0.0  ;;  %v3176_v33 = vmul.f32 0.01, %v3160_v7  ;;  %v3179_v32 = vsel %vm3163_vm11, %v3155_v54, %v3171_v16  ;;  %v3180_v44 = vsel %vm3164_vm12, %v3156_v56, %v3172_v0  ;;  %3185 = vst.msk [vmem:[%s509_s20] sm:$0xff] %vm616_vm1, %v3177_v55 }
 0xad4   : > { %vm3168_vm0 = vcmp.ge.f32.partialorder %v3160_v7, 0.0  ;;  %v3181_v14 = vsel %vm3165_vm13, %v3157_v50, %v3173_v17  ;;  %3186 = vst.msk [vmem:[%s509_s20 + $0x8] sm:$0xff] %vm616_vm1, %v3178_v61  ;;  %v3182_v8 = vsel %vm3166_vm14, %v3158_v9, %v3174_v57  ;;  %v3183_v5 = vsel %vm3167_vm15, %v3159_v23, %v3175_v12 }
 0xad5   : > { %3187 = vst.msk [vmem:[%s509_s20 + $0x10] sm:$0xff] %vm616_vm1, %v3179_v32  ;;  %v3184_v26 = vsel %vm3168_vm0, %v3160_v7, %v3176_v33 }
 0xad6   : > { %3188 = vst.msk [vmem:[%s509_s20 + $0x18] sm:$0xff] %vm616_vm1, %v3180_v44 }
 0xad7   : > { %3189 = vst.msk [vmem:[%s509_s20 + $0x20] sm:$0xff] %vm616_vm1, %v3181_v14 }
 0xad8   : > { %3190 = vst.msk [vmem:[%s509_s20 + $0x28] sm:$0xff] %vm616_vm1, %v3182_v8 }
 0xad9   : > { %3191 = vst.msk [vmem:[%s509_s20 + $0x30] sm:$0xff] %vm616_vm1, %v3183_v5 }
 0xada   : > { %3192 = vst.msk [vmem:[%s509_s20 + $0x38] sm:$0xff] %vm616_vm1, %v3184_v26 }
 0xadb PF: > { %s25_s29 = sadd.s32 1, %s3652_s29  }
 0xadc   : > { %p22_p4 = scmp.ge.s32.totalorder %s25_s29, 4  }
 0xade   :  { %24 = sbr.rel (!%p22_p4) target bundleno = 1 (0x1), region = 120 }

</bundles_post_ra>
